<compile_context>
chip_gen: v6e
topology: v6e:2x2x1
jax: 0.10.0
libtpu: 0.0.40
codegen_flags: <defaults>
</compile_context>

<pallas_src>
import jax
import jax.numpy as jnp
from jax import lax
from jax.experimental import pallas as pl
from jax.experimental.pallas import tpu as pltpu


# ----------------------------- Pallas kernel --------------------------------
def rnn_mimick_kernel(x_ref,       # (T*Bg, E)  char embeddings for one group, time-major rows
                      wih_ref,     # (E, 8C)    [Wih_fwd | Wih_bwd], pre-transposed (in, out)
                      b_ref,       # (1, 8C)    [b_fwd | b_bwd]  (b_ih + b_hh folded)
                      whh_f_ref,   # (C, 4C)    forward hidden->hidden
                      w1f_ref,     # (C, H)     proj[0] weight rows for forward half
                      w1b_ref,     # (C, H)     proj[0] weight rows for backward half
                      b1_ref,      # (1, H)
                      w2_ref,      # (H, Wp)    proj[2] weight, output lanes padded to 128
                      b2_ref,      # (1, Wp)
                      out_ref,     # (Bg, Wp)
                      gates_scr):  # scratch VMEM (T*Bg, 4C): forward gate pre-activations
    TB, _E = x_ref.shape
    Bg = out_ref.shape[0]
    T = TB // Bg
    C = whh_f_ref.shape[0]

    # ---- hoisted input projection: one matmul covers both directions -------
    gates_all = (jnp.dot(x_ref[...], wih_ref[...],
                         preferred_element_type=jnp.float32)
                 + b_ref[...])                               # (T*Bg, 8C)
    gates_scr[...] = gates_all[:, :4 * C]                    # forward gates precompute

    # ---- backward direction at output index T-1 (zero initial state) -------
    # h0 @ Whh_b == 0 and f_gate * c0 == 0, so neither is computed.
    gb = gates_all[TB - Bg:, 4 * C:]                         # (Bg, 4C) last timestep, bwd gates
    i_b = jax.nn.sigmoid(gb[:, 0 * C:1 * C])
    g_b = jnp.tanh(gb[:, 2 * C:3 * C])
    o_b = jax.nn.sigmoid(gb[:, 3 * C:4 * C])
    h_bwd = o_b * jnp.tanh(i_b * g_b)                        # (Bg, C)

    # ---- forward direction: full recurrence over T steps (unrolled) --------
    whh_f = whh_f_ref[...]
    h0 = jnp.zeros((Bg, C), jnp.float32)
    c0 = jnp.zeros((Bg, C), jnp.float32)

    def body(t, carry):
        h, c = carry
        row = pl.multiple_of(t * Bg, Bg)
        gates = gates_scr[pl.ds(row, Bg), :] + jnp.dot(
            h, whh_f, preferred_element_type=jnp.float32)    # (Bg, 4C)
        i_g = jax.nn.sigmoid(gates[:, 0 * C:1 * C])
        f_g = jax.nn.sigmoid(gates[:, 1 * C:2 * C])
        g_g = jnp.tanh(gates[:, 2 * C:3 * C])
        o_g = jax.nn.sigmoid(gates[:, 3 * C:4 * C])
        c_new = f_g * c + i_g * g_g
        h_new = o_g * jnp.tanh(c_new)
        return h_new, c_new

    h_fwd, _ = lax.fori_loop(0, T, body, (h0, c0), unroll=True)

    # ---- projection MLP: Linear -> Tanh -> Linear (concat-free) -------------
    hid = jnp.tanh(
        jnp.dot(h_fwd, w1f_ref[...], preferred_element_type=jnp.float32)
        + jnp.dot(h_bwd, w1b_ref[...], preferred_element_type=jnp.float32)
        + b1_ref[...])                                       # (Bg, H)
    out_ref[...] = (jnp.dot(hid, w2_ref[...], preferred_element_type=jnp.float32)
                    + b2_ref[...])                           # (Bg, Wp)


# ------------------------------- wrapper -------------------------------------
def rnn_mimick_forward(x_bte, params, group_size=8):
    """x_bte: (B, T, E) float32 char embeddings (batch-first, like PyTorch)."""
    B, T, E = x_bte.shape
    assert B % group_size == 0, "batch must be divisible by group_size"
    G = B // group_size
    Bg = group_size
    C = params["whh_f"].shape[0]
    W = params["w2"].shape[1]
    Wp = ((W + 127) // 128) * 128

    # Layout-only parameter prep (outside the kernel, done once per call).
    wih = jnp.concatenate([params["wih_f"], params["wih_b"]], axis=1)  # (E, 8C)
    b = jnp.concatenate([params["b_f"], params["b_b"]], axis=1)        # (1, 8C)
    w1f = params["w1"][:C]                                             # (C, H)
    w1b = params["w1"][C:]                                             # (C, H)
    w2 = jnp.pad(params["w2"], ((0, 0), (0, Wp - W)))                  # (H, Wp)
    b2 = jnp.pad(params["b2"], ((0, 0), (0, Wp - W)))                  # (1, Wp)

    # (B,T,E) -> (G, T*Bg, E): time-major rows within each word group.
    x = x_bte.reshape(G, Bg, T, E).transpose(0, 2, 1, 3).reshape(G, T * Bg, E)
    TB = T * Bg

    def wspec(shape):  # weights: same block every grid step -> stay VMEM-resident
        return pl.BlockSpec(shape, lambda g, _n=len(shape): (0,) * _n)

    out = pl.pallas_call(
        rnn_mimick_kernel,
        out_shape=jax.ShapeDtypeStruct((G, Bg, Wp), jnp.float32),
        grid=(G,),
        in_specs=[
            pl.BlockSpec((None, TB, E), lambda g: (g, 0, 0)),          # x slab per group
            wspec(wih.shape), wspec(b.shape), wspec(params["whh_f"].shape),
            wspec(w1f.shape), wspec(w1b.shape), wspec(params["b1"].shape),
            wspec(w2.shape), wspec(b2.shape),
        ],
        out_specs=pl.BlockSpec((None, Bg, Wp), lambda g: (g, 0, 0)),
        scratch_shapes=[pltpu.VMEM((TB, 4 * C), jnp.float32)],
        compiler_params=pltpu.CompilerParams(
            dimension_semantics=("parallel",)),
    )(x, wih, b, params["whh_f"], w1f, w1b, params["b1"], w2, b2)

    return out.reshape(B, Wp)[:, :W]


# --------------------------- plain-JAX reference -----------------------------
def reference_forward(x_bte, params):
    B, T, _E = x_bte.shape
    C = params["whh_f"].shape[0]

    def step(x_t, h, c, wih, whh, bias):
        gates = x_t @ wih + h @ whh + bias
        i = jax.nn.sigmoid(gates[:, 0 * C:1 * C])
        f = jax.nn.sigmoid(gates[:, 1 * C:2 * C])
        g = jnp.tanh(gates[:, 2 * C:3 * C])
        o = jax.nn.sigmoid(gates[:, 3 * C:4 * C])
        c = f * c + i * g
        h = o * jnp.tanh(c)
        return h, c

    h = jnp.zeros((B, C), jnp.float32)
    c = jnp.zeros((B, C), jnp.float32)
    for t in range(T):
        h, c = step(x_bte[:, t], h, c, params["wih_f"], params["whh_f"], params["b_f"])
    h0 = jnp.zeros((B, C), jnp.float32)
    c0 = jnp.zeros((B, C), jnp.float32)
    h_b, _ = step(x_bte[:, T - 1], h0, c0,
                  params["wih_b"], params["whh_b"], params["b_b"])
    feat = jnp.concatenate([h, h_b], axis=-1)
    hid = jnp.tanh(feat @ params["w1"] + params["b1"])
    return hid @ params["w2"] + params["b2"]


# ------------------------- python glue: word2chars ---------------------------
def word2chars(word_indices, itos, ctoi):
    """word indices -> padded char-index matrix (B, max_len), padding=0,
    rows sorted by decreasing length (mirrors the PyTorch pad_sequence glue)."""
    words = [itos[int(w)] for w in word_indices]
    char_ids = [[ctoi[c] for c in w] for w in words]
    char_ids = sorted(char_ids, key=lambda s: -len(s))
    max_len = len(char_ids[0])
    out = [row + [0] * (max_len - len(row)) for row in char_ids]
    return jnp.asarray(out, dtype=jnp.int32)      # (B, T)


# --------------------------------- main --------------------------------------
if __name__ == "__main__":
    # Hyper-parameters (small, lane-friendly where it matters).
    char_embed = 32      # E
    cell_size = 128      # C  (LSTM hidden per direction)
    hidden_size = 128    # H
    word_embed = 64      # W
    char_size = 40       # character vocabulary (index 0 = padding)

    # Deterministic vocabulary: 16 words -> 2 word groups of 8 for the grid.
    vocab = ["bridges", "mimicks", "alphabet", "delta", "gamma", "echo",
             "cat", "hi", "foxtrot", "uniform", "kilo", "lima",
             "november", "oscar", "papa", "quebec"]
    itos = {i: w for i, w in enumerate(vocab)}
    chars = sorted(set("".join(vocab)))
    ctoi = {c: i + 1 for i, c in enumerate(chars)}          # 0 reserved for padding
    assert len(ctoi) + 1 <= char_size

    key = jax.random.PRNGKey(0)
    ks = jax.random.split(key, 12)

    def init(k, shape, scale=0.1):
        return scale * jax.random.normal(k, shape, dtype=jnp.float32)

    # Embedding table (padding_idx=0 -> zero row).
    emb_table = init(ks[0], (char_size, char_embed)).at[0].set(0.0)

    C = cell_size
    params = {
        # LSTM weights stored pre-transposed: (in, 4C); gate order i,f,g,o.
        "wih_f": init(ks[1], (char_embed, 4 * C)),
        "whh_f": init(ks[2], (C, 4 * C)),
        "b_f":   init(ks[3], (1, 4 * C)),          # b_ih + b_hh folded
        "wih_b": init(ks[4], (char_embed, 4 * C)),
        "whh_b": init(ks[5], (C, 4 * C)),          # reference only: zero-state step => dead math
        "b_b":   init(ks[6], (1, 4 * C)),
        # proj: Linear(2C -> H), Tanh, Linear(H -> W); weights stored (in, out)
        "w1": init(ks[7], (2 * C, hidden_size)),
        "b1": init(ks[8], (1, hidden_size)),
        "w2": init(ks[9], (hidden_size, word_embed)),
        "b2": init(ks[10], (1, word_embed)),
    }

    # Word indices -> padded char ids (B, T); embedding gather in plain JAX.
    word_batch = jnp.arange(len(vocab), dtype=jnp.int32)     # B = 16 words
    char_ids = word2chars(word_batch, itos, ctoi)            # (B, T)
    x_bte = emb_table[char_ids].astype(jnp.float32)          # (B, T, E)

    out = rnn_mimick_forward(x_bte, params, group_size=8)
    out = jax.block_until_ready(out)

    ref = reference_forward(x_bte, params)
    assert out.shape == (len(vocab), word_embed)
    assert jnp.allclose(out, ref, atol=2e-3, rtol=2e-3), "Pallas kernel mismatch vs JAX reference"

    print("KERNEL_OK")
</pallas_src>

<mosaic_0001>
module attributes {stable_mosaic.version = 11 : i64} {
  func.func @rnn_mimick_kernel(%arg0: i32, %arg1: memref<1x64x32xf32, #tpu.memory_space<vmem>>, %arg2: memref<32x1024xf32, #tpu.memory_space<vmem>>, %arg3: memref<1x1024xf32, #tpu.memory_space<vmem>>, %arg4: memref<128x512xf32, #tpu.memory_space<vmem>>, %arg5: memref<128x128xf32, #tpu.memory_space<vmem>>, %arg6: memref<128x128xf32, #tpu.memory_space<vmem>>, %arg7: memref<1x128xf32, #tpu.memory_space<vmem>>, %arg8: memref<128x128xf32, #tpu.memory_space<vmem>>, %arg9: memref<1x128xf32, #tpu.memory_space<vmem>>, %arg10: memref<1x8x128xf32, #tpu.memory_space<vmem>>, %arg11: memref<64x512xf32, #tpu.memory_space<vmem>>) attributes {dimension_semantics = [#tpu.dimension_semantics<parallel>], iteration_bounds = array<i64: 2>, scalar_prefetch = 0 : i64, scratch_operands = 1 : i64, tpu.core_type = #tpu.core_type<tc>, window_params = [{transform_indices = @transform_0, window_bounds = array<i64: 1, 64, 32>}, {pipeline_mode = #tpu.pipeline_mode<synchronous>, transform_indices = @transform_1, window_bounds = array<i64: 32, 1024>}, {pipeline_mode = #tpu.pipeline_mode<synchronous>, transform_indices = @transform_2, window_bounds = array<i64: 1, 1024>}, {pipeline_mode = #tpu.pipeline_mode<synchronous>, transform_indices = @transform_3, window_bounds = array<i64: 128, 512>}, {pipeline_mode = #tpu.pipeline_mode<synchronous>, transform_indices = @transform_4, window_bounds = array<i64: 128, 128>}, {pipeline_mode = #tpu.pipeline_mode<synchronous>, transform_indices = @transform_5, window_bounds = array<i64: 128, 128>}, {pipeline_mode = #tpu.pipeline_mode<synchronous>, transform_indices = @transform_6, window_bounds = array<i64: 1, 128>}, {pipeline_mode = #tpu.pipeline_mode<synchronous>, transform_indices = @transform_7, window_bounds = array<i64: 128, 128>}, {pipeline_mode = #tpu.pipeline_mode<synchronous>, transform_indices = @transform_8, window_bounds = array<i64: 1, 128>}, {transform_indices = @transform_9, window_bounds = array<i64: 1, 8, 128>}]} {
    %c0 = arith.constant 0 : index
    %c0_0 = arith.constant 0 : index
    %c0_1 = arith.constant 0 : index
    %0 = vector.load %arg1[%c0, %c0_0, %c0_1] : memref<1x64x32xf32, #tpu.memory_space<vmem>>, vector<1x64x32xf32>
    %1 = vector.shape_cast %0 : vector<1x64x32xf32> to vector<64x32xf32>
    %c0_2 = arith.constant 0 : index
    %c0_3 = arith.constant 0 : index
    %2 = vector.load %arg2[%c0_2, %c0_3] : memref<32x1024xf32, #tpu.memory_space<vmem>>, vector<32x1024xf32>
    %cst = arith.constant dense<0.000000e+00> : vector<64x1024xf32>
    %3 = tpu.matmul %1, %2, %cst {dimension_numbers = #tpu.dot_dimension_numbers<[1], [0], [0], [1], [0, 0, 1, 1], [], []>} : vector<64x32xf32>, vector<32x1024xf32>, vector<64x1024xf32> -> vector<64x1024xf32>
    %c0_4 = arith.constant 0 : index
    %c0_5 = arith.constant 0 : index
    %4 = vector.load %arg3[%c0_4, %c0_5] : memref<1x1024xf32, #tpu.memory_space<vmem>>, vector<1x1024xf32>
    %5 = vector.broadcast %4 : vector<1x1024xf32> to vector<64x1024xf32>
    %6 = arith.addf %3, %5 : vector<64x1024xf32>
    %7 = vector.extract_strided_slice %6 {offsets = [0, 0], sizes = [64, 512], strides = [1, 1]} : vector<64x1024xf32> to vector<64x512xf32>
    %c0_6 = arith.constant 0 : index
    %c0_7 = arith.constant 0 : index
    %8 = vector.load %arg11[%c0_6, %c0_7] : memref<64x512xf32, #tpu.memory_space<vmem>>, vector<64x512xf32>
    tpu.vector_store %arg11[%c0_6, %c0_7], %7 {strides = array<i32>} : memref<64x512xf32, #tpu.memory_space<vmem>>, vector<64x512xf32>,
    %9 = vector.extract_strided_slice %6 {offsets = [56, 512], sizes = [8, 512], strides = [1, 1]} : vector<64x1024xf32> to vector<8x512xf32>
    %10 = vector.extract_strided_slice %9 {offsets = [0, 0], sizes = [8, 128], strides = [1, 1]} : vector<8x512xf32> to vector<8x128xf32>
    %11 = arith.negf %10 : vector<8x128xf32>
    %12 = math.exp %11 : vector<8x128xf32>
    %cst_8 = arith.constant 1.000000e+00 : f32
    %13 = vector.broadcast %cst_8 : f32 to vector<8x128xf32>
    %14 = arith.addf %13, %12 : vector<8x128xf32>
    %15 = arith.divf %13, %14 : vector<8x128xf32>
    %16 = vector.extract_strided_slice %9 {offsets = [0, 256], sizes = [8, 128], strides = [1, 1]} : vector<8x512xf32> to vector<8x128xf32>
    %17 = math.tanh %16 : vector<8x128xf32>
    %18 = vector.extract_strided_slice %9 {offsets = [0, 384], sizes = [8, 128], strides = [1, 1]} : vector<8x512xf32> to vector<8x128xf32>
    %19 = arith.negf %18 : vector<8x128xf32>
    %20 = math.exp %19 : vector<8x128xf32>
    %cst_9 = arith.constant 1.000000e+00 : f32
    %21 = vector.broadcast %cst_9 : f32 to vector<8x128xf32>
    %22 = arith.addf %21, %20 : vector<8x128xf32>
    %23 = arith.divf %21, %22 : vector<8x128xf32>
    %24 = arith.mulf %15, %17 : vector<8x128xf32>
    %25 = math.tanh %24 : vector<8x128xf32>
    %26 = arith.mulf %23, %25 : vector<8x128xf32>
    %c0_10 = arith.constant 0 : index
    %c0_11 = arith.constant 0 : index
    %27 = vector.load %arg4[%c0_10, %c0_11] : memref<128x512xf32, #tpu.memory_space<vmem>>, vector<128x512xf32>
    %cst_12 = arith.constant 0.000000e+00 : f32
    %28 = vector.broadcast %cst_12 : f32 to vector<8x128xf32>
    %cst_13 = arith.constant 0.000000e+00 : f32
    %29 = vector.broadcast %cst_13 : f32 to vector<8x128xf32>
    %c0_i32 = arith.constant 0 : i32
    %c8_i32 = arith.constant 8 : i32
    %30 = arith.muli %c0_i32, %c8_i32 : i32
    %31 = tpu.assume_multiple %30, 8 : i32
    %32 = arith.index_cast %31 : i32 to index
    %c0_14 = arith.constant 0 : index
    %33 = vector.load %arg11[%32, %c0_14] : memref<64x512xf32, #tpu.memory_space<vmem>>, vector<8x512xf32>
    %cst_15 = arith.constant dense<0.000000e+00> : vector<8x512xf32>
    %34 = tpu.matmul %28, %27, %cst_15 {dimension_numbers = #tpu.dot_dimension_numbers<[1], [0], [0], [1], [0, 0, 1, 1], [], []>} : vector<8x128xf32>, vector<128x512xf32>, vector<8x512xf32> -> vector<8x512xf32>
    %35 = arith.addf %33, %34 : vector<8x512xf32>
    %36 = vector.extract_strided_slice %35 {offsets = [0, 0], sizes = [8, 128], strides = [1, 1]} : vector<8x512xf32> to vector<8x128xf32>
    %37 = arith.negf %36 : vector<8x128xf32>
    %38 = math.exp %37 : vector<8x128xf32>
    %cst_16 = arith.constant 1.000000e+00 : f32
    %39 = vector.broadcast %cst_16 : f32 to vector<8x128xf32>
    %40 = arith.addf %39, %38 : vector<8x128xf32>
    %41 = arith.divf %39, %40 : vector<8x128xf32>
    %42 = vector.extract_strided_slice %35 {offsets = [0, 128], sizes = [8, 128], strides = [1, 1]} : vector<8x512xf32> to vector<8x128xf32>
    %43 = arith.negf %42 : vector<8x128xf32>
    %44 = math.exp %43 : vector<8x128xf32>
    %cst_17 = arith.constant 1.000000e+00 : f32
    %45 = vector.broadcast %cst_17 : f32 to vector<8x128xf32>
    %46 = arith.addf %45, %44 : vector<8x128xf32>
    %47 = arith.divf %45, %46 : vector<8x128xf32>
    %48 = vector.extract_strided_slice %35 {offsets = [0, 256], sizes = [8, 128], strides = [1, 1]} : vector<8x512xf32> to vector<8x128xf32>
    %49 = math.tanh %48 : vector<8x128xf32>
    %50 = vector.extract_strided_slice %35 {offsets = [0, 384], sizes = [8, 128], strides = [1, 1]} : vector<8x512xf32> to vector<8x128xf32>
    %51 = arith.negf %50 : vector<8x128xf32>
    %52 = math.exp %51 : vector<8x128xf32>
    %cst_18 = arith.constant 1.000000e+00 : f32
    %53 = vector.broadcast %cst_18 : f32 to vector<8x128xf32>
    %54 = arith.addf %53, %52 : vector<8x128xf32>
    %55 = arith.divf %53, %54 : vector<8x128xf32>
    %56 = arith.mulf %47, %29 : vector<8x128xf32>
    %57 = arith.mulf %41, %49 : vector<8x128xf32>
    %58 = arith.addf %56, %57 : vector<8x128xf32>
    %59 = math.tanh %58 : vector<8x128xf32>
    %60 = arith.mulf %55, %59 : vector<8x128xf32>
    %c1_i32 = arith.constant 1 : i32
    %c8_i32_19 = arith.constant 8 : i32
    %61 = arith.muli %c1_i32, %c8_i32_19 : i32
    %62 = tpu.assume_multiple %61, 8 : i32
    %63 = arith.index_cast %62 : i32 to index
    %c0_20 = arith.constant 0 : index
    %64 = vector.load %arg11[%63, %c0_20] : memref<64x512xf32, #tpu.memory_space<vmem>>, vector<8x512xf32>
    %cst_21 = arith.constant dense<0.000000e+00> : vector<8x512xf32>
    %65 = tpu.matmul %60, %27, %cst_21 {dimension_numbers = #tpu.dot_dimension_numbers<[1], [0], [0], [1], [0, 0, 1, 1], [], []>} : vector<8x128xf32>, vector<128x512xf32>, vector<8x512xf32> -> vector<8x512xf32>
    %66 = arith.addf %64, %65 : vector<8x512xf32>
    %67 = vector.extract_strided_slice %66 {offsets = [0, 0], sizes = [8, 128], strides = [1, 1]} : vector<8x512xf32> to vector<8x128xf32>
    %68 = arith.negf %67 : vector<8x128xf32>
    %69 = math.exp %68 : vector<8x128xf32>
    %cst_22 = arith.constant 1.000000e+00 : f32
    %70 = vector.broadcast %cst_22 : f32 to vector<8x128xf32>
    %71 = arith.addf %70, %69 : vector<8x128xf32>
    %72 = arith.divf %70, %71 : vector<8x128xf32>
    %73 = vector.extract_strided_slice %66 {offsets = [0, 128], sizes = [8, 128], strides = [1, 1]} : vector<8x512xf32> to vector<8x128xf32>
    %74 = arith.negf %73 : vector<8x128xf32>
    %75 = math.exp %74 : vector<8x128xf32>
    %cst_23 = arith.constant 1.000000e+00 : f32
    %76 = vector.broadcast %cst_23 : f32 to vector<8x128xf32>
    %77 = arith.addf %76, %75 : vector<8x128xf32>
    %78 = arith.divf %76, %77 : vector<8x128xf32>
    %79 = vector.extract_strided_slice %66 {offsets = [0, 256], sizes = [8, 128], strides = [1, 1]} : vector<8x512xf32> to vector<8x128xf32>
    %80 = math.tanh %79 : vector<8x128xf32>
    %81 = vector.extract_strided_slice %66 {offsets = [0, 384], sizes = [8, 128], strides = [1, 1]} : vector<8x512xf32> to vector<8x128xf32>
    %82 = arith.negf %81 : vector<8x128xf32>
    %83 = math.exp %82 : vector<8x128xf32>
    %cst_24 = arith.constant 1.000000e+00 : f32
    %84 = vector.broadcast %cst_24 : f32 to vector<8x128xf32>
    %85 = arith.addf %84, %83 : vector<8x128xf32>
    %86 = arith.divf %84, %85 : vector<8x128xf32>
    %87 = arith.mulf %78, %58 : vector<8x128xf32>
    %88 = arith.mulf %72, %80 : vector<8x128xf32>
    %89 = arith.addf %87, %88 : vector<8x128xf32>
    %90 = math.tanh %89 : vector<8x128xf32>
    %91 = arith.mulf %86, %90 : vector<8x128xf32>
    %c2_i32 = arith.constant 2 : i32
    %c8_i32_25 = arith.constant 8 : i32
    %92 = arith.muli %c2_i32, %c8_i32_25 : i32
    %93 = tpu.assume_multiple %92, 8 : i32
    %94 = arith.index_cast %93 : i32 to index
    %c0_26 = arith.constant 0 : index
    %95 = vector.load %arg11[%94, %c0_26] : memref<64x512xf32, #tpu.memory_space<vmem>>, vector<8x512xf32>
    %cst_27 = arith.constant dense<0.000000e+00> : vector<8x512xf32>
    %96 = tpu.matmul %91, %27, %cst_27 {dimension_numbers = #tpu.dot_dimension_numbers<[1], [0], [0], [1], [0, 0, 1, 1], [], []>} : vector<8x128xf32>, vector<128x512xf32>, vector<8x512xf32> -> vector<8x512xf32>
    %97 = arith.addf %95, %96 : vector<8x512xf32>
    %98 = vector.extract_strided_slice %97 {offsets = [0, 0], sizes = [8, 128], strides = [1, 1]} : vector<8x512xf32> to vector<8x128xf32>
    %99 = arith.negf %98 : vector<8x128xf32>
    %100 = math.exp %99 : vector<8x128xf32>
    %cst_28 = arith.constant 1.000000e+00 : f32
    %101 = vector.broadcast %cst_28 : f32 to vector<8x128xf32>
    %102 = arith.addf %101, %100 : vector<8x128xf32>
    %103 = arith.divf %101, %102 : vector<8x128xf32>
    %104 = vector.extract_strided_slice %97 {offsets = [0, 128], sizes = [8, 128], strides = [1, 1]} : vector<8x512xf32> to vector<8x128xf32>
    %105 = arith.negf %104 : vector<8x128xf32>
    %106 = math.exp %105 : vector<8x128xf32>
    %cst_29 = arith.constant 1.000000e+00 : f32
    %107 = vector.broadcast %cst_29 : f32 to vector<8x128xf32>
    %108 = arith.addf %107, %106 : vector<8x128xf32>
    %109 = arith.divf %107, %108 : vector<8x128xf32>
    %110 = vector.extract_strided_slice %97 {offsets = [0, 256], sizes = [8, 128], strides = [1, 1]} : vector<8x512xf32> to vector<8x128xf32>
    %111 = math.tanh %110 : vector<8x128xf32>
    %112 = vector.extract_strided_slice %97 {offsets = [0, 384], sizes = [8, 128], strides = [1, 1]} : vector<8x512xf32> to vector<8x128xf32>
    %113 = arith.negf %112 : vector<8x128xf32>
    %114 = math.exp %113 : vector<8x128xf32>
    %cst_30 = arith.constant 1.000000e+00 : f32
    %115 = vector.broadcast %cst_30 : f32 to vector<8x128xf32>
    %116 = arith.addf %115, %114 : vector<8x128xf32>
    %117 = arith.divf %115, %116 : vector<8x128xf32>
    %118 = arith.mulf %109, %89 : vector<8x128xf32>
    %119 = arith.mulf %103, %111 : vector<8x128xf32>
    %120 = arith.addf %118, %119 : vector<8x128xf32>
    %121 = math.tanh %120 : vector<8x128xf32>
    %122 = arith.mulf %117, %121 : vector<8x128xf32>
    %c3_i32 = arith.constant 3 : i32
    %c8_i32_31 = arith.constant 8 : i32
    %123 = arith.muli %c3_i32, %c8_i32_31 : i32
    %124 = tpu.assume_multiple %123, 8 : i32
    %125 = arith.index_cast %124 : i32 to index
    %c0_32 = arith.constant 0 : index
    %126 = vector.load %arg11[%125, %c0_32] : memref<64x512xf32, #tpu.memory_space<vmem>>, vector<8x512xf32>
    %cst_33 = arith.constant dense<0.000000e+00> : vector<8x512xf32>
    %127 = tpu.matmul %122, %27, %cst_33 {dimension_numbers = #tpu.dot_dimension_numbers<[1], [0], [0], [1], [0, 0, 1, 1], [], []>} : vector<8x128xf32>, vector<128x512xf32>, vector<8x512xf32> -> vector<8x512xf32>
    %128 = arith.addf %126, %127 : vector<8x512xf32>
    %129 = vector.extract_strided_slice %128 {offsets = [0, 0], sizes = [8, 128], strides = [1, 1]} : vector<8x512xf32> to vector<8x128xf32>
    %130 = arith.negf %129 : vector<8x128xf32>
    %131 = math.exp %130 : vector<8x128xf32>
    %cst_34 = arith.constant 1.000000e+00 : f32
    %132 = vector.broadcast %cst_34 : f32 to vector<8x128xf32>
    %133 = arith.addf %132, %131 : vector<8x128xf32>
    %134 = arith.divf %132, %133 : vector<8x128xf32>
    %135 = vector.extract_strided_slice %128 {offsets = [0, 128], sizes = [8, 128], strides = [1, 1]} : vector<8x512xf32> to vector<8x128xf32>
    %136 = arith.negf %135 : vector<8x128xf32>
    %137 = math.exp %136 : vector<8x128xf32>
    %cst_35 = arith.constant 1.000000e+00 : f32
    %138 = vector.broadcast %cst_35 : f32 to vector<8x128xf32>
    %139 = arith.addf %138, %137 : vector<8x128xf32>
    %140 = arith.divf %138, %139 : vector<8x128xf32>
    %141 = vector.extract_strided_slice %128 {offsets = [0, 256], sizes = [8, 128], strides = [1, 1]} : vector<8x512xf32> to vector<8x128xf32>
    %142 = math.tanh %141 : vector<8x128xf32>
    %143 = vector.extract_strided_slice %128 {offsets = [0, 384], sizes = [8, 128], strides = [1, 1]} : vector<8x512xf32> to vector<8x128xf32>
    %144 = arith.negf %143 : vector<8x128xf32>
    %145 = math.exp %144 : vector<8x128xf32>
    %cst_36 = arith.constant 1.000000e+00 : f32
    %146 = vector.broadcast %cst_36 : f32 to vector<8x128xf32>
    %147 = arith.addf %146, %145 : vector<8x128xf32>
    %148 = arith.divf %146, %147 : vector<8x128xf32>
    %149 = arith.mulf %140, %120 : vector<8x128xf32>
    %150 = arith.mulf %134, %142 : vector<8x128xf32>
    %151 = arith.addf %149, %150 : vector<8x128xf32>
    %152 = math.tanh %151 : vector<8x128xf32>
    %153 = arith.mulf %148, %152 : vector<8x128xf32>
    %c4_i32 = arith.constant 4 : i32
    %c8_i32_37 = arith.constant 8 : i32
    %154 = arith.muli %c4_i32, %c8_i32_37 : i32
    %155 = tpu.assume_multiple %154, 8 : i32
    %156 = arith.index_cast %155 : i32 to index
    %c0_38 = arith.constant 0 : index
    %157 = vector.load %arg11[%156, %c0_38] : memref<64x512xf32, #tpu.memory_space<vmem>>, vector<8x512xf32>
    %cst_39 = arith.constant dense<0.000000e+00> : vector<8x512xf32>
    %158 = tpu.matmul %153, %27, %cst_39 {dimension_numbers = #tpu.dot_dimension_numbers<[1], [0], [0], [1], [0, 0, 1, 1], [], []>} : vector<8x128xf32>, vector<128x512xf32>, vector<8x512xf32> -> vector<8x512xf32>
    %159 = arith.addf %157, %158 : vector<8x512xf32>
    %160 = vector.extract_strided_slice %159 {offsets = [0, 0], sizes = [8, 128], strides = [1, 1]} : vector<8x512xf32> to vector<8x128xf32>
    %161 = arith.negf %160 : vector<8x128xf32>
    %162 = math.exp %161 : vector<8x128xf32>
    %cst_40 = arith.constant 1.000000e+00 : f32
    %163 = vector.broadcast %cst_40 : f32 to vector<8x128xf32>
    %164 = arith.addf %163, %162 : vector<8x128xf32>
    %165 = arith.divf %163, %164 : vector<8x128xf32>
    %166 = vector.extract_strided_slice %159 {offsets = [0, 128], sizes = [8, 128], strides = [1, 1]} : vector<8x512xf32> to vector<8x128xf32>
    %167 = arith.negf %166 : vector<8x128xf32>
    %168 = math.exp %167 : vector<8x128xf32>
    %cst_41 = arith.constant 1.000000e+00 : f32
    %169 = vector.broadcast %cst_41 : f32 to vector<8x128xf32>
    %170 = arith.addf %169, %168 : vector<8x128xf32>
    %171 = arith.divf %169, %170 : vector<8x128xf32>
    %172 = vector.extract_strided_slice %159 {offsets = [0, 256], sizes = [8, 128], strides = [1, 1]} : vector<8x512xf32> to vector<8x128xf32>
    %173 = math.tanh %172 : vector<8x128xf32>
    %174 = vector.extract_strided_slice %159 {offsets = [0, 384], sizes = [8, 128], strides = [1, 1]} : vector<8x512xf32> to vector<8x128xf32>
    %175 = arith.negf %174 : vector<8x128xf32>
    %176 = math.exp %175 : vector<8x128xf32>
    %cst_42 = arith.constant 1.000000e+00 : f32
    %177 = vector.broadcast %cst_42 : f32 to vector<8x128xf32>
    %178 = arith.addf %177, %176 : vector<8x128xf32>
    %179 = arith.divf %177, %178 : vector<8x128xf32>
    %180 = arith.mulf %171, %151 : vector<8x128xf32>
    %181 = arith.mulf %165, %173 : vector<8x128xf32>
    %182 = arith.addf %180, %181 : vector<8x128xf32>
    %183 = math.tanh %182 : vector<8x128xf32>
    %184 = arith.mulf %179, %183 : vector<8x128xf32>
    %c5_i32 = arith.constant 5 : i32
    %c8_i32_43 = arith.constant 8 : i32
    %185 = arith.muli %c5_i32, %c8_i32_43 : i32
    %186 = tpu.assume_multiple %185, 8 : i32
    %187 = arith.index_cast %186 : i32 to index
    %c0_44 = arith.constant 0 : index
    %188 = vector.load %arg11[%187, %c0_44] : memref<64x512xf32, #tpu.memory_space<vmem>>, vector<8x512xf32>
    %cst_45 = arith.constant dense<0.000000e+00> : vector<8x512xf32>
    %189 = tpu.matmul %184, %27, %cst_45 {dimension_numbers = #tpu.dot_dimension_numbers<[1], [0], [0], [1], [0, 0, 1, 1], [], []>} : vector<8x128xf32>, vector<128x512xf32>, vector<8x512xf32> -> vector<8x512xf32>
    %190 = arith.addf %188, %189 : vector<8x512xf32>
    %191 = vector.extract_strided_slice %190 {offsets = [0, 0], sizes = [8, 128], strides = [1, 1]} : vector<8x512xf32> to vector<8x128xf32>
    %192 = arith.negf %191 : vector<8x128xf32>
    %193 = math.exp %192 : vector<8x128xf32>
    %cst_46 = arith.constant 1.000000e+00 : f32
    %194 = vector.broadcast %cst_46 : f32 to vector<8x128xf32>
    %195 = arith.addf %194, %193 : vector<8x128xf32>
    %196 = arith.divf %194, %195 : vector<8x128xf32>
    %197 = vector.extract_strided_slice %190 {offsets = [0, 128], sizes = [8, 128], strides = [1, 1]} : vector<8x512xf32> to vector<8x128xf32>
    %198 = arith.negf %197 : vector<8x128xf32>
    %199 = math.exp %198 : vector<8x128xf32>
    %cst_47 = arith.constant 1.000000e+00 : f32
    %200 = vector.broadcast %cst_47 : f32 to vector<8x128xf32>
    %201 = arith.addf %200, %199 : vector<8x128xf32>
    %202 = arith.divf %200, %201 : vector<8x128xf32>
    %203 = vector.extract_strided_slice %190 {offsets = [0, 256], sizes = [8, 128], strides = [1, 1]} : vector<8x512xf32> to vector<8x128xf32>
    %204 = math.tanh %203 : vector<8x128xf32>
    %205 = vector.extract_strided_slice %190 {offsets = [0, 384], sizes = [8, 128], strides = [1, 1]} : vector<8x512xf32> to vector<8x128xf32>
    %206 = arith.negf %205 : vector<8x128xf32>
    %207 = math.exp %206 : vector<8x128xf32>
    %cst_48 = arith.constant 1.000000e+00 : f32
    %208 = vector.broadcast %cst_48 : f32 to vector<8x128xf32>
    %209 = arith.addf %208, %207 : vector<8x128xf32>
    %210 = arith.divf %208, %209 : vector<8x128xf32>
    %211 = arith.mulf %202, %182 : vector<8x128xf32>
    %212 = arith.mulf %196, %204 : vector<8x128xf32>
    %213 = arith.addf %211, %212 : vector<8x128xf32>
    %214 = math.tanh %213 : vector<8x128xf32>
    %215 = arith.mulf %210, %214 : vector<8x128xf32>
    %c6_i32 = arith.constant 6 : i32
    %c8_i32_49 = arith.constant 8 : i32
    %216 = arith.muli %c6_i32, %c8_i32_49 : i32
    %217 = tpu.assume_multiple %216, 8 : i32
    %218 = arith.index_cast %217 : i32 to index
    %c0_50 = arith.constant 0 : index
    %219 = vector.load %arg11[%218, %c0_50] : memref<64x512xf32, #tpu.memory_space<vmem>>, vector<8x512xf32>
    %cst_51 = arith.constant dense<0.000000e+00> : vector<8x512xf32>
    %220 = tpu.matmul %215, %27, %cst_51 {dimension_numbers = #tpu.dot_dimension_numbers<[1], [0], [0], [1], [0, 0, 1, 1], [], []>} : vector<8x128xf32>, vector<128x512xf32>, vector<8x512xf32> -> vector<8x512xf32>
    %221 = arith.addf %219, %220 : vector<8x512xf32>
    %222 = vector.extract_strided_slice %221 {offsets = [0, 0], sizes = [8, 128], strides = [1, 1]} : vector<8x512xf32> to vector<8x128xf32>
    %223 = arith.negf %222 : vector<8x128xf32>
    %224 = math.exp %223 : vector<8x128xf32>
    %cst_52 = arith.constant 1.000000e+00 : f32
    %225 = vector.broadcast %cst_52 : f32 to vector<8x128xf32>
    %226 = arith.addf %225, %224 : vector<8x128xf32>
    %227 = arith.divf %225, %226 : vector<8x128xf32>
    %228 = vector.extract_strided_slice %221 {offsets = [0, 128], sizes = [8, 128], strides = [1, 1]} : vector<8x512xf32> to vector<8x128xf32>
    %229 = arith.negf %228 : vector<8x128xf32>
    %230 = math.exp %229 : vector<8x128xf32>
    %cst_53 = arith.constant 1.000000e+00 : f32
    %231 = vector.broadcast %cst_53 : f32 to vector<8x128xf32>
    %232 = arith.addf %231, %230 : vector<8x128xf32>
    %233 = arith.divf %231, %232 : vector<8x128xf32>
    %234 = vector.extract_strided_slice %221 {offsets = [0, 256], sizes = [8, 128], strides = [1, 1]} : vector<8x512xf32> to vector<8x128xf32>
    %235 = math.tanh %234 : vector<8x128xf32>
    %236 = vector.extract_strided_slice %221 {offsets = [0, 384], sizes = [8, 128], strides = [1, 1]} : vector<8x512xf32> to vector<8x128xf32>
    %237 = arith.negf %236 : vector<8x128xf32>
    %238 = math.exp %237 : vector<8x128xf32>
    %cst_54 = arith.constant 1.000000e+00 : f32
    %239 = vector.broadcast %cst_54 : f32 to vector<8x128xf32>
    %240 = arith.addf %239, %238 : vector<8x128xf32>
    %241 = arith.divf %239, %240 : vector<8x128xf32>
    %242 = arith.mulf %233, %213 : vector<8x128xf32>
    %243 = arith.mulf %227, %235 : vector<8x128xf32>
    %244 = arith.addf %242, %243 : vector<8x128xf32>
    %245 = math.tanh %244 : vector<8x128xf32>
    %246 = arith.mulf %241, %245 : vector<8x128xf32>
    %c7_i32 = arith.constant 7 : i32
    %c8_i32_55 = arith.constant 8 : i32
    %247 = arith.muli %c7_i32, %c8_i32_55 : i32
    %248 = tpu.assume_multiple %247, 8 : i32
    %249 = arith.index_cast %248 : i32 to index
    %c0_56 = arith.constant 0 : index
    %250 = vector.load %arg11[%249, %c0_56] : memref<64x512xf32, #tpu.memory_space<vmem>>, vector<8x512xf32>
    %cst_57 = arith.constant dense<0.000000e+00> : vector<8x512xf32>
    %251 = tpu.matmul %246, %27, %cst_57 {dimension_numbers = #tpu.dot_dimension_numbers<[1], [0], [0], [1], [0, 0, 1, 1], [], []>} : vector<8x128xf32>, vector<128x512xf32>, vector<8x512xf32> -> vector<8x512xf32>
    %252 = arith.addf %250, %251 : vector<8x512xf32>
    %253 = vector.extract_strided_slice %252 {offsets = [0, 0], sizes = [8, 128], strides = [1, 1]} : vector<8x512xf32> to vector<8x128xf32>
    %254 = arith.negf %253 : vector<8x128xf32>
    %255 = math.exp %254 : vector<8x128xf32>
    %cst_58 = arith.constant 1.000000e+00 : f32
    %256 = vector.broadcast %cst_58 : f32 to vector<8x128xf32>
    %257 = arith.addf %256, %255 : vector<8x128xf32>
    %258 = arith.divf %256, %257 : vector<8x128xf32>
    %259 = vector.extract_strided_slice %252 {offsets = [0, 128], sizes = [8, 128], strides = [1, 1]} : vector<8x512xf32> to vector<8x128xf32>
    %260 = arith.negf %259 : vector<8x128xf32>
    %261 = math.exp %260 : vector<8x128xf32>
    %cst_59 = arith.constant 1.000000e+00 : f32
    %262 = vector.broadcast %cst_59 : f32 to vector<8x128xf32>
    %263 = arith.addf %262, %261 : vector<8x128xf32>
    %264 = arith.divf %262, %263 : vector<8x128xf32>
    %265 = vector.extract_strided_slice %252 {offsets = [0, 256], sizes = [8, 128], strides = [1, 1]} : vector<8x512xf32> to vector<8x128xf32>
    %266 = math.tanh %265 : vector<8x128xf32>
    %267 = vector.extract_strided_slice %252 {offsets = [0, 384], sizes = [8, 128], strides = [1, 1]} : vector<8x512xf32> to vector<8x128xf32>
    %268 = arith.negf %267 : vector<8x128xf32>
    %269 = math.exp %268 : vector<8x128xf32>
    %cst_60 = arith.constant 1.000000e+00 : f32
    %270 = vector.broadcast %cst_60 : f32 to vector<8x128xf32>
    %271 = arith.addf %270, %269 : vector<8x128xf32>
    %272 = arith.divf %270, %271 : vector<8x128xf32>
    %273 = arith.mulf %264, %244 : vector<8x128xf32>
    %274 = arith.mulf %258, %266 : vector<8x128xf32>
    %275 = arith.addf %273, %274 : vector<8x128xf32>
    %276 = math.tanh %275 : vector<8x128xf32>
    %277 = arith.mulf %272, %276 : vector<8x128xf32>
    %c8_i32_61 = arith.constant 8 : i32
    %c0_62 = arith.constant 0 : index
    %c0_63 = arith.constant 0 : index
    %278 = vector.load %arg5[%c0_62, %c0_63] : memref<128x128xf32, #tpu.memory_space<vmem>>, vector<128x128xf32>
    %cst_64 = arith.constant dense<0.000000e+00> : vector<8x128xf32>
    %279 = tpu.matmul %277, %278, %cst_64 {dimension_numbers = #tpu.dot_dimension_numbers<[1], [0], [0], [1], [0, 0, 1, 1], [], []>} : vector<8x128xf32>, vector<128x128xf32>, vector<8x128xf32> -> vector<8x128xf32>
    %c0_65 = arith.constant 0 : index
    %c0_66 = arith.constant 0 : index
    %280 = vector.load %arg6[%c0_65, %c0_66] : memref<128x128xf32, #tpu.memory_space<vmem>>, vector<128x128xf32>
    %cst_67 = arith.constant dense<0.000000e+00> : vector<8x128xf32>
    %281 = tpu.matmul %26, %280, %cst_67 {dimension_numbers = #tpu.dot_dimension_numbers<[1], [0], [0], [1], [0, 0, 1, 1], [], []>} : vector<8x128xf32>, vector<128x128xf32>, vector<8x128xf32> -> vector<8x128xf32>
    %282 = arith.addf %279, %281 : vector<8x128xf32>
    %c0_68 = arith.constant 0 : index
    %c0_69 = arith.constant 0 : index
    %283 = vector.load %arg7[%c0_68, %c0_69] : memref<1x128xf32, #tpu.memory_space<vmem>>, vector<1x128xf32>
    %284 = vector.broadcast %283 : vector<1x128xf32> to vector<8x128xf32>
    %285 = arith.addf %282, %284 : vector<8x128xf32>
    %286 = math.tanh %285 : vector<8x128xf32>
    %c0_70 = arith.constant 0 : index
    %c0_71 = arith.constant 0 : index
    %287 = vector.load %arg8[%c0_70, %c0_71] : memref<128x128xf32, #tpu.memory_space<vmem>>, vector<128x128xf32>
    %cst_72 = arith.constant dense<0.000000e+00> : vector<8x128xf32>
    %288 = tpu.matmul %286, %287, %cst_72 {dimension_numbers = #tpu.dot_dimension_numbers<[1], [0], [0], [1], [0, 0, 1, 1], [], []>} : vector<8x128xf32>, vector<128x128xf32>, vector<8x128xf32> -> vector<8x128xf32>
    %c0_73 = arith.constant 0 : index
    %c0_74 = arith.constant 0 : index
    %289 = vector.load %arg9[%c0_73, %c0_74] : memref<1x128xf32, #tpu.memory_space<vmem>>, vector<1x128xf32>
    %290 = vector.broadcast %289 : vector<1x128xf32> to vector<8x128xf32>
    %291 = arith.addf %288, %290 : vector<8x128xf32>
    %c0_75 = arith.constant 0 : index
    %c0_76 = arith.constant 0 : index
    %c0_77 = arith.constant 0 : index
    %292 = vector.load %arg10[%c0_75, %c0_76, %c0_77] : memref<1x8x128xf32, #tpu.memory_space<vmem>>, vector<1x8x128xf32>
    %293 = vector.shape_cast %292 : vector<1x8x128xf32> to vector<8x128xf32>
    %294 = vector.shape_cast %291 : vector<8x128xf32> to vector<1x8x128xf32>
    tpu.vector_store %arg10[%c0_75, %c0_76, %c0_77], %294 {strides = array<i32>} : memref<1x8x128xf32, #tpu.memory_space<vmem>>, vector<1x8x128xf32>,
    return
  }
  func.func @transform_0(%arg0: i32) -> (i32, i32, i32) {
    %c0_i32 = arith.constant 0 : i32
    %c0_i32_0 = arith.constant 0 : i32
    %c0_i32_1 = arith.constant 0 : i32
    return %arg0, %c0_i32, %c0_i32_0 : i32, i32, i32
  }
  func.func @transform_1(%arg0: i32) -> (i32, i32) {
    %c0_i32 = arith.constant 0 : i32
    %c0_i32_0 = arith.constant 0 : i32
    %c0_i32_1 = arith.constant 0 : i32
    return %c0_i32, %c0_i32_0 : i32, i32
  }
  func.func @transform_2(%arg0: i32) -> (i32, i32) {
    %c0_i32 = arith.constant 0 : i32
    %c0_i32_0 = arith.constant 0 : i32
    %c0_i32_1 = arith.constant 0 : i32
    return %c0_i32, %c0_i32_0 : i32, i32
  }
  func.func @transform_3(%arg0: i32) -> (i32, i32) {
    %c0_i32 = arith.constant 0 : i32
    %c0_i32_0 = arith.constant 0 : i32
    %c0_i32_1 = arith.constant 0 : i32
    return %c0_i32, %c0_i32_0 : i32, i32
  }
  func.func @transform_4(%arg0: i32) -> (i32, i32) {
    %c0_i32 = arith.constant 0 : i32
    %c0_i32_0 = arith.constant 0 : i32
    %c0_i32_1 = arith.constant 0 : i32
    return %c0_i32, %c0_i32_0 : i32, i32
  }
  func.func @transform_5(%arg0: i32) -> (i32, i32) {
    %c0_i32 = arith.constant 0 : i32
    %c0_i32_0 = arith.constant 0 : i32
    %c0_i32_1 = arith.constant 0 : i32
    return %c0_i32, %c0_i32_0 : i32, i32
  }
  func.func @transform_6(%arg0: i32) -> (i32, i32) {
    %c0_i32 = arith.constant 0 : i32
    %c0_i32_0 = arith.constant 0 : i32
    %c0_i32_1 = arith.constant 0 : i32
    return %c0_i32, %c0_i32_0 : i32, i32
  }
  func.func @transform_7(%arg0: i32) -> (i32, i32) {
    %c0_i32 = arith.constant 0 : i32
    %c0_i32_0 = arith.constant 0 : i32
    %c0_i32_1 = arith.constant 0 : i32
    return %c0_i32, %c0_i32_0 : i32, i32
  }
  func.func @transform_8(%arg0: i32) -> (i32, i32) {
    %c0_i32 = arith.constant 0 : i32
    %c0_i32_0 = arith.constant 0 : i32
    %c0_i32_1 = arith.constant 0 : i32
    return %c0_i32, %c0_i32_0 : i32, i32
  }
  func.func @transform_9(%arg0: i32) -> (i32, i32, i32) {
    %c0_i32 = arith.constant 0 : i32
    %c0_i32_0 = arith.constant 0 : i32
    %c0_i32_1 = arith.constant 0 : i32
    return %arg0, %c0_i32, %c0_i32_0 : i32, i32, i32
  }
}

</mosaic_0001>

<bundles_post_ra>
// kernel: tpu_custom_call.1
= control target key start
LH: loop header
LB: loop body
LE: loop exit
PB: predicated region body
PF: predicated region fallthrough
CT: control target
= control target key end

     0   :  { %14 = vsyncpa [#allocation4], 0  ;;  %s4976_s0 = inlined_call_operand.vmem [shape: f32[2,64,32], index: 0, kind: input, shape index: {}]   ;;  %s4977_s1 = inlined_call_operand.hbm [shape: f32[32,1024], index: 1, kind: input, shape index: {}]   ;;  %s4978_s2 = inlined_call_operand.vmem [shape: f32[1,1024], index: 2, kind: input, shape index: {}]   ;;  %s4979_s3 = inlined_call_operand.hbm [shape: f32[128,512], index: 3, kind: input, shape index: {}]   ;;  %s4980_s4 = inlined_call_operand.vmem [shape: f32[128,128], index: 4, kind: input, shape index: {}]   ;;  %s4981_s5 = inlined_call_operand.hbm [shape: f32[128,128], index: 5, kind: input, shape index: {}]   ;;  %s4982_s6 = inlined_call_operand.vmem [shape: f32[1,128], index: 6, kind: input, shape index: {}]   ;;  %s4983_s7 = inlined_call_operand.hbm [shape: f32[128,128], index: 7, kind: input, shape index: {}]   ;;  %s4984_s8 = inlined_call_operand.vmem [shape: f32[1,128], index: 8, kind: input, shape index: {}]   ;;  %s4985_s9 = inlined_call_operand.hbm [shape: f32[2,8,128], index: 9, kind: output, shape index: {}]  }
   0x1   :  { %15 = vsyncpa [#allocation7], 0 }
   0x2   :  { %16 = vsyncpa [#allocation10], 0 }
   0x3   :  { %17 = vsyncpa [#allocation5], 0 }
   0x4   :  { %19 = vsyncpa [#allocation5 + $0x1], 0  ;;  %s3618_s30 = smov 0   ;;  %s3620_s10 = smov 0  }
   0x5   :  { %s3622_s11 = smov 0   ;;  %s3624_s12 = smov 0  }
   0x6 LB: > { %s3639_s13 = sadd.s32 4294967295, %s3553_s12   ;;  %s2839_s14 = sadd.s32 4294967294, %s3553_s12   ;;  %s3553_s12 = sphi %s3624_s12, %s5281_s12   ;;  %s3549_s11 = sphi %s3622_s11, %s5280_s11   ;;  %s3545_s10 = sphi %s3620_s10, %s5279_s10   ;;  %s3541_s30 = sphi %s3618_s30, %s5278_s30  }
   0x7   : > { %s3643_s15 = sadd.s32 1, %s3553_s12   ;;  %s226_s16 = sadd.s32 1, %s3549_s11 }
   0x8   : > { %s223_s17 = ssub.s32 %s3553_s12, %s3643_s15  ;;  %p236_p0 = scmp.ne.s32.totalorder %s3549_s11, %s3545_s10 }
   0x9   : > { %p224_p1 = scmp.eq.s32.totalorder %s223_s17, 0  ;;  %p237_p2 = scmp.eq.s32.totalorder %s3639_s13, 1 }
   0xa   : > { %p242_p3 = scmp.ne.s32.totalorder %s3545_s10, %s3541_s30  ;;  %p243_p4 = scmp.eq.s32.totalorder %s2839_s14, 1 }
   0xb   : > { %s3654_s18 = scalar_select %p224_p1, %s3549_s11, %s226_s16  }
   0xc   : > { %p3656_p5 = por %p237_p2, %p236_p0  ;;  %p3660_p6 = por %p243_p4, %p242_p3 }
   0xd   : > { %5084 = sst [smem:[#allocation16_spill]] %s3654_s18  ;;  %p2840_p7 = scmp.ge.s32.totalorder %s3553_s12, 1 }
   0xe   : > { %s5086_s20 = scalar_select %p3660_p6, 1, 0 }
   0xf   : > { %p250_p8 = scmp.lt.s32.totalorder %s3553_s12, 3  ;;  %p4986_p9 = scmp.eq.s32.totalorder %s3639_s13, 0 }
  0x10   : > { %s3555_s22 = smov [#allocation6]   ;;  %s3556_s25 = smov [#allocation3]  }
  0x11   : > { %p3667_p10 = pnand %p2840_p7, %p250_p8  ;;  %s278_s23 = sshll.u32 %s3555_s22, 4  ;;  %s279_s23 = int_to_ptr.vmem [resolvable:$true] %s278_s23 }
  0x12   : > { %s262_s26 = sshll.u32 %s3556_s25, 4  ;;  %s3388_s27 = scalar_lea.vmem %s279_s23, 8192  ;;  %s263_s26 = int_to_ptr.vmem [resolvable:$true] %s262_s26 }
  0x13   : > { %p3101_p11 = pneg %p3667_p10  ;;  %p3389_p0 = scmp.ne.s32.totalorder %s279_s23, %s3388_s27 }
  0x14   : > { %p3396_p3 = scmp.lt.s32.totalorder %s279_s23, %s279_s23  ;;  %p3397_p4 = scmp.lt.s32.totalorder %s3388_s27, %s3388_s27 }
  0x15   : > { %p3675_p12 = pnand %p4986_p9, %p3101_p11 }
  0x16   : > { %p3398_p7 = por %p3397_p4, %p3396_p3 }
  0x17   : > { %p3379_p13 = pneg %p3675_p12 }
  0x19   : > { %p3391_p1 = pnand %p3389_p0, %p3379_p13 }
  0x1b   : > { %p3392_p2 = pneg %p3391_p1 }
  0x1d   : > { %p3399_p8 = pnand %p3398_p7, %p3392_p2 }
  0x1f   : > { %3402 = shalt.err (!%p3399_p8)
}
  0x20   : > { %s3557_s28 = smov 512   ;;  %s3558_s29 = smov 32  }
  0x21   : > { %3107 = dma.hbm_to_vmem [thread:$0]  (!%p3675_p12), %s4979_s3, 8192, %s279_s23, [#allocation7], %s3557_s28, %s3557_s28, %s3558_s29  }
  0x22   : > { %s3414_s17 = scalar_lea.vmem %s263_s26, 4096  ;;  %p3422_p9 = scmp.lt.s32.totalorder %s263_s26, %s263_s26 }
  0x23   : > { %p3415_p11 = scmp.ne.s32.totalorder %s263_s26, %s3414_s17  ;;  %p3423_p6 = scmp.lt.s32.totalorder %s3414_s17, %s3414_s17 }
  0x25   : > { %p3417_p0 = pnand %p3415_p11, %p3379_p13  ;;  %p3424_p3 = por %p3423_p6, %p3422_p9 }
  0x27   : > { %p3418_p1 = pneg %p3417_p0 }
  0x29   : > { %p3425_p2 = pnand %p3424_p3, %p3418_p1 }
  0x2b   : > { %3428 = shalt.err (!%p3425_p2)
}
  0x2c   : > { %s3559_s22 = smov 1024   ;;  %s3560_s25 = smov 64  }
  0x2d   : > { %3104 = dma.hbm_to_vmem [thread:$0]  (!%p3675_p12), %s4977_s1, 4096, %s263_s26, [#allocation4], %s3559_s22, %s3559_s22, %s3560_s25  }
  0x2e   : > { %s3561_s23 = smov [#allocation8]  }
  0x2f   : > { %s294_s28 = sshll.u32 %s3561_s23, 4  ;;  %s295_s28 = int_to_ptr.vmem [resolvable:$true] %s294_s28 }
  0x30   : > { %s3440_s29 = scalar_lea.vmem %s295_s28, 2048  ;;  %p3448_p9 = scmp.lt.s32.totalorder %s295_s28, %s295_s28 }
  0x31   : > { %p3441_p4 = scmp.ne.s32.totalorder %s295_s28, %s3440_s29  ;;  %p3449_p8 = scmp.lt.s32.totalorder %s3440_s29, %s3440_s29 }
  0x33   : > { %p3443_p7 = pnand %p3441_p4, %p3379_p13  ;;  %p3450_p11 = por %p3449_p8, %p3448_p9 }
  0x35   : > { %p3444_p6 = pneg %p3443_p7 }
  0x37   : > { %p3451_p0 = pnand %p3450_p11, %p3444_p6 }
  0x39   : > { %3454 = shalt.err (!%p3451_p0)
}
  0x3a   : > { %s3562_s14 = smov 128   ;;  %s3563_s16 = smov 8  }
  0x3b   : > { %3110 = dma.hbm_to_vmem [thread:$0]  (!%p3675_p12), %s4981_s5, 2048, %s295_s28, [#allocation7], %s3562_s14, %s3562_s14, %s3563_s16  }
  0x3c   : > { %s3564_s17 = smov [#allocation9]  }
  0x3d   : > { %s310_s22 = sshll.u32 %s3564_s17, 4  ;;  %s311_s22 = int_to_ptr.vmem [resolvable:$true] %s310_s22 }
  0x3e   : > { %s3466_s25 = scalar_lea.vmem %s311_s22, 2048  ;;  %p3474_p4 = scmp.lt.s32.totalorder %s311_s22, %s311_s22 }
  0x3f   : > { %p3467_p1 = scmp.ne.s32.totalorder %s311_s22, %s3466_s25  ;;  %p3475_p7 = scmp.lt.s32.totalorder %s3466_s25, %s3466_s25 }
  0x41   : > { %p3469_p3 = pnand %p3467_p1, %p3379_p13  ;;  %p3476_p6 = por %p3475_p7, %p3474_p4 }
  0x43   : > { %p3470_p2 = pneg %p3469_p3 }
  0x45   : > { %p3477_p9 = pnand %p3476_p6, %p3470_p2 }
  0x47   : > { %3480 = shalt.err (!%p3477_p9)
}
  0x48   : > { %3113 = dma.hbm_to_vmem [thread:$0]  (!%p3675_p12), %s4983_s7, 2048, %s311_s22, [#allocation10], %s3562_s14, %s3562_s14, %s3563_s16  }
  0x49   : > { %337 = sbr.rel (%p3667_p10) target bundleno = 2575 (0xa0f), region = 56 }
  0x4e   : > { %p5089_p8 = scmp.eq.s32.totalorder %s3639_s13, 0 }
  0x50   : > { %3524 = dma.done.wait (%p5089_p8), [#allocation4], 4096   ;;  %p5090_p13 = pmov %p5089_p8 }
  0x51   : > { %p5091_p11 = pmov %p5089_p8 }
  0x52   : > { %3526 = vsyncadd (%p5090_p13), [#allocation4], 4294963200 }
  0x53   : > { %3528 = dma.done.wait (%p5091_p11), [#allocation7], 10240   ;;  %p5092_p0 = pmov %p5089_p8 }
  0x55   : > { %3530 = vsyncadd (%p5092_p0), [#allocation7], 4294957056  ;;  %p5093_p1 = pmov %p5092_p0 }
  0x56   : > { %p5094_p12 = pmov %p5092_p0 }
  0x57   : > { %3532 = dma.done.wait (%p5093_p1), [#allocation10], 2048  }
  0x58   : > { %3534 = vsyncadd (%p5094_p12), [#allocation10], 4294965248  ;;  %p385_p10 = scmp.lt.s32.totalorder %s3639_s13, 1  ;;  %v4989_v0 = vmov 0.0   ;;  %v423_v1 = vld [vmem:[#allocation3 + $0xc8] sm:$0xff]  ;;  %v422_v2 = vld [vmem:[#allocation3 + $0xc0] sm:$0xff] }
  0x59   : > { %556 = vmatprep.mubr.f32.mxu0 %v4989_v0  ;;  %580 = vmatprep.mubr.f32.mxu1 %v4989_v0  ;;  %v415_v3 = vld [vmem:[#allocation3 + $0x88] sm:$0xff]  ;;  %v414_v4 = vld [vmem:[#allocation3 + $0x80] sm:$0xff]  ;;  %vm467_vm0 = vcmask 261120   ;;  %v425_v11 = vld [vmem:[#allocation3 + $0xd8] sm:$0xff]  ;;  %vm3566_vm1 = vmmov 0   ;;  %s382_s28 = sand.u32 1, %s3545_s10  }
  0x5a   : > { %s386_s21 = scalar_select %p385_p10, %s3639_s13, 1  ;;  %516 = vmatprep.subr.mxu0 %v423_v1  ;;  %3075 = vmatprep.subr.mxu1 %v423_v1  ;;  %v407_v5 = vld [vmem:[#allocation3 + $0x48] sm:$0xff]  ;;  %v406_v6 = vld [vmem:[#allocation3 + $0x40] sm:$0xff]  ;;  %v424_v12 = vld [vmem:[#allocation3 + $0xd0] sm:$0xff] }
  0x5b   : > { %517 = vmatpush1.msra.mxu0 %v422_v2  ;;  %3079 = vmatpush1.msra.mxu1 %v422_v2  ;;  %v399_v7 = vld [vmem:[#allocation3 + $0x8] sm:$0xff]  ;;  %v398_v8 = vld [vmem:[#allocation3] sm:$0xff]  ;;  %v417_v13 = vld [vmem:[#allocation3 + $0x98] sm:$0xff]  ;;  %s2851_s29 = sshll.u32 %s382_s28, 3  ;;  %s2915_s18 = sshll.u32 %s3639_s13, 7 }
  0x5c   : > { %s2918_s24 = sshll.u32 %s386_s21, 6  ;;  %518 = vmatprep.subr.mxu0 %v415_v3  ;;  %3076 = vmatprep.subr.mxu1 %v415_v3  ;;  %v427_v14 = vld [vmem:[#allocation3 + $0xe8] sm:$0xff]  ;;  %v416_v17 = vld [vmem:[#allocation3 + $0x90] sm:$0xff]  ;;  %v409_v18 = vld [vmem:[#allocation3 + $0x58] sm:$0xff]  ;;  %s384_s26 = scalar_lea.vmem [#allocation11], %s2851_s29 }
  0x5d   : > { %s3734_s14 = scalar_lea.vmem %s4976_s0, %s2918_s24  ;;  %519 = vmatpush1.msra.mxu0 %v414_v4  ;;  %3080 = vmatpush1.msra.mxu1 %v414_v4  ;;  %v408_v19 = vld [vmem:[#allocation3 + $0x50] sm:$0xff]  ;;  %v426_v20 = vld [vmem:[#allocation3 + $0xe0] sm:$0xff]  ;;  %v419_v23 = vld [vmem:[#allocation3 + $0xa8] sm:$0xff]  ;;  %s2732_s17 = sshll.u32 %s384_s26, 4  ;;  %s2733_s17 = int_to_ptr.vmem [resolvable:$true] %s2732_s17 }
  0x5e   : > { %520 = vmatprep.subr.mxu0 %v407_v5  ;;  %3077 = vmatprep.subr.mxu1 %v407_v5  ;;  %v3737_v9 = vld [vmem:[%s3734_s14] sm:$0xff]  ;;  %v3748_v15 = vld [vmem:[%s3734_s14 + $0x8] sm:$0xff]  ;;  %v3760_v21 = vld [vmem:[%s3734_s14 + $0x10] sm:$0xff]  ;;  %s4941_s27 = scalar_lea.hbm %s4985_s9, %s2915_s18  ;;  %s2719_s23 = scalar_lea.sflag [#allocation5], %s382_s28 }
  0x5f   : > { %521 = vmatpush1.msra.mxu0 %v406_v6  ;;  %3081 = vmatpush1.msra.mxu1 %v406_v6  ;;  %v3740_v10 = vld [vmem:[%s3734_s14 + $0x20] sm:$0xff]  ;;  %v3751_v16 = vld [vmem:[%s3734_s14 + $0x28] sm:$0xff]  ;;  %v3763_v22 = vld [vmem:[%s3734_s14 + $0x30] sm:$0xff]  ;;  %s3481_s21 = scalar_lea.vmem %s2733_s17, 128  ;;  %s3567_s24 = smov [#allocation11]  }
  0x60   : > { %522 = vmatprep.subr.mxu0 %v399_v7  ;;  %3078 = vmatprep.subr.mxu1 %v399_v7  ;;  %v418_v24 = vld [vmem:[#allocation3 + $0xa0] sm:$0xff]  ;;  %v401_v25 = vld [vmem:[#allocation3 + $0x18] sm:$0xff]  ;;  %v411_v26 = vld [vmem:[#allocation3 + $0x68] sm:$0xff]  ;;  %p3482_p3 = scmp.ne.s32.totalorder %s2733_s17, %s3481_s21  ;;  %s3485_s13 = sshll.u32 %s3567_s24, 4  ;;  %s3486_s13 = int_to_ptr.vmem [resolvable:$false] %s3485_s13 }
  0x61   : > { %523 = vmatpush1.msra.mxu0 %v398_v8  ;;  %3082 = vmatpush1.msra.mxu1 %v398_v8  ;;  %v3772_v27 = vld [vmem:[%s3734_s14 + $0x18] sm:$0xff]  ;;  %v400_v29 = vld [vmem:[#allocation3 + $0x10] sm:$0xff]  ;;  %v410_v30 = vld [vmem:[#allocation3 + $0x60] sm:$0xff]  ;;  %s3487_s29 = scalar_lea.vmem %s3486_s13, 256  ;;  %p3488_p7 = scmp.lt.s32.totalorder %s2733_s17, %s3486_s13 }
  0x62   : > { %2854 = vmatmul.mubr.msk.f32.vlgmr.msra.gmra.mxu0 %vm467_vm0, %v3737_v9  ;;  %2858 = vmatmul.mubr.msk.f32.vlgmr.msra.gmra.mxu1 %vm467_vm0, %v3740_v10  ;;  %v3775_v28 = vld [vmem:[%s3734_s14 + $0x38] sm:$0xff]  ;;  %v403_v31 = vld [vmem:[#allocation3 + $0x28] sm:$0xff]  ;;  %v402_v32 = vld [vmem:[#allocation3 + $0x20] sm:$0xff]  ;;  %p3483_p2 = pnand %p3482_p3, %p3656_p5  ;;  %p3489_p6 = scmp.lt.s32.totalorder %s3487_s29, %s3481_s21 }
  0x63   : > { %629 = vmatprep.subr.mxu1 %v425_v11  ;;  %562 = vmatprep.mubr.f32.mxu0 %v4989_v0  ;;  %v429_v33 = vld [vmem:[#allocation3 + $0xf8] sm:$0xff]  ;;  %v3783_v34 = vld [vmem:[#allocation6 + $0x1e8] sm:$0xff]  ;;  %v428_v35 = vld [vmem:[#allocation3 + $0xf0] sm:$0xff] }
  0x64   : > { %630 = vmatpush1.msra.mxu1 %v424_v12  ;;  %586 = vmatprep.mubr.f32.mxu1 %v4989_v0  ;;  %5095 = vst [vmem:[#allocation17_spill] sm:$0xff] %v3783_v34  ;;  %v3786_v36 = vld [vmem:[#allocation6 + $0x1e0] sm:$0xff]  ;;  %v3792_v37 = vld [vmem:[#allocation6 + $0x1c8] sm:$0xff]  ;;  %v421_v42 = vld [vmem:[#allocation3 + $0xb8] sm:$0xff]  ;;  %p3484_p4 = pneg %p3483_p2  ;;  %p3490_p9 = por %p3489_p6, %p3488_p7 }
  0x65   : > { %631 = vmatprep.subr.mxu1 %v417_v13  ;;  %742 = vmatprep.subr.mxu0 %v427_v14  ;;  %v3795_v38 = vld [vmem:[#allocation6 + $0x1c0] sm:$0xff]  ;;  %v3800_v39 = vld [vmem:[#allocation6 + $0x1a8] sm:$0xff]  ;;  %v420_v45 = vld [vmem:[#allocation3 + $0xb0] sm:$0xff] }
  0x66   : > { %2855 = vmatmul.mubr.msk.f32.gmra.mxu0 %vm467_vm0, %v3748_v15  ;;  %2859 = vmatmul.mubr.msk.f32.gmra.mxu1 %vm467_vm0, %v3751_v16  ;;  %v3804_v40 = vld [vmem:[#allocation6 + $0x1a0] sm:$0xff]  ;;  %v3810_v41 = vld [vmem:[#allocation6 + $0x188] sm:$0xff]  ;;  %v413_v52 = vld [vmem:[#allocation3 + $0x78] sm:$0xff]  ;;  %p3491_p8 = pnand %p3490_p9, %p3484_p4 }
  0x67   : > { %632 = vmatpush1.msra.mxu1 %v416_v17  ;;  %568 = vmatprep.mubr.f32.mxu0 %v4989_v0  ;;  %v3814_v43 = vld [vmem:[#allocation6 + $0x180] sm:$0xff]  ;;  %v3818_v44 = vld [vmem:[#allocation6 + $0x168] sm:$0xff]  ;;  %v412_v55 = vld [vmem:[#allocation3 + $0x70] sm:$0xff] }
  0x68   : > { %592 = vmatprep.mubr.f32.mxu1 %v4989_v0  ;;  %633 = vmatprep.subr.mxu1 %v409_v18  ;;  %v3821_v46 = vld [vmem:[#allocation6 + $0x160] sm:$0xff]  ;;  %v3826_v47 = vld [vmem:[#allocation6 + $0x148] sm:$0xff]  ;;  %v405_v62 = vld [vmem:[#allocation3 + $0x38] sm:$0xff] }
  0x69   : > { %634 = vmatpush1.msra.mxu1 %v408_v19  ;;  %743 = vmatpush1.msra.mxu0 %v426_v20  ;;  %5096 = vst [vmem:[#allocation18_spill] sm:$0xff] %v3821_v46  ;;  %5097 = vst [vmem:[#allocation19_spill] sm:$0xff] %v3826_v47  ;;  %v3831_v48 = vld [vmem:[#allocation6 + $0x140] sm:$0xff]  ;;  %v3836_v49 = vld [vmem:[#allocation6 + $0x128] sm:$0xff] }
  0x6a   : > { %2856 = vmatmul.mubr.msk.f32.gmra.mxu0 %vm467_vm0, %v3760_v21  ;;  %2860 = vmatmul.mubr.msk.f32.gmra.mxu1 %vm467_vm0, %v3763_v22  ;;  %v3840_v50 = vld [vmem:[#allocation6 + $0x120] sm:$0xff]  ;;  %v3846_v51 = vld [vmem:[#allocation6 + $0x108] sm:$0xff]  ;;  %v404_v2 = vld [vmem:[#allocation3 + $0x30] sm:$0xff] }
  0x6b   : > { %744 = vmatprep.subr.mxu0 %v419_v23  ;;  %574 = vmatprep.mubr.f32.mxu0 %v4989_v0  ;;  %v3850_v53 = vld [vmem:[#allocation6 + $0x100] sm:$0xff]  ;;  %v3854_v54 = vld [vmem:[#allocation6 + $0xe8] sm:$0xff]  ;;  %v3920_v11 = vld [vmem:[#allocation6 + $0x1f8] sm:$0xff] }
  0x6c   : > { %598 = vmatprep.mubr.f32.mxu1 %v4989_v0  ;;  %745 = vmatpush1.msra.mxu0 %v418_v24  ;;  %v3857_v56 = vld [vmem:[#allocation6 + $0xe0] sm:$0xff]  ;;  %v3862_v57 = vld [vmem:[#allocation6 + $0xc8] sm:$0xff]  ;;  %5109 = vst [vmem:[#allocation31_spill] sm:$0xff] %v3920_v11  ;;  %v3928_v13 = vld [vmem:[#allocation6 + $0x1f0] sm:$0xff] }
  0x6d   : > { %635 = vmatprep.subr.mxu1 %v401_v25  ;;  %746 = vmatprep.subr.mxu0 %v411_v26  ;;  %v3867_v58 = vld [vmem:[#allocation6 + $0xc0] sm:$0xff]  ;;  %v3872_v59 = vld [vmem:[#allocation6 + $0xa8] sm:$0xff]  ;;  %v3932_v14 = vld [vmem:[#allocation6 + $0x1d8] sm:$0xff] }
  0x6e   : > { %2857 = vmatmul.mubr.msk.f32.gmra.mxu0 %vm467_vm0, %v3772_v27  ;;  %2861 = vmatmul.mubr.msk.f32.gmra.mxu1 %vm467_vm0, %v3775_v28  ;;  %5098 = vst [vmem:[#allocation20_spill] sm:$0xff] %v3872_v59  ;;  %v3876_v60 = vld [vmem:[#allocation6 + $0xa0] sm:$0xff]  ;;  %v3882_v61 = vld [vmem:[#allocation6 + $0x88] sm:$0xff]  ;;  %v3937_v17 = vld [vmem:[#allocation6 + $0x1d0] sm:$0xff] }
  0x6f   : > { %636 = vmatpush1.msra.mxu1 %v400_v29  ;;  %747 = vmatpush1.msra.mxu0 %v410_v30  ;;  %5099 = vst [vmem:[#allocation21_spill] sm:$0xff] %v3876_v60  ;;  %5100 = vst [vmem:[#allocation22_spill] sm:$0xff] %v3882_v61  ;;  %v3886_v63 = vld [vmem:[#allocation6 + $0x80] sm:$0xff]  ;;  %v3890_v1 = vld [vmem:[#allocation6 + $0x68] sm:$0xff] }
  0x70   : > { %748 = vmatprep.subr.mxu0 %v403_v31  ;;  %669 = vmatprep.mubr.f32.mxu1 %v4989_v0  ;;  %5101 = vst [vmem:[#allocation23_spill] sm:$0xff] %v3886_v63  ;;  %5102 = vst [vmem:[#allocation24_spill] sm:$0xff] %v3890_v1  ;;  %v3893_v3 = vld [vmem:[#allocation6 + $0x60] sm:$0xff]  ;;  %v3898_v4 = vld [vmem:[#allocation6 + $0x48] sm:$0xff] }
  0x71   : > { %749 = vmatpush1.msra.mxu0 %v402_v32  ;;  %782 = vmatprep.mubr.f32.mxu0 %v4989_v0  ;;  %5103 = vst [vmem:[#allocation25_spill] sm:$0xff] %v3893_v3  ;;  %5104 = vst [vmem:[#allocation26_spill] sm:$0xff] %v3898_v4  ;;  %v3903_v5 = vld [vmem:[#allocation6 + $0x40] sm:$0xff]  ;;  %v3908_v6 = vld [vmem:[#allocation6 + $0x28] sm:$0xff] }
  0x72   : > { %2862 = vmatmul.mubr.msk.f32.vlgmr.msra.gmra.mxu1 %vm467_vm0, %v3737_v9  ;;  %2870 = vmatmul.mubr.msk.f32.vlgmr.msra.gmra.mxu0 %vm467_vm0, %v3737_v9  ;;  %5105 = vst [vmem:[#allocation27_spill] sm:$0xff] %v3903_v5  ;;  %5106 = vst [vmem:[#allocation28_spill] sm:$0xff] %v3908_v6  ;;  %v3912_v7 = vld [vmem:[#allocation6 + $0x20] sm:$0xff]  ;;  %v3918_v8 = vld [vmem:[#allocation6 + $0x8] sm:$0xff] }
  0x73   : > { %840 = vmatprep.subr.mxu1 %v429_v33  ;;  %1034 = vmatprep.subr.mxu0 %v3783_v34  ;;  %5107 = vst [vmem:[#allocation29_spill] sm:$0xff] %v3912_v7  ;;  %5108 = vst [vmem:[#allocation30_spill] sm:$0xff] %v3918_v8  ;;  %v3924_v12 = vld [vmem:[#allocation6] sm:$0xff]  ;;  %v3941_v18 = vld [vmem:[#allocation6 + $0x1b8] sm:$0xff] }
  0x74   : > { %841 = vmatpush1.msra.mxu1 %v428_v35  ;;  %1035 = vmatpush1.msra.mxu0 %v3786_v36  ;;  %5110 = vst [vmem:[#allocation32_spill] sm:$0xff] %v3924_v12  ;;  %v3945_v19 = vld [vmem:[#allocation6 + $0x1b0] sm:$0xff]  ;;  %v3948_v20 = vld [vmem:[#allocation6 + $0x198] sm:$0xff] }
  0x75   : > { %1036 = vmatprep.subr.mxu0 %v3792_v37  ;;  %675 = vmatprep.mubr.f32.mxu1 %v4989_v0  ;;  %v3958_v23 = vld [vmem:[#allocation6 + $0x178] sm:$0xff]  ;;  %v3961_v24 = vld [vmem:[#allocation6 + $0x170] sm:$0xff] }
  0x76   : > { %786 = vmatprep.mubr.f32.mxu0 %v4989_v0  ;;  %1037 = vmatpush1.msra.mxu0 %v3795_v38  ;;  %v3965_v25 = vld [vmem:[#allocation6 + $0x158] sm:$0xff]  ;;  %v3978_v29 = vld [vmem:[#allocation6 + $0x130] sm:$0xff] }
  0x77   : > { %2863 = vmatmul.mubr.msk.f32.gmra.mxu1 %vm467_vm0, %v3748_v15  ;;  %2871 = vmatmul.mubr.msk.f32.gmra.mxu0 %vm467_vm0, %v3748_v15  ;;  %v3975_v26 = vld [vmem:[#allocation6 + $0x138] sm:$0xff]  ;;  %v3995_v32 = vld [vmem:[#allocation6 + $0xf0] sm:$0xff] }
  0x78   : > { %1038 = vmatprep.subr.mxu0 %v3800_v39  ;;  %681 = vmatprep.mubr.f32.mxu1 %v4989_v0  ;;  %v3982_v30 = vld [vmem:[#allocation6 + $0x118] sm:$0xff] }
  0x79   : > { %1039 = vmatpush1.msra.mxu0 %v3804_v40  ;;  %790 = vmatprep.mubr.f32.mxu0 %v4989_v0  ;;  %v3992_v31 = vld [vmem:[#allocation6 + $0xf8] sm:$0xff] }
  0x7a   : > { %1040 = vmatprep.subr.mxu0 %v3810_v41  ;;  %842 = vmatprep.subr.mxu1 %v421_v42  ;;  %v3999_v33 = vld [vmem:[#allocation6 + $0xd8] sm:$0xff]  ;;  %v4012_v42 = vld [vmem:[#allocation6 + $0xb0] sm:$0xff] }
  0x7b   : > { %1041 = vmatpush1.msra.mxu0 %v3814_v43  ;;  %2864 = vmatmul.mubr.msk.f32.gmra.mxu1 %vm467_vm0, %v3760_v21  ;;  %v4009_v35 = vld [vmem:[#allocation6 + $0xb8] sm:$0xff]  ;;  %5112 = vst [vmem:[#allocation34_spill] sm:$0xff] %v4012_v42 }
  0x7c   : > { %2872 = vmatmul.mubr.msk.f32.gmra.mxu0 %vm467_vm0, %v3760_v21  ;;  %1042 = vmatprep.subr.mxu0 %v3818_v44  ;;  %5111 = vst [vmem:[#allocation33_spill] sm:$0xff] %v4009_v35 }
  0x7d   : > { %843 = vmatpush1.msra.mxu1 %v420_v45  ;;  %1043 = vmatpush1.msra.mxu0 %v3821_v46  ;;  %v4016_v45 = vld [vmem:[#allocation6 + $0x98] sm:$0xff] }
  0x7e   : > { %1044 = vmatprep.subr.mxu0 %v3826_v47  ;;  %687 = vmatprep.mubr.f32.mxu1 %v4989_v0  ;;  %5113 = vst [vmem:[#allocation35_spill] sm:$0xff] %v4016_v45 }
  0x7f   : > { %794 = vmatprep.mubr.f32.mxu0 %v4989_v0  ;;  %1045 = vmatpush1.msra.mxu0 %v3831_v48 }
  0x80   : > { %2865 = vmatmul.mubr.msk.f32.gmra.mxu1 %vm467_vm0, %v3772_v27  ;;  %2873 = vmatmul.mubr.msk.f32.gmra.mxu0 %vm467_vm0, %v3772_v27 }
  0x81   : > { %1046 = vmatprep.subr.mxu0 %v3836_v49  ;;  %693 = vmatprep.mubr.f32.mxu1 %v4989_v0 }
  0x82   : > { %1047 = vmatpush1.msra.mxu0 %v3840_v50  ;;  %798 = vmatprep.mubr.f32.mxu0 %v4989_v0 }
  0x83   : > { %1048 = vmatprep.subr.mxu0 %v3846_v51  ;;  %844 = vmatprep.subr.mxu1 %v413_v52  ;;  %v4026_v52 = vld [vmem:[#allocation6 + $0x78] sm:$0xff] }
  0x84   : > { %1049 = vmatpush1.msra.mxu0 %v3850_v53  ;;  %2866 = vmatmul.mubr.msk.f32.gmra.mxu1 %vm467_vm0, %v3740_v10  ;;  %5115 = vst [vmem:[#allocation37_spill] sm:$0xff] %v4026_v52 }
  0x85   : > { %2874 = vmatmul.mubr.msk.f32.gmra.mxu0 %vm467_vm0, %v3740_v10  ;;  %1050 = vmatprep.subr.mxu0 %v3854_v54 }
  0x86   : > { %845 = vmatpush1.msra.mxu1 %v412_v55  ;;  %1051 = vmatpush1.msra.mxu0 %v3857_v56  ;;  %v4029_v55 = vld [vmem:[#allocation6 + $0x70] sm:$0xff] }
  0x87   : > { %1052 = vmatprep.subr.mxu0 %v3862_v57  ;;  %699 = vmatprep.mubr.f32.mxu1 %v4989_v0  ;;  %5116 = vst [vmem:[#allocation38_spill] sm:$0xff] %v4029_v55 }
  0x88   : > { %802 = vmatprep.mubr.f32.mxu0 %v4989_v0  ;;  %1053 = vmatpush1.msra.mxu0 %v3867_v58 }
  0x89   : > { %2867 = vmatmul.mubr.msk.f32.gmra.mxu1 %vm467_vm0, %v3751_v16  ;;  %2875 = vmatmul.mubr.msk.f32.gmra.mxu0 %vm467_vm0, %v3751_v16 }
  0x8a   : > { %1054 = vmatprep.subr.mxu0 %v3872_v59  ;;  %705 = vmatprep.mubr.f32.mxu1 %v4989_v0 }
  0x8b   : > { %1055 = vmatpush1.msra.mxu0 %v3876_v60  ;;  %806 = vmatprep.mubr.f32.mxu0 %v4989_v0 }
  0x8c   : > { %1056 = vmatprep.subr.mxu0 %v3882_v61  ;;  %846 = vmatprep.subr.mxu1 %v405_v62  ;;  %v4033_v62 = vld [vmem:[#allocation6 + $0x58] sm:$0xff] }
  0x8d   : > { %1057 = vmatpush1.msra.mxu0 %v3886_v63  ;;  %2868 = vmatmul.mubr.msk.f32.gmra.mxu1 %vm467_vm0, %v3763_v22  ;;  %5117 = vst [vmem:[#allocation39_spill] sm:$0xff] %v4033_v62 }
  0x8e   : > { %2876 = vmatmul.mubr.msk.f32.gmra.mxu0 %vm467_vm0, %v3763_v22  ;;  %1058 = vmatprep.subr.mxu0 %v3890_v1 }
  0x8f   : > { %847 = vmatpush1.msra.mxu1 %v404_v2  ;;  %1059 = vmatpush1.msra.mxu0 %v3893_v3  ;;  %v4043_v2 = vld [vmem:[#allocation6 + $0x38] sm:$0xff] }
  0x90   : > { %1060 = vmatprep.subr.mxu0 %v3898_v4  ;;  %711 = vmatprep.mubr.f32.mxu1 %v4989_v0  ;;  %5119 = vst [vmem:[#allocation41_spill] sm:$0xff] %v4043_v2 }
  0x91   : > { %810 = vmatprep.mubr.f32.mxu0 %v4989_v0  ;;  %1061 = vmatpush1.msra.mxu0 %v3903_v5 }
  0x92   : > { %2869 = vmatmul.mubr.msk.f32.gmra.mxu1 %vm467_vm0, %v3775_v28  ;;  %2877 = vmatmul.mubr.msk.f32.gmra.mxu0 %vm467_vm0, %v3775_v28 }
  0x93   : > { %1062 = vmatprep.subr.mxu0 %v3908_v6  ;;  %880 = vmatprep.mubr.f32.mxu1 %v4989_v0 }
  0x94   : > { %1063 = vmatpush1.msra.mxu0 %v3912_v7  ;;  %1098 = vmatprep.mubr.f32.mxu0 %v4989_v0 }
  0x95   : > { %1064 = vmatprep.subr.mxu0 %v3918_v8  ;;  %1105 = vmatprep.subr.mxu1 %v3920_v11 }
  0x96   : > { %1065 = vmatpush1.msra.mxu0 %v3924_v12  ;;  %2878 = vmatmul.mubr.msk.f32.vlgmr.msra.gmra.mxu1 %vm467_vm0, %v3737_v9  ;;  %v3954_v9 = vld [vmem:[#allocation6 + $0x190] sm:$0xff] }
  0x97   : > { %1099 = vmatmul.mubr.f32.vlgmr.msra.gmra.mxu0 %v4989_v0  ;;  %1106 = vmatpush1.msra.mxu1 %v3928_v13 }
  0x98   : > { %1107 = vmatprep.subr.mxu1 %v3932_v14  ;;  %884 = vmatprep.mubr.f32.mxu1 %v4989_v0 }
  0x99   : > { %1108 = vmatpush1.msra.mxu1 %v3937_v17  ;;  %1211 = vmatprep.subr.mxu0 %v3783_v34 }
  0x9a   : > { %2879 = vmatmul.mubr.msk.f32.gmra.mxu1 %vm467_vm0, %v3748_v15  ;;  %1109 = vmatprep.subr.mxu1 %v3941_v18  ;;  %v3971_v15 = vld [vmem:[#allocation6 + $0x150] sm:$0xff] }
  0x9b   : > { %1110 = vmatpush1.msra.mxu1 %v3945_v19  ;;  %888 = vmatprep.mubr.f32.mxu1 %v4989_v0 }
  0x9c   : > { %1111 = vmatprep.subr.mxu1 %v3948_v20  ;;  %1212 = vmatpush1.msra.mxu0 %v3786_v36 }
  0x9d   : > { %1112 = vmatpush1.msra.mxu1 %v3954_v9  ;;  %1213 = vmatprep.subr.mxu0 %v3792_v37 }
  0x9e   : > { %2880 = vmatmul.mubr.msk.f32.gmra.mxu1 %vm467_vm0, %v3760_v21  ;;  %1113 = vmatprep.subr.mxu1 %v3958_v23  ;;  %v3988_v21 = vld [vmem:[#allocation6 + $0x110] sm:$0xff] }
  0x9f   : > { %1114 = vmatpush1.msra.mxu1 %v3961_v24  ;;  %892 = vmatprep.mubr.f32.mxu1 %v4989_v0 }
  0xa0   : > { %1115 = vmatprep.subr.mxu1 %v3965_v25  ;;  %1214 = vmatpush1.msra.mxu0 %v3795_v38 }
  0xa1   : > { %1116 = vmatpush1.msra.mxu1 %v3971_v15  ;;  %1215 = vmatprep.subr.mxu0 %v3800_v39 }
  0xa2   : > { %2881 = vmatmul.mubr.msk.f32.gmra.mxu1 %vm467_vm0, %v3772_v27  ;;  %1117 = vmatprep.subr.mxu1 %v3975_v26  ;;  %v4005_v27 = vld [vmem:[#allocation6 + $0xd0] sm:$0xff] }
  0xa3   : > { %1118 = vmatpush1.msra.mxu1 %v3978_v29  ;;  %896 = vmatprep.mubr.f32.mxu1 %v4989_v0 }
  0xa4   : > { %1119 = vmatprep.subr.mxu1 %v3982_v30  ;;  %1216 = vmatpush1.msra.mxu0 %v3804_v40 }
  0xa5   : > { %1120 = vmatpush1.msra.mxu1 %v3988_v21  ;;  %1217 = vmatprep.subr.mxu0 %v3810_v41 }
  0xa6   : > { %2882 = vmatmul.mubr.msk.f32.gmra.mxu1 %vm467_vm0, %v3740_v10  ;;  %1121 = vmatprep.subr.mxu1 %v3992_v31  ;;  %v4022_v10 = vld [vmem:[#allocation6 + $0x90] sm:$0xff] }
  0xa7   : > { %1122 = vmatpush1.msra.mxu1 %v3995_v32  ;;  %900 = vmatprep.mubr.f32.mxu1 %v4989_v0  ;;  %5114 = vst [vmem:[#allocation36_spill] sm:$0xff] %v4022_v10 }
  0xa8   : > { %1123 = vmatprep.subr.mxu1 %v3999_v33  ;;  %1218 = vmatpush1.msra.mxu0 %v3814_v43 }
  0xa9   : > { %1124 = vmatpush1.msra.mxu1 %v4005_v27  ;;  %1219 = vmatprep.subr.mxu0 %v3818_v44 }
  0xaa   : > { %2883 = vmatmul.mubr.msk.f32.gmra.mxu1 %vm467_vm0, %v3751_v16  ;;  %1125 = vmatprep.subr.mxu1 %v4009_v35  ;;  %v4039_v16 = vld [vmem:[#allocation6 + $0x50] sm:$0xff] }
  0xab   : > { %1126 = vmatpush1.msra.mxu1 %v4012_v42  ;;  %904 = vmatprep.mubr.f32.mxu1 %v4989_v0  ;;  %5118 = vst [vmem:[#allocation40_spill] sm:$0xff] %v4039_v16 }
  0xac   : > { %1127 = vmatprep.subr.mxu1 %v4016_v45  ;;  %1220 = vmatpush1.msra.mxu0 %v3821_v46  ;;  %v4046_v46 = vld [vmem:[#allocation6 + $0x30] sm:$0xff] }
  0xad   : > { %1128 = vmatpush1.msra.mxu1 %v4022_v10  ;;  %1221 = vmatprep.subr.mxu0 %v3826_v47  ;;  %5120 = vst [vmem:[#allocation42_spill] sm:$0xff] %v4046_v46  ;;  %v4050_v47 = vld [vmem:[#allocation6 + $0x18] sm:$0xff] }
  0xae   : > { %2884 = vmatmul.mubr.msk.f32.gmra.mxu1 %vm467_vm0, %v3763_v22  ;;  %1129 = vmatprep.subr.mxu1 %v4026_v52  ;;  %5121 = vst [vmem:[#allocation43_spill] sm:$0xff] %v4050_v47  ;;  %v4056_v22 = vld [vmem:[#allocation6 + $0x10] sm:$0xff] }
  0xaf   : > { %1130 = vmatpush1.msra.mxu1 %v4029_v55  ;;  %908 = vmatprep.mubr.f32.mxu1 %v4989_v0  ;;  %5122 = vst [vmem:[#allocation44_spill] sm:$0xff] %v4056_v22 }
  0xb0   : > { %1131 = vmatprep.subr.mxu1 %v4033_v62  ;;  %1222 = vmatpush1.msra.mxu0 %v3831_v48 }
  0xb1   : > { %1132 = vmatpush1.msra.mxu1 %v4039_v16  ;;  %1223 = vmatprep.subr.mxu0 %v3836_v49 }
  0xb2   : > { %2885 = vmatmul.mubr.msk.f32.gmra.mxu1 %vm467_vm0, %v3775_v28  ;;  %1133 = vmatprep.subr.mxu1 %v4043_v2  ;;  %v432_v28 = vlaneseq }
  0xb3   : > { %1134 = vmatpush1.msra.mxu1 %v4046_v46  ;;  %1169 = vmatprep.mubr.f32.mxu1 %v4989_v0 }
  0xb4   : > { %1135 = vmatprep.subr.mxu1 %v4050_v47  ;;  %1224 = vmatpush1.msra.mxu0 %v3840_v50 }
  0xb5   : > { %1136 = vmatpush1.msra.mxu1 %v4056_v22  ;;  %1225 = vmatprep.subr.mxu0 %v3846_v51 }
  0xb6   : > { %1170 = vmatmul.mubr.f32.vlgmr.msra.gmra.mxu1 %v4989_v0  ;;  %1282 = vmatprep.subr.mxu1 %v3920_v11 }
  0xb7   : > { %1283 = vmatpush1.msra.mxu1 %v3928_v13  ;;  %1226 = vmatpush1.msra.mxu0 %v3850_v53 }
  0xb8   : > { %1284 = vmatprep.subr.mxu1 %v3932_v14  ;;  %1227 = vmatprep.subr.mxu0 %v3854_v54 }
  0xb9   : > { %1285 = vmatpush1.msra.mxu1 %v3937_v17  ;;  %1228 = vmatpush1.msra.mxu0 %v3857_v56 }
  0xba   : > { %1286 = vmatprep.subr.mxu1 %v3941_v18  ;;  %1229 = vmatprep.subr.mxu0 %v3862_v57 }
  0xbb   : > { %1287 = vmatpush1.msra.mxu1 %v3945_v19  ;;  %1230 = vmatpush1.msra.mxu0 %v3867_v58 }
  0xbc   : > { %1288 = vmatprep.subr.mxu1 %v3948_v20  ;;  %1231 = vmatprep.subr.mxu0 %v3872_v59 }
  0xbd   : > { %1289 = vmatpush1.msra.mxu1 %v3954_v9  ;;  %1232 = vmatpush1.msra.mxu0 %v3876_v60 }
  0xbe   : > { %1290 = vmatprep.subr.mxu1 %v3958_v23  ;;  %1233 = vmatprep.subr.mxu0 %v3882_v61 }
  0xbf   : > { %1291 = vmatpush1.msra.mxu1 %v3961_v24  ;;  %1234 = vmatpush1.msra.mxu0 %v3886_v63 }
  0xc0   : > { %1292 = vmatprep.subr.mxu1 %v3965_v25  ;;  %1235 = vmatprep.subr.mxu0 %v3890_v1 }
  0xc1   : > { %1293 = vmatpush1.msra.mxu1 %v3971_v15  ;;  %1236 = vmatpush1.msra.mxu0 %v3893_v3 }
  0xc2   : > { %1294 = vmatprep.subr.mxu1 %v3975_v26  ;;  %1237 = vmatprep.subr.mxu0 %v3898_v4 }
  0xc3   : > { %1295 = vmatpush1.msra.mxu1 %v3978_v29  ;;  %1238 = vmatpush1.msra.mxu0 %v3903_v5 }
  0xc4   : > { %1296 = vmatprep.subr.mxu1 %v3982_v30  ;;  %1239 = vmatprep.subr.mxu0 %v3908_v6 }
  0xc5   : > { %1297 = vmatpush1.msra.mxu1 %v3988_v21  ;;  %1240 = vmatpush1.msra.mxu0 %v3912_v7 }
  0xc6   : > { %1298 = vmatprep.subr.mxu1 %v3992_v31  ;;  %1241 = vmatprep.subr.mxu0 %v3918_v8 }
  0xc7   : > { %1299 = vmatpush1.msra.mxu1 %v3995_v32  ;;  %1242 = vmatpush1.msra.mxu0 %v3924_v12  ;;  %v4124_v12 = vld [vmem:[%s4978_s2] sm:$0xff] }
  0xc8   : > { %1300 = vmatprep.subr.mxu1 %v3999_v33  ;;  %1275 = vmatprep.mubr.f32.mxu0 %v4989_v0 }
  0xc9   : > { %1301 = vmatpush1.msra.mxu1 %v4005_v27  ;;  %1346 = vmatprep.mubr.f32.mxu1 %v4989_v0  ;;  %v4118_v0 = vshrl.u32 %v432_v28, 7 }
  0xca   : > { %1302 = vmatprep.subr.mxu1 %v4009_v35  ;;  %1388 = vmatprep.subr.mxu0 %v3783_v34 }
  0xcb   : > { %1303 = vmatpush1.msra.mxu1 %v4012_v42  ;;  %v434_v34 = vsub.s32 0, %v4118_v0  ;;  %v438_v8 = vsub.s32 1, %v4118_v0  ;;  %v454_v59 = vsub.s32 6, %v4118_v0 }
  0xcc   : > { %1304 = vmatprep.subr.mxu1 %v4016_v45 }
  0xcd   : > { %1305 = vmatpush1.msra.mxu1 %v4022_v10 }
  0xce   : > { %1306 = vmatprep.subr.mxu1 %v4026_v52 }
  0xcf   : > { %1307 = vmatpush1.msra.mxu1 %v4029_v55 }
  0xd0   : > { %1308 = vmatprep.subr.mxu1 %v4033_v62 }
  0xd1   : > { %1309 = vmatpush1.msra.mxu1 %v4039_v16 }
  0xd2   : > { %1310 = vmatprep.subr.mxu1 %v4043_v2 }
  0xd3   : > { %1311 = vmatpush1.msra.mxu1 %v4046_v46  ;;  %v4128_v46 = vrot.slane %v4124_v12, %v434_v34 }
  0xd4   : > { %1312 = vmatprep.subr.mxu1 %v4050_v47  ;;  %v4131_v47 = vrot.slane %v4124_v12, %v438_v8 }
  0xd5   : > { %1313 = vmatpush1.msra.mxu1 %v4056_v22 }
  0xd6   : > { %1459 = vmatprep.subr.mxu1 %v3920_v11 }
 0x122   : > { %v4133_v22 = vpop.f32.mrf.mxu0  ;;  %v582_v11 = vpop.f32.mrf.mxu1 }
 0x123   : > { %v4136_v28 = vadd.f32 %v582_v11, %v4128_v46 }
 0x124   : > { %v4138_v7 = vpop.f32.mrf.mxu0  ;;  %v584_v2 = vpop.f32.mrf.mxu1 }
 0x125   : > { %5123 = vst [vmem:[#allocation45_spill] sm:$0xff] %v4136_v28  ;;  %v4141_v6 = vadd.f32 %v584_v2, %v4131_v47 }
 0x126   : > { %v564_v16 = vpop.f32.mrf.mxu0  ;;  %v588_v5 = vpop.f32.mrf.mxu1 }
 0x127   : > { %5124 = vst [vmem:[#allocation46_spill] sm:$0xff] %v4141_v6  ;;  %v4144_v34 = vadd.f32 %v564_v16, %v4128_v46  ;;  %v4147_v8 = vadd.f32 %v588_v5, %v4128_v46 }
 0x128   : > { %v566_v62 = vpop.f32.mrf.mxu0  ;;  %v590_v4 = vpop.f32.mrf.mxu1 }
 0x129   : > { %5125 = vst [vmem:[#allocation47_spill] sm:$0xff] %v4144_v34  ;;  %5126 = vst [vmem:[#allocation48_spill] sm:$0xff] %v4147_v8  ;;  %v4150_v55 = vadd.f32 %v566_v62, %v4131_v47  ;;  %v4153_v11 = vadd.f32 %v590_v4, %v4131_v47 }
 0x12a   : > { %v570_v28 = vpop.f32.mrf.mxu0  ;;  %v594_v3 = vpop.f32.mrf.mxu1 }
 0x12b   : > { %5127 = vst [vmem:[#allocation49_spill] sm:$0xff] %v4150_v55  ;;  %5128 = vst [vmem:[#allocation50_spill] sm:$0xff] %v4153_v11  ;;  %v4156_v2 = vadd.f32 %v570_v28, %v4128_v46  ;;  %v4159_v6 = vadd.f32 %v594_v3, %v4128_v46 }
 0x12c   : > { %v572_v16 = vpop.f32.mrf.mxu0  ;;  %v596_v34 = vpop.f32.mrf.mxu1 }
 0x12d   : > { %5129 = vst [vmem:[#allocation51_spill] sm:$0xff] %v4156_v2  ;;  %5130 = vst [vmem:[#allocation52_spill] sm:$0xff] %v4159_v6  ;;  %v4162_v5 = vadd.f32 %v572_v16, %v4131_v47  ;;  %v4165_v8 = vadd.f32 %v596_v34, %v4131_v47  ;;  %v442_v16 = vsub.s32 2, %v4118_v0 }
 0x12e   : > { %v576_v62 = vpop.f32.mrf.mxu0  ;;  %v600_v55 = vpop.f32.mrf.mxu1 }
 0x12f   : > { %5131 = vst [vmem:[#allocation53_spill] sm:$0xff] %v4162_v5  ;;  %5132 = vst [vmem:[#allocation54_spill] sm:$0xff] %v4165_v8  ;;  %v4168_v4 = vadd.f32 %v576_v62, %v4128_v46  ;;  %v4171_v11 = vadd.f32 %v600_v55, %v4128_v46  ;;  %v446_v5 = vsub.s32 3, %v4118_v0  ;;  %v4186_v55 = vrot.slane %v4124_v12, %v442_v16 }
 0x130   : > { %v578_v28 = vpop.f32.mrf.mxu0  ;;  %v602_v2 = vpop.f32.mrf.mxu1 }
 0x131   : > { %5133 = vst [vmem:[#allocation55_spill] sm:$0xff] %v4168_v4  ;;  %5134 = vst [vmem:[#allocation56_spill] sm:$0xff] %v4171_v11  ;;  %v4174_v3 = vadd.f32 %v578_v28, %v4131_v47  ;;  %v4177_v6 = vadd.f32 %v602_v2, %v4131_v47  ;;  %v4189_v28 = vrot.slane %v4124_v12, %v446_v5 }
 0x132   : > { %v4180_v34 = vpop.f32.mrf.mxu1  ;;  %v784_v8 = vpop.f32.mrf.mxu0 }
 0x133   : > { %5135 = vst [vmem:[#allocation57_spill] sm:$0xff] %v4174_v3  ;;  %5136 = vst [vmem:[#allocation58_spill] sm:$0xff] %v4177_v6 }
 0x134   : > { %v4183_v62 = vpop.f32.mrf.mxu1  ;;  %v785_v4 = vpop.f32.mrf.mxu0 }
 0x137   : > { %v677_v11 = vpop.f32.mrf.mxu1  ;;  %v788_v52 = vpop.f32.mrf.mxu0 }
 0x138   : > { %v4192_v2 = vadd.f32 %v677_v11, %v4186_v55 }
 0x139   : > { %v679_v6 = vpop.f32.mrf.mxu1  ;;  %v789_v3 = vpop.f32.mrf.mxu0 }
 0x13a   : > { %5137 = vst [vmem:[#allocation59_spill] sm:$0xff] %v4192_v2  ;;  %v4195_v8 = vadd.f32 %v679_v6, %v4189_v28 }
 0x13b   : > { %v683_v1 = vpop.f32.mrf.mxu1 }
 0x13c   : > { %5138 = vst [vmem:[#allocation60_spill] sm:$0xff] %v4195_v8  ;;  %v4198_v10 = vadd.f32 %v683_v1, %v4186_v55  ;;  %v792_v4 = vpop.f32.mrf.mxu0 }
 0x13d   : > { %v685_v16 = vpop.f32.mrf.mxu1 }
 0x13e   : > { %5139 = vst [vmem:[#allocation61_spill] sm:$0xff] %v4198_v10  ;;  %v4201_v63 = vadd.f32 %v685_v16, %v4189_v28  ;;  %v793_v52 = vpop.f32.mrf.mxu0 }
 0x140   : > { %5140 = vst [vmem:[#allocation62_spill] sm:$0xff] %v4201_v63  ;;  %v689_v5 = vpop.f32.mrf.mxu1  ;;  %v796_v45 = vpop.f32.mrf.mxu0 }
 0x141   : > { %v4204_v11 = vadd.f32 %v689_v5, %v4186_v55 }
 0x142   : > { %v691_v2 = vpop.f32.mrf.mxu1  ;;  %v797_v3 = vpop.f32.mrf.mxu0 }
 0x143   : > { %5141 = vst [vmem:[#allocation63_spill] sm:$0xff] %v4204_v11  ;;  %v4207_v6 = vadd.f32 %v691_v2, %v4189_v28 }
 0x144   : > { %v695_v8 = vpop.f32.mrf.mxu1 }
 0x145   : > { %5142 = vst [vmem:[#allocation64_spill] sm:$0xff] %v4207_v6  ;;  %v4210_v1 = vadd.f32 %v695_v8, %v4186_v55  ;;  %v800_v4 = vpop.f32.mrf.mxu0 }
 0x146   : > { %v697_v10 = vpop.f32.mrf.mxu1 }
 0x147   : > { %5143 = vst [vmem:[#allocation65_spill] sm:$0xff] %v4210_v1  ;;  %v4213_v16 = vadd.f32 %v697_v10, %v4189_v28  ;;  %v801_v52 = vpop.f32.mrf.mxu0  ;;  %v450_v10 = vsub.s32 4, %v4118_v0 }
 0x149   : > { %5144 = vst [vmem:[#allocation66_spill] sm:$0xff] %v4213_v16  ;;  %v701_v63 = vpop.f32.mrf.mxu1  ;;  %v804_v45 = vpop.f32.mrf.mxu0 }
 0x14a   : > { %v4216_v5 = vadd.f32 %v701_v63, %v4186_v55 }
 0x14b   : > { %v703_v11 = vpop.f32.mrf.mxu1  ;;  %v805_v3 = vpop.f32.mrf.mxu0 }
 0x14c   : > { %5145 = vst [vmem:[#allocation67_spill] sm:$0xff] %v4216_v5  ;;  %v4219_v2 = vadd.f32 %v703_v11, %v4189_v28  ;;  %v451_v11 = vrot.slane %v4124_v12, %v450_v10 }
 0x14d   : > { %v707_v6 = vpop.f32.mrf.mxu1 }
 0x14e   : > { %5146 = vst [vmem:[#allocation68_spill] sm:$0xff] %v4219_v2  ;;  %v4222_v8 = vadd.f32 %v707_v6, %v4186_v55  ;;  %v808_v4 = vpop.f32.mrf.mxu0 }
 0x14f   : > { %v709_v1 = vpop.f32.mrf.mxu1 }
 0x150   : > { %5147 = vst [vmem:[#allocation69_spill] sm:$0xff] %v4222_v8  ;;  %v4226_v52 = vadd.f32 %v709_v1, %v4189_v28  ;;  %v809_v45 = vpop.f32.mrf.mxu0  ;;  %v559_v1 = vadd.f32 %v4133_v22, %v4128_v46 }
 0x152   : > { %5148 = vst [vmem:[#allocation70_spill] sm:$0xff] %v4226_v52  ;;  %v713_v16 = vpop.f32.mrf.mxu1  ;;  %v812_v63 = vpop.f32.mrf.mxu0  ;;  %v561_v52 = vadd.f32 %v4138_v7, %v4131_v47 }
 0x153   : > { %v4229_v5 = vadd.f32 %v713_v16, %v4186_v55  ;;  %v813_v8 = vadd.f32 %v812_v63, %v451_v11 }
 0x154   : > { %v715_v3 = vpop.f32.mrf.mxu1  ;;  %v814_v2 = vpop.f32.mrf.mxu0 }
 0x155   : > { %5149 = vst [vmem:[#allocation71_spill] sm:$0xff] %v4229_v5  ;;  %v4233_v6 = vadd.f32 %v715_v3, %v4189_v28  ;;  %v2886_v5 = vmul.f32 -1.442695, %v813_v8 }
 0x156   : > { %v882_v4 = vpop.f32.mrf.mxu1 }
 0x157   : > { %5150 = vst [vmem:[#allocation72_spill] sm:$0xff] %v4233_v6  ;;  %v1100_v61 = vpop.f32.mrf.mxu0  ;;  %3171 = vpow2.f32 %v2886_v5  ;;  %v455_v5 = vrot.slane %v4124_v12, %v454_v59  ;;  %v674_v59 = vadd.f32 %v4183_v62, %v4189_v28 }
 0x158   : > { %v883_v42 = vpop.f32.mrf.mxu1  ;;  %v1176_v60 = vadd.f32 %v1100_v61, %v559_v1  ;;  %v458_v61 = vsub.s32 7, %v4118_v0 }
 0x159   : > { %v1102_v45 = vpop.f32.mrf.mxu0 }
 0x15a   : > { %v886_v16 = vpop.f32.mrf.mxu1  ;;  %v1177_v10 = vadd.f32 %v1102_v45, %v561_v52  ;;  %v2888_v3 = vmul.f32 -1.442695, %v1176_v60  ;;  %v459_v45 = vrot.slane %v4124_v12, %v458_v61 }
 0x15c   : > { %v887_v35 = vpop.f32.mrf.mxu1  ;;  %v2889_v6 = vmul.f32 -1.442695, %v1177_v10  ;;  %3173 = vpow2.f32 %v2888_v3 }
 0x15e   : > { %v890_v2 = vpop.f32.mrf.mxu1  ;;  %3175 = vpow2.f32 %v2889_v6 }
 0x160   : > { %v891_v4 = vpop.f32.mrf.mxu1 }
 0x161   : > { %v672_v4 = vadd.f32 %v4180_v34, %v4186_v55 }
 0x162   : > { %v894_v63 = vpop.f32.mrf.mxu1 }
 0x164   : > { %v895_v42 = vpop.f32.mrf.mxu1  ;;  %v3172_v47 = vpop.eup %3171 }
 0x165   : > { %v950_v35 = vadd.f32 1.0, %v3172_v47 }
 0x166   : > { %v898_v11 = vpop.f32.mrf.mxu1 }
 0x167   : > { %3177 = vrcp.f32 %v950_v35 }
 0x168   : > { %v899_v46 = vpop.f32.mrf.mxu1 }
 0x169   : > { %v3174_v60 = vpop.eup %3173 }
 0x16a   : > { %v902_v22 = vpop.f32.mrf.mxu1  ;;  %v1183_v16 = vadd.f32 1.0, %v3174_v60 }
 0x16b   : > { %v3176_v1 = vpop.eup %3175 }
 0x16c   : > { %v903_v7 = vpop.f32.mrf.mxu1  ;;  %v1189_v2 = vadd.f32 1.0, %v3176_v1 }
 0x16e   : > { %v906_v8 = vpop.f32.mrf.mxu1 }
 0x170   : > { %v907_v52 = vpop.f32.mrf.mxu1 }
 0x172   : > { %v910_v6 = vpop.f32.mrf.mxu1 }
 0x173   : > { %v911_v10 = vadd.f32 %v910_v6, %v455_v5 }
 0x174   : > { %v912_v3 = vpop.f32.mrf.mxu1  ;;  %v3178_v47 = vpop.eup %3177 }
 0x175   : > { %3179 = vtanh.f32 %v911_v10  ;;  %v913_v0 = vadd.f32 %v912_v3, %v459_v45 }
 0x176   : > { %v1171_v63 = vpop.f32.mrf.mxu1  ;;  %3181 = vrcp.f32 %v1183_v16 }
 0x177   : > { %v2887_v42 = vmul.f32 -1.442695, %v913_v0  ;;  %v1178_v11 = vadd.f32 %v1171_v63, %v672_v4  ;;  %3183 = vrcp.f32 %v1189_v2  ;;  %v5164_v4 = vld [vmem:[#allocation25_spill] sm:$0xff]  ;;  %v5165_v0 = vld [vmem:[#allocation38_spill] sm:$0xff] }
 0x178   : > { %v1173_v12 = vpop.f32.mrf.mxu1  ;;  %v5166_v63 = vld [vmem:[#allocation26_spill] sm:$0xff] }
 0x179   : > { %3185 = vpow2.f32 %v2887_v42  ;;  %v1179_v46 = vadd.f32 %v1173_v12, %v674_v59  ;;  %v5167_v59 = vld [vmem:[#allocation39_spill] sm:$0xff]  ;;  %v5170_v12 = vld [vmem:[#allocation28_spill] sm:$0xff] }
 0x17a   : > { %3187 = vtanh.f32 %v1178_v11  ;;  %v5168_v42 = vld [vmem:[#allocation27_spill] sm:$0xff]  ;;  %v5169_v11 = vld [vmem:[#allocation40_spill] sm:$0xff] }
 0x17b   : > { %v2890_v22 = vmul.f32 -1.442695, %v1179_v46  ;;  %v5171_v46 = vld [vmem:[#allocation41_spill] sm:$0xff] }
 0x17d   : > { %3189 = vpow2.f32 %v2890_v22  ;;  %v5172_v22 = vld [vmem:[#allocation29_spill] sm:$0xff] }
 0x182   : > { %v3180_v7 = vpop.eup %3179 }
 0x183   : > { %v960_v61 = vmul.f32 %v3180_v7, %v3178_v47  ;;  %v3182_v34 = vpop.eup %3181  ;;  %v5173_v47 = vld [vmem:[#allocation42_spill] sm:$0xff] }
 0x184   : > { %v3184_v55 = vpop.eup %3183  ;;  %v5174_v7 = vld [vmem:[#allocation30_spill] sm:$0xff] }
 0x185   : > { %v1199_v60 = vmul.f32 0.0, %v3184_v55  ;;  %3191 = vtanh.f32 %v960_v61  ;;  %v5175_v61 = vld [vmem:[#allocation43_spill] sm:$0xff]  ;;  %v5177_v55 = vmov 0.0  }
 0x186   : > { %v3186_v8 = vpop.eup %3185 }
 0x187   : > { %v3188_v35 = vpop.eup %3187  ;;  %v957_v5 = vadd.f32 1.0, %v3186_v8  ;;  %v5178_v8 = vld [vmem:[#allocation44_spill] sm:$0xff] }
 0x188   : > { %v1200_v62 = vmul.f32 %v3188_v35, %v3182_v34  ;;  %v5176_v34 = vld [vmem:[#allocation32_spill] sm:$0xff]  ;;  %v5179_v35 = vld [vmem:[#allocation17_spill] sm:$0xff] }
 0x189   : > { %3193 = vrcp.f32 %v957_v5  ;;  %v5180_v5 = vld [vmem:[#allocation31_spill] sm:$0xff] }
 0x18a   : > { %v3190_v28 = vpop.eup %3189  ;;  %v4247_v52 = vadd.f32 %v1200_v62, %v1199_v60  ;;  %v5181_v62 = vld [vmem:[#allocation47_spill] sm:$0xff] }
 0x18b   : > { %v1196_v1 = vadd.f32 1.0, %v3190_v28 }
 0x18c   : > { %3195 = vtanh.f32 %v4247_v52 }
 0x18d   : > { %3197 = vrcp.f32 %v1196_v1 }
 0x192   : > { %v3192_v45 = vpop.eup %3191 }
 0x196   : > { %v3194_v6 = vpop.eup %3193 }
 0x197   : > { %v4250_v16 = vmul.f32 %v3194_v6, %v3192_v45  ;;  %v5182_v6 = vld [vmem:[#allocation49_spill] sm:$0xff] }
 0x199   : > { %5151 = vst [vmem:[#allocation73_spill] sm:$0xff] %v4250_v16  ;;  %v3196_v10 = vpop.eup %3195 }
 0x19a   : > { %v3198_v2 = vpop.eup %3197 }
 0x19b   : > { %v1203_v3 = vmul.f32 %v3198_v2, %v3196_v10 }
 0x19d   : > { %1276 = vmatmul.mubr.f32.vlgmr.msra.gmra.mxu0 %v1203_v3  ;;  %1347 = vmatmul.mubr.f32.vlgmr.msra.gmra.mxu1 %v1203_v3 }
 0x19e   : > { %1389 = vmatpush1.msra.mxu0 %v3786_v36  ;;  %1460 = vmatpush1.msra.mxu1 %v3928_v13  ;;  %v5152_v36 = vld [vmem:[#allocation18_spill] sm:$0xff] }
 0x19f   : > { %1390 = vmatprep.subr.mxu0 %v3792_v37  ;;  %1461 = vmatprep.subr.mxu1 %v3932_v14  ;;  %v5153_v37 = vld [vmem:[#allocation19_spill] sm:$0xff] }
 0x1a0   : > { %1391 = vmatpush1.msra.mxu0 %v3795_v38  ;;  %1462 = vmatpush1.msra.mxu1 %v3937_v17  ;;  %v5154_v38 = vld [vmem:[#allocation20_spill] sm:$0xff] }
 0x1a1   : > { %1392 = vmatprep.subr.mxu0 %v3800_v39  ;;  %1463 = vmatprep.subr.mxu1 %v3941_v18  ;;  %v5155_v39 = vld [vmem:[#allocation33_spill] sm:$0xff] }
 0x1a2   : > { %1393 = vmatpush1.msra.mxu0 %v3804_v40  ;;  %1464 = vmatpush1.msra.mxu1 %v3945_v19  ;;  %v5156_v40 = vld [vmem:[#allocation21_spill] sm:$0xff] }
 0x1a3   : > { %1394 = vmatprep.subr.mxu0 %v3810_v41  ;;  %1465 = vmatprep.subr.mxu1 %v3948_v20  ;;  %v5157_v41 = vld [vmem:[#allocation34_spill] sm:$0xff] }
 0x1a4   : > { %1395 = vmatpush1.msra.mxu0 %v3814_v43  ;;  %1466 = vmatpush1.msra.mxu1 %v3954_v9  ;;  %v5158_v43 = vld [vmem:[#allocation22_spill] sm:$0xff] }
 0x1a5   : > { %1396 = vmatprep.subr.mxu0 %v3818_v44  ;;  %1467 = vmatprep.subr.mxu1 %v3958_v23  ;;  %v5159_v44 = vld [vmem:[#allocation35_spill] sm:$0xff] }
 0x1a6   : > { %1397 = vmatpush1.msra.mxu0 %v5152_v36  ;;  %1468 = vmatpush1.msra.mxu1 %v3961_v24 }
 0x1a7   : > { %1398 = vmatprep.subr.mxu0 %v5153_v37  ;;  %1469 = vmatprep.subr.mxu1 %v3965_v25  ;;  %v5183_v37 = vld [vmem:[#allocation60_spill] sm:$0xff] }
 0x1a8   : > { %1399 = vmatpush1.msra.mxu0 %v3831_v48  ;;  %1470 = vmatpush1.msra.mxu1 %v3971_v15  ;;  %v5160_v48 = vld [vmem:[#allocation23_spill] sm:$0xff] }
 0x1a9   : > { %1400 = vmatprep.subr.mxu0 %v3836_v49  ;;  %1471 = vmatprep.subr.mxu1 %v3975_v26  ;;  %v5161_v49 = vld [vmem:[#allocation36_spill] sm:$0xff] }
 0x1aa   : > { %1401 = vmatpush1.msra.mxu0 %v3840_v50  ;;  %1472 = vmatpush1.msra.mxu1 %v3978_v29  ;;  %v5162_v50 = vld [vmem:[#allocation24_spill] sm:$0xff] }
 0x1ab   : > { %1402 = vmatprep.subr.mxu0 %v3846_v51  ;;  %1473 = vmatprep.subr.mxu1 %v3982_v30  ;;  %v5163_v51 = vld [vmem:[#allocation37_spill] sm:$0xff] }
 0x1ac   : > { %1403 = vmatpush1.msra.mxu0 %v3850_v53  ;;  %1474 = vmatpush1.msra.mxu1 %v3988_v21 }
 0x1ad   : > { %1404 = vmatprep.subr.mxu0 %v3854_v54  ;;  %1475 = vmatprep.subr.mxu1 %v3992_v31 }
 0x1ae   : > { %1405 = vmatpush1.msra.mxu0 %v3857_v56  ;;  %1476 = vmatpush1.msra.mxu1 %v3995_v32 }
 0x1af   : > { %1406 = vmatprep.subr.mxu0 %v3862_v57  ;;  %1477 = vmatprep.subr.mxu1 %v3999_v33 }
 0x1b0   : > { %1407 = vmatpush1.msra.mxu0 %v3867_v58  ;;  %1478 = vmatpush1.msra.mxu1 %v4005_v27 }
 0x1b1   : > { %1408 = vmatprep.subr.mxu0 %v5154_v38  ;;  %1479 = vmatprep.subr.mxu1 %v5155_v39 }
 0x1b2   : > { %1409 = vmatpush1.msra.mxu0 %v5156_v40  ;;  %1480 = vmatpush1.msra.mxu1 %v5157_v41 }
 0x1b3   : > { %1410 = vmatprep.subr.mxu0 %v5158_v43  ;;  %1481 = vmatprep.subr.mxu1 %v5159_v44 }
 0x1b4   : > { %1411 = vmatpush1.msra.mxu0 %v5160_v48  ;;  %1482 = vmatpush1.msra.mxu1 %v5161_v49 }
 0x1b5   : > { %1412 = vmatprep.subr.mxu0 %v5162_v50  ;;  %1483 = vmatprep.subr.mxu1 %v5163_v51 }
 0x1b6   : > { %1413 = vmatpush1.msra.mxu0 %v5164_v4  ;;  %1484 = vmatpush1.msra.mxu1 %v5165_v0 }
 0x1b7   : > { %1414 = vmatprep.subr.mxu0 %v5166_v63  ;;  %1485 = vmatprep.subr.mxu1 %v5167_v59 }
 0x1b8   : > { %1415 = vmatpush1.msra.mxu0 %v5168_v42  ;;  %1486 = vmatpush1.msra.mxu1 %v5169_v11 }
 0x1b9   : > { %1416 = vmatprep.subr.mxu0 %v5170_v12  ;;  %1487 = vmatprep.subr.mxu1 %v5171_v46 }
 0x1ba   : > { %1417 = vmatpush1.msra.mxu0 %v5172_v22  ;;  %1488 = vmatpush1.msra.mxu1 %v5173_v47 }
 0x1bb   : > { %1418 = vmatprep.subr.mxu0 %v5174_v7  ;;  %1489 = vmatprep.subr.mxu1 %v5175_v61 }
 0x1bc   : > { %1419 = vmatpush1.msra.mxu0 %v5176_v34  ;;  %1452 = vmatprep.mubr.f32.mxu0 %v5177_v55 }
 0x1bd   : > { %1490 = vmatpush1.msra.mxu1 %v5178_v8  ;;  %1523 = vmatprep.mubr.f32.mxu1 %v5177_v55  ;;  %v5184_v8 = vld [vmem:[#allocation59_spill] sm:$0xff] }
 0x1be   : > { %1565 = vmatprep.subr.mxu0 %v5179_v35  ;;  %1636 = vmatprep.subr.mxu1 %v5180_v5 }
 0x25d   : > { %v1277_v60 = vpop.f32.mrf.mxu0  ;;  %v1348_v2 = vpop.f32.mrf.mxu1 }
 0x25e   : > { %v1353_v28 = vadd.f32 %v1277_v60, %v5181_v62  ;;  %v1355_v55 = vadd.f32 %v1348_v2, %v5184_v8  ;;  %v4342_v2 = vld [vmem:[#allocation6 + $0x1a0] sm:$0xff] }
 0x25f   : > { %v1279_v1 = vpop.f32.mrf.mxu0  ;;  %v1350_v36 = vpop.f32.mrf.mxu1 }
 0x260   : > { %v2891_v45 = vmul.f32 -1.442695, %v1353_v28  ;;  %v1354_v10 = vadd.f32 %v1279_v1, %v5182_v6  ;;  %v1356_v16 = vadd.f32 %v1350_v36, %v5183_v37 }
 0x262   : > { %3199 = vpow2.f32 %v2891_v45  ;;  %v2892_v3 = vmul.f32 -1.442695, %v1354_v10  ;;  %v2893_v34 = vmul.f32 -1.442695, %v1356_v16 }
 0x264   : > { %3201 = vpow2.f32 %v2892_v3 }
 0x265   : > { %3203 = vtanh.f32 %v1355_v55 }
 0x266   : > { %3205 = vpow2.f32 %v2893_v34  ;;  %v4330_v34 = vld [vmem:[#allocation6 + $0x1c8] sm:$0xff] }
 0x26f   : > { %v3200_v35 = vpop.eup %3199 }
 0x270   : > { %v1360_v61 = vadd.f32 1.0, %v3200_v35 }
 0x271   : > { %v3202_v5 = vpop.eup %3201 }
 0x272   : > { %3207 = vrcp.f32 %v1360_v61  ;;  %v1366_v60 = vadd.f32 1.0, %v3202_v5  ;;  %v3204_v62 = vpop.eup %3203  ;;  %v4326_v61 = vld [vmem:[#allocation6 + $0x1e0] sm:$0xff]  ;;  %v4338_v5 = vld [vmem:[#allocation6 + $0x1a8] sm:$0xff] }
 0x273   : > { %v3206_v28 = vpop.eup %3205 }
 0x274   : > { %3209 = vrcp.f32 %v1366_v60  ;;  %v1373_v10 = vadd.f32 1.0, %v3206_v28 }
 0x276   : > { %3211 = vrcp.f32 %v1373_v10 }
 0x27f   : > { %v3208_v1 = vpop.eup %3207 }
 0x280   : > { %v1377_v45 = vmul.f32 %v3208_v1, %v3204_v62 }
 0x281   : > { %v3210_v6 = vpop.eup %3209 }
 0x282   : > { %v1376_v3 = vmul.f32 %v3210_v6, %v4247_v52  ;;  %v4334_v52 = vld [vmem:[#allocation6 + $0x1c0] sm:$0xff] }
 0x283   : > { %v3212_v16 = vpop.eup %3211 }
 0x284   : > { %v4323_v36 = vadd.f32 %v1377_v45, %v1376_v3 }
 0x286   : > { %3213 = vtanh.f32 %v4323_v36 }
 0x293   : > { %v3214_v55 = vpop.eup %3213 }
 0x294   : > { %v1380_v8 = vmul.f32 %v3214_v55, %v3212_v16 }
 0x296   : > { %1453 = vmatmul.mubr.f32.vlgmr.msra.gmra.mxu0 %v1380_v8  ;;  %1524 = vmatmul.mubr.f32.vlgmr.msra.gmra.mxu1 %v1380_v8 }
 0x297   : > { %1566 = vmatpush1.msra.mxu0 %v4326_v61  ;;  %1637 = vmatpush1.msra.mxu1 %v3928_v13  ;;  %v4346_v13 = vld [vmem:[#allocation6 + $0x188] sm:$0xff] }
 0x298   : > { %1567 = vmatprep.subr.mxu0 %v4330_v34  ;;  %1638 = vmatprep.subr.mxu1 %v3932_v14  ;;  %v4350_v14 = vld [vmem:[#allocation6 + $0x180] sm:$0xff] }
 0x299   : > { %1568 = vmatpush1.msra.mxu0 %v4334_v52  ;;  %1639 = vmatpush1.msra.mxu1 %v3937_v17  ;;  %v4354_v17 = vld [vmem:[#allocation6 + $0x168] sm:$0xff] }
 0x29a   : > { %1569 = vmatprep.subr.mxu0 %v4338_v5  ;;  %1640 = vmatprep.subr.mxu1 %v3941_v18  ;;  %v4358_v18 = vld [vmem:[#allocation6 + $0x160] sm:$0xff] }
 0x29b   : > { %1570 = vmatpush1.msra.mxu0 %v4342_v2  ;;  %1641 = vmatpush1.msra.mxu1 %v3945_v19  ;;  %v4362_v19 = vld [vmem:[#allocation6 + $0x148] sm:$0xff] }
 0x29c   : > { %1571 = vmatprep.subr.mxu0 %v4346_v13  ;;  %1642 = vmatprep.subr.mxu1 %v3948_v20  ;;  %v4366_v20 = vld [vmem:[#allocation6 + $0x140] sm:$0xff] }
 0x29d   : > { %1572 = vmatpush1.msra.mxu0 %v4350_v14  ;;  %1643 = vmatpush1.msra.mxu1 %v3954_v9  ;;  %v4370_v9 = vld [vmem:[#allocation6 + $0x128] sm:$0xff] }
 0x29e   : > { %1573 = vmatprep.subr.mxu0 %v4354_v17  ;;  %1644 = vmatprep.subr.mxu1 %v3958_v23  ;;  %v4374_v23 = vld [vmem:[#allocation6 + $0x120] sm:$0xff] }
 0x29f   : > { %1574 = vmatpush1.msra.mxu0 %v4358_v18  ;;  %1645 = vmatpush1.msra.mxu1 %v3961_v24  ;;  %v4378_v24 = vld [vmem:[#allocation6 + $0x108] sm:$0xff] }
 0x2a0   : > { %1575 = vmatprep.subr.mxu0 %v4362_v19  ;;  %1646 = vmatprep.subr.mxu1 %v3965_v25  ;;  %v5190_v25 = vld [vmem:[#allocation31_spill] sm:$0xff] }
 0x2a1   : > { %1576 = vmatpush1.msra.mxu0 %v4366_v20  ;;  %1647 = vmatpush1.msra.mxu1 %v3971_v15 }
 0x2a2   : > { %1577 = vmatprep.subr.mxu0 %v4370_v9  ;;  %1648 = vmatprep.subr.mxu1 %v3975_v26  ;;  %v5191_v26 = vld [vmem:[#allocation51_spill] sm:$0xff] }
 0x2a3   : > { %1578 = vmatpush1.msra.mxu0 %v4374_v23  ;;  %1649 = vmatpush1.msra.mxu1 %v3978_v29 }
 0x2a4   : > { %1579 = vmatprep.subr.mxu0 %v4378_v24  ;;  %1650 = vmatprep.subr.mxu1 %v3982_v30 }
 0x2a5   : > { %1580 = vmatpush1.msra.mxu0 %v3850_v53  ;;  %1651 = vmatpush1.msra.mxu1 %v3988_v21  ;;  %v5185_v53 = vld [vmem:[#allocation43_spill] sm:$0xff] }
 0x2a6   : > { %1581 = vmatprep.subr.mxu0 %v3854_v54  ;;  %1652 = vmatprep.subr.mxu1 %v3992_v31  ;;  %v5186_v54 = vld [vmem:[#allocation32_spill] sm:$0xff] }
 0x2a7   : > { %1582 = vmatpush1.msra.mxu0 %v3857_v56  ;;  %1653 = vmatpush1.msra.mxu1 %v3995_v32  ;;  %v5187_v56 = vmov 0.0  }
 0x2a8   : > { %1583 = vmatprep.subr.mxu0 %v3862_v57  ;;  %1654 = vmatprep.subr.mxu1 %v3999_v33  ;;  %v5188_v57 = vld [vmem:[#allocation44_spill] sm:$0xff] }
 0x2a9   : > { %1584 = vmatpush1.msra.mxu0 %v3867_v58  ;;  %1655 = vmatpush1.msra.mxu1 %v4005_v27  ;;  %v4418_v58 = vld [vmem:[#allocation6 + $0x1e8] sm:$0xff] }
 0x2aa   : > { %1585 = vmatprep.subr.mxu0 %v5154_v38  ;;  %1656 = vmatprep.subr.mxu1 %v5155_v39  ;;  %5189 = vst [vmem:[#allocation18_spill] sm:$0xff] %v4418_v58  ;;  %v5192_v38 = vld [vmem:[#allocation53_spill] sm:$0xff] }
 0x2ab   : > { %1586 = vmatpush1.msra.mxu0 %v5156_v40  ;;  %1657 = vmatpush1.msra.mxu1 %v5157_v41 }
 0x2ac   : > { %1587 = vmatprep.subr.mxu0 %v5158_v43  ;;  %1658 = vmatprep.subr.mxu1 %v5159_v44 }
 0x2ad   : > { %1588 = vmatpush1.msra.mxu0 %v5160_v48  ;;  %1659 = vmatpush1.msra.mxu1 %v5161_v49 }
 0x2ae   : > { %1589 = vmatprep.subr.mxu0 %v5162_v50  ;;  %1660 = vmatprep.subr.mxu1 %v5163_v51 }
 0x2af   : > { %1590 = vmatpush1.msra.mxu0 %v5164_v4  ;;  %1661 = vmatpush1.msra.mxu1 %v5165_v0  ;;  %v5193_v4 = vld [vmem:[#allocation62_spill] sm:$0xff] }
 0x2b0   : > { %1591 = vmatprep.subr.mxu0 %v5166_v63  ;;  %1662 = vmatprep.subr.mxu1 %v5167_v59 }
 0x2b1   : > { %1592 = vmatpush1.msra.mxu0 %v5168_v42  ;;  %1663 = vmatpush1.msra.mxu1 %v5169_v11  ;;  %v5194_v42 = vld [vmem:[#allocation61_spill] sm:$0xff] }
 0x2b2   : > { %1593 = vmatprep.subr.mxu0 %v5170_v12  ;;  %1664 = vmatprep.subr.mxu1 %v5171_v46 }
 0x2b3   : > { %1594 = vmatpush1.msra.mxu0 %v5172_v22  ;;  %1665 = vmatpush1.msra.mxu1 %v5173_v47 }
 0x2b4   : > { %1595 = vmatprep.subr.mxu0 %v5174_v7  ;;  %1666 = vmatprep.subr.mxu1 %v5185_v53 }
 0x2b5   : > { %1596 = vmatpush1.msra.mxu0 %v5186_v54  ;;  %1629 = vmatprep.mubr.f32.mxu0 %v5187_v56 }
 0x2b6   : > { %1667 = vmatpush1.msra.mxu1 %v5188_v57  ;;  %1700 = vmatprep.mubr.f32.mxu1 %v5187_v56 }
 0x2b7   : > { %1742 = vmatprep.subr.mxu0 %v4418_v58  ;;  %1813 = vmatprep.subr.mxu1 %v5190_v25  ;;  %v4431_v25 = vld [vmem:[#allocation6 + $0x1f0] sm:$0xff] }
 0x356   : > { %v1454_v15 = vpop.f32.mrf.mxu0  ;;  %v1525_v43 = vpop.f32.mrf.mxu1 }
 0x357   : > { %v1530_v29 = vadd.f32 %v1454_v15, %v5191_v26  ;;  %v1532_v12 = vadd.f32 %v1525_v43, %v5194_v42  ;;  %v4435_v15 = vld [vmem:[#allocation6 + $0x1d8] sm:$0xff]  ;;  %v4486_v42 = vld [vmem:[#allocation6 + $0x100] sm:$0xff] }
 0x358   : > { %v1456_v30 = vpop.f32.mrf.mxu0  ;;  %v1527_v50 = vpop.f32.mrf.mxu1  ;;  %v4443_v26 = vld [vmem:[#allocation6 + $0x1b8] sm:$0xff] }
 0x359   : > { %v2894_v21 = vmul.f32 -1.442695, %v1530_v29  ;;  %v1531_v40 = vadd.f32 %v1456_v30, %v5192_v38  ;;  %v1533_v63 = vadd.f32 %v1527_v50, %v5193_v4  ;;  %v4447_v29 = vld [vmem:[#allocation6 + $0x1b0] sm:$0xff]  ;;  %v4451_v30 = vld [vmem:[#allocation6 + $0x198] sm:$0xff] }
 0x35a   : > { %v4459_v38 = vld [vmem:[#allocation6 + $0x178] sm:$0xff]  ;;  %v4479_v4 = vld [vmem:[#allocation6 + $0x130] sm:$0xff] }
 0x35b   : > { %3215 = vpow2.f32 %v2894_v21  ;;  %v2895_v48 = vmul.f32 -1.442695, %v1531_v40  ;;  %v2896_v22 = vmul.f32 -1.442695, %v1533_v63  ;;  %v4455_v21 = vld [vmem:[#allocation6 + $0x190] sm:$0xff]  ;;  %v4467_v43 = vld [vmem:[#allocation6 + $0x158] sm:$0xff] }
 0x35c   : > { %v4463_v40 = vld [vmem:[#allocation6 + $0x170] sm:$0xff]  ;;  %v4475_v50 = vld [vmem:[#allocation6 + $0x138] sm:$0xff] }
 0x35d   : > { %3217 = vpow2.f32 %v2895_v48  ;;  %v4471_v48 = vld [vmem:[#allocation6 + $0x150] sm:$0xff]  ;;  %v4483_v63 = vld [vmem:[#allocation6 + $0x118] sm:$0xff] }
 0x35e   : > { %3219 = vtanh.f32 %v1532_v12  ;;  %v4489_v12 = vld [vmem:[#allocation6 + $0x110] sm:$0xff] }
 0x35f   : > { %3221 = vpow2.f32 %v2896_v22  ;;  %v4492_v22 = vld [vmem:[#allocation6 + $0xe8] sm:$0xff] }
 0x368   : > { %v3216_v7 = vpop.eup %3215 }
 0x369   : > { %v1537_v37 = vadd.f32 1.0, %v3216_v7  ;;  %v4496_v7 = vld [vmem:[#allocation6 + $0xe0] sm:$0xff] }
 0x36a   : > { %v3218_v35 = vpop.eup %3217 }
 0x36b   : > { %3223 = vrcp.f32 %v1537_v37  ;;  %v1543_v60 = vadd.f32 1.0, %v3218_v35  ;;  %v3220_v62 = vpop.eup %3219  ;;  %v4500_v37 = vld [vmem:[#allocation6 + $0xc8] sm:$0xff]  ;;  %v4504_v35 = vld [vmem:[#allocation6 + $0xc0] sm:$0xff] }
 0x36c   : > { %v3222_v28 = vpop.eup %3221 }
 0x36d   : > { %3225 = vrcp.f32 %v1543_v60  ;;  %v1550_v10 = vadd.f32 1.0, %v3222_v28  ;;  %v4508_v60 = vld [vmem:[#allocation6 + $0xa8] sm:$0xff] }
 0x36f   : > { %3227 = vrcp.f32 %v1550_v10 }
 0x378   : > { %v3224_v1 = vpop.eup %3223 }
 0x379   : > { %v1554_v45 = vmul.f32 %v3224_v1, %v3220_v62  ;;  %v5205_v1 = vld [vmem:[#allocation57_spill] sm:$0xff] }
 0x37a   : > { %v3226_v6 = vpop.eup %3225 }
 0x37b   : > { %v1553_v3 = vmul.f32 %v3226_v6, %v4323_v36  ;;  %v4439_v36 = vld [vmem:[#allocation6 + $0x1d0] sm:$0xff] }
 0x37c   : > { %v3228_v55 = vpop.eup %3227 }
 0x37d   : > { %v4427_v16 = vadd.f32 %v1554_v45, %v1553_v3  ;;  %v5206_v3 = vld [vmem:[#allocation64_spill] sm:$0xff] }
 0x37f   : > { %3229 = vtanh.f32 %v4427_v16 }
 0x38c   : > { %v3230_v8 = vpop.eup %3229 }
 0x38d   : > { %v1557_v54 = vmul.f32 %v3230_v8, %v3228_v55  ;;  %v5207_v8 = vld [vmem:[#allocation63_spill] sm:$0xff] }
 0x38f   : > { %1630 = vmatmul.mubr.f32.vlgmr.msra.gmra.mxu0 %v1557_v54  ;;  %1701 = vmatmul.mubr.f32.vlgmr.msra.gmra.mxu1 %v1557_v54 }
 0x390   : > { %1743 = vmatpush1.msra.mxu0 %v4326_v61  ;;  %1814 = vmatpush1.msra.mxu1 %v4431_v25 }
 0x391   : > { %1744 = vmatprep.subr.mxu0 %v4330_v34  ;;  %1815 = vmatprep.subr.mxu1 %v4435_v15 }
 0x392   : > { %1745 = vmatpush1.msra.mxu0 %v4334_v52  ;;  %1816 = vmatpush1.msra.mxu1 %v4439_v36 }
 0x393   : > { %1746 = vmatprep.subr.mxu0 %v4338_v5  ;;  %1817 = vmatprep.subr.mxu1 %v4443_v26 }
 0x394   : > { %1747 = vmatpush1.msra.mxu0 %v4342_v2  ;;  %1818 = vmatpush1.msra.mxu1 %v4447_v29 }
 0x395   : > { %1748 = vmatprep.subr.mxu0 %v4346_v13  ;;  %1819 = vmatprep.subr.mxu1 %v4451_v30 }
 0x396   : > { %1749 = vmatpush1.msra.mxu0 %v4350_v14  ;;  %1820 = vmatpush1.msra.mxu1 %v4455_v21 }
 0x397   : > { %1750 = vmatprep.subr.mxu0 %v4354_v17  ;;  %1821 = vmatprep.subr.mxu1 %v4459_v38 }
 0x398   : > { %1751 = vmatpush1.msra.mxu0 %v4358_v18  ;;  %1822 = vmatpush1.msra.mxu1 %v4463_v40 }
 0x399   : > { %1752 = vmatprep.subr.mxu0 %v4362_v19  ;;  %1823 = vmatprep.subr.mxu1 %v4467_v43 }
 0x39a   : > { %1753 = vmatpush1.msra.mxu0 %v4366_v20  ;;  %1824 = vmatpush1.msra.mxu1 %v4471_v48 }
 0x39b   : > { %1754 = vmatprep.subr.mxu0 %v4370_v9  ;;  %1825 = vmatprep.subr.mxu1 %v4475_v50 }
 0x39c   : > { %1755 = vmatpush1.msra.mxu0 %v4374_v23  ;;  %1826 = vmatpush1.msra.mxu1 %v4479_v4 }
 0x39d   : > { %1756 = vmatprep.subr.mxu0 %v4378_v24  ;;  %1827 = vmatprep.subr.mxu1 %v4483_v63 }
 0x39e   : > { %1757 = vmatpush1.msra.mxu0 %v4486_v42  ;;  %1828 = vmatpush1.msra.mxu1 %v4489_v12 }
 0x39f   : > { %1758 = vmatprep.subr.mxu0 %v4492_v22  ;;  %1829 = vmatprep.subr.mxu1 %v3992_v31  ;;  %v4512_v31 = vld [vmem:[#allocation6 + $0xa0] sm:$0xff] }
 0x3a0   : > { %1759 = vmatpush1.msra.mxu0 %v4496_v7  ;;  %1830 = vmatpush1.msra.mxu1 %v3995_v32  ;;  %v4516_v32 = vld [vmem:[#allocation6 + $0x88] sm:$0xff] }
 0x3a1   : > { %1760 = vmatprep.subr.mxu0 %v4500_v37  ;;  %1831 = vmatprep.subr.mxu1 %v3999_v33  ;;  %v4520_v33 = vld [vmem:[#allocation6 + $0x80] sm:$0xff] }
 0x3a2   : > { %1761 = vmatpush1.msra.mxu0 %v4504_v35  ;;  %1832 = vmatpush1.msra.mxu1 %v4005_v27  ;;  %v4524_v27 = vld [vmem:[#allocation6 + $0x68] sm:$0xff] }
 0x3a3   : > { %1762 = vmatprep.subr.mxu0 %v4508_v60  ;;  %1833 = vmatprep.subr.mxu1 %v5155_v39  ;;  %5195 = vst [vmem:[#allocation19_spill] sm:$0xff] %v4524_v27  ;;  %v4528_v39 = vld [vmem:[#allocation6 + $0x60] sm:$0xff] }
 0x3a4   : > { %1763 = vmatpush1.msra.mxu0 %v4512_v31  ;;  %1834 = vmatpush1.msra.mxu1 %v5157_v41  ;;  %5196 = vst [vmem:[#allocation20_spill] sm:$0xff] %v4528_v39  ;;  %v4532_v41 = vld [vmem:[#allocation6 + $0x48] sm:$0xff] }
 0x3a5   : > { %1764 = vmatprep.subr.mxu0 %v4516_v32  ;;  %1835 = vmatprep.subr.mxu1 %v5159_v44  ;;  %5197 = vst [vmem:[#allocation33_spill] sm:$0xff] %v4532_v41  ;;  %v4536_v44 = vld [vmem:[#allocation6 + $0x40] sm:$0xff] }
 0x3a6   : > { %1765 = vmatpush1.msra.mxu0 %v4520_v33  ;;  %1836 = vmatpush1.msra.mxu1 %v5161_v49  ;;  %5198 = vst [vmem:[#allocation21_spill] sm:$0xff] %v4536_v44  ;;  %v4540_v49 = vld [vmem:[#allocation6 + $0x28] sm:$0xff] }
 0x3a7   : > { %1766 = vmatprep.subr.mxu0 %v4524_v27  ;;  %1837 = vmatprep.subr.mxu1 %v5163_v51  ;;  %5199 = vst [vmem:[#allocation34_spill] sm:$0xff] %v4540_v49  ;;  %v4544_v51 = vld [vmem:[#allocation6 + $0x20] sm:$0xff] }
 0x3a8   : > { %1767 = vmatpush1.msra.mxu0 %v4528_v39  ;;  %1838 = vmatpush1.msra.mxu1 %v5165_v0  ;;  %5200 = vst [vmem:[#allocation22_spill] sm:$0xff] %v4544_v51  ;;  %v4548_v0 = vld [vmem:[#allocation6 + $0x8] sm:$0xff] }
 0x3a9   : > { %1768 = vmatprep.subr.mxu0 %v4532_v41  ;;  %1839 = vmatprep.subr.mxu1 %v5167_v59  ;;  %5201 = vst [vmem:[#allocation35_spill] sm:$0xff] %v4548_v0  ;;  %v4552_v59 = vld [vmem:[#allocation6] sm:$0xff] }
 0x3aa   : > { %1769 = vmatpush1.msra.mxu0 %v4536_v44  ;;  %1840 = vmatpush1.msra.mxu1 %v5169_v11  ;;  %5202 = vst [vmem:[#allocation23_spill] sm:$0xff] %v4552_v59  ;;  %v4559_v11 = vld [vmem:[#allocation6 + $0x1f8] sm:$0xff] }
 0x3ab   : > { %1770 = vmatprep.subr.mxu0 %v4540_v49  ;;  %1841 = vmatprep.subr.mxu1 %v5171_v46  ;;  %5203 = vst [vmem:[#allocation36_spill] sm:$0xff] %v4559_v11 }
 0x3ac   : > { %1771 = vmatpush1.msra.mxu0 %v4544_v51  ;;  %1842 = vmatpush1.msra.mxu1 %v5173_v47  ;;  %v5204_v47 = vld [vmem:[#allocation55_spill] sm:$0xff] }
 0x3ad   : > { %1772 = vmatprep.subr.mxu0 %v4548_v0  ;;  %1843 = vmatprep.subr.mxu1 %v5185_v53 }
 0x3ae   : > { %1773 = vmatpush1.msra.mxu0 %v4552_v59  ;;  %1806 = vmatprep.mubr.f32.mxu0 %v5187_v56 }
 0x3af   : > { %1844 = vmatpush1.msra.mxu1 %v5188_v57  ;;  %1877 = vmatprep.mubr.f32.mxu1 %v5187_v56 }
 0x3b0   : > { %1919 = vmatprep.subr.mxu0 %v4418_v58  ;;  %1990 = vmatprep.subr.mxu1 %v4559_v11 }
 0x44f   : > { %v1631_v46 = vpop.f32.mrf.mxu0  ;;  %v1702_v6 = vpop.f32.mrf.mxu1 }
 0x450   : > { %v1707_v62 = vadd.f32 %v1631_v46, %v5204_v47  ;;  %v1709_v54 = vadd.f32 %v1702_v6, %v5207_v8  ;;  %v4621_v8 = vld [vmem:[#allocation6 + $0xb0] sm:$0xff] }
 0x451   : > { %v1633_v53 = vpop.f32.mrf.mxu0  ;;  %v1704_v57 = vpop.f32.mrf.mxu1 }
 0x452   : > { %v2897_v28 = vmul.f32 -1.442695, %v1707_v62  ;;  %v1708_v45 = vadd.f32 %v1633_v53, %v5205_v1  ;;  %v1710_v55 = vadd.f32 %v1704_v57, %v5206_v3 }
 0x454   : > { %3231 = vpow2.f32 %v2897_v28  ;;  %v2898_v10 = vmul.f32 -1.442695, %v1708_v45  ;;  %v2899_v58 = vmul.f32 -1.442695, %v1710_v55  ;;  %v4617_v55 = vld [vmem:[#allocation6 + $0xb8] sm:$0xff] }
 0x456   : > { %3233 = vpow2.f32 %v2898_v10 }
 0x457   : > { %3235 = vtanh.f32 %v1709_v54  ;;  %v4625_v54 = vld [vmem:[#allocation6 + $0x98] sm:$0xff] }
 0x458   : > { %3237 = vpow2.f32 %v2899_v58  ;;  %v4601_v58 = vld [vmem:[#allocation6 + $0xf8] sm:$0xff] }
 0x461   : > { %v3232_v56 = vpop.eup %3231 }
 0x462   : > { %v1714_v59 = vadd.f32 1.0, %v3232_v56 }
 0x463   : > { %v3234_v11 = vpop.eup %3233 }
 0x464   : > { %3239 = vrcp.f32 %v1714_v59  ;;  %v1720_v46 = vadd.f32 1.0, %v3234_v11  ;;  %v3236_v47 = vpop.eup %3235  ;;  %v4609_v59 = vld [vmem:[#allocation6 + $0xd8] sm:$0xff]  ;;  %v4613_v11 = vld [vmem:[#allocation6 + $0xd0] sm:$0xff] }
 0x465   : > { %v3238_v62 = vpop.eup %3237 }
 0x466   : > { %3241 = vrcp.f32 %v1720_v46  ;;  %v1727_v45 = vadd.f32 1.0, %v3238_v62  ;;  %v4629_v46 = vld [vmem:[#allocation6 + $0x90] sm:$0xff] }
 0x467   : > { %5208 = vst [vmem:[#allocation24_spill] sm:$0xff] %v4629_v46  ;;  %v4637_v62 = vld [vmem:[#allocation6 + $0x70] sm:$0xff] }
 0x468   : > { %3243 = vrcp.f32 %v1727_v45  ;;  %5210 = vst [vmem:[#allocation25_spill] sm:$0xff] %v4637_v62  ;;  %v4653_v45 = vld [vmem:[#allocation6 + $0x30] sm:$0xff] }
 0x469   : > { %5214 = vst [vmem:[#allocation27_spill] sm:$0xff] %v4653_v45 }
 0x471   : > { %v3240_v53 = vpop.eup %3239 }
 0x472   : > { %v1731_v28 = vmul.f32 %v3240_v53, %v3236_v47  ;;  %v4633_v47 = vld [vmem:[#allocation6 + $0x78] sm:$0xff] }
 0x473   : > { %v3242_v1 = vpop.eup %3241  ;;  %5209 = vst [vmem:[#allocation37_spill] sm:$0xff] %v4633_v47  ;;  %v4641_v53 = vld [vmem:[#allocation6 + $0x58] sm:$0xff] }
 0x474   : > { %v1730_v10 = vmul.f32 %v3242_v1, %v4427_v16  ;;  %v4605_v16 = vld [vmem:[#allocation6 + $0xf0] sm:$0xff]  ;;  %5211 = vst [vmem:[#allocation38_spill] sm:$0xff] %v4641_v53  ;;  %v4649_v1 = vld [vmem:[#allocation6 + $0x38] sm:$0xff] }
 0x475   : > { %v3244_v56 = vpop.eup %3243  ;;  %5213 = vst [vmem:[#allocation39_spill] sm:$0xff] %v4649_v1 }
 0x476   : > { %v4567_v57 = vadd.f32 %v1731_v28, %v1730_v10  ;;  %v4645_v28 = vld [vmem:[#allocation6 + $0x50] sm:$0xff]  ;;  %v4657_v10 = vld [vmem:[#allocation6 + $0x18] sm:$0xff] }
 0x477   : > { %5212 = vst [vmem:[#allocation26_spill] sm:$0xff] %v4645_v28  ;;  %5215 = vst [vmem:[#allocation40_spill] sm:$0xff] %v4657_v10 }
 0x478   : > { %3245 = vtanh.f32 %v4567_v57 }
 0x485   : > { %v3246_v6 = vpop.eup %3245 }
 0x486   : > { %v1734_v3 = vmul.f32 %v3246_v6, %v3244_v56  ;;  %v5216_v56 = vld [vmem:[#allocation23_spill] sm:$0xff]  ;;  %v5217_v6 = vmov 0.0  }
 0x488   : > { %1807 = vmatmul.mubr.f32.vlgmr.msra.gmra.mxu0 %v1734_v3  ;;  %1878 = vmatmul.mubr.f32.vlgmr.msra.gmra.mxu1 %v1734_v3  ;;  %v4662_v3 = vld [vmem:[#allocation6 + $0x10] sm:$0xff] }
 0x489   : > { %1920 = vmatpush1.msra.mxu0 %v4326_v61  ;;  %1991 = vmatpush1.msra.mxu1 %v4431_v25  ;;  %5218 = vst [vmem:[#allocation28_spill] sm:$0xff] %v4662_v3 }
 0x48a   : > { %1921 = vmatprep.subr.mxu0 %v4330_v34  ;;  %1992 = vmatprep.subr.mxu1 %v4435_v15 }
 0x48b   : > { %1922 = vmatpush1.msra.mxu0 %v4334_v52  ;;  %1993 = vmatpush1.msra.mxu1 %v4439_v36 }
 0x48c   : > { %1923 = vmatprep.subr.mxu0 %v4338_v5  ;;  %1994 = vmatprep.subr.mxu1 %v4443_v26 }
 0x48d   : > { %1924 = vmatpush1.msra.mxu0 %v4342_v2  ;;  %1995 = vmatpush1.msra.mxu1 %v4447_v29 }
 0x48e   : > { %1925 = vmatprep.subr.mxu0 %v4346_v13  ;;  %1996 = vmatprep.subr.mxu1 %v4451_v30 }
 0x48f   : > { %1926 = vmatpush1.msra.mxu0 %v4350_v14  ;;  %1997 = vmatpush1.msra.mxu1 %v4455_v21 }
 0x490   : > { %1927 = vmatprep.subr.mxu0 %v4354_v17  ;;  %1998 = vmatprep.subr.mxu1 %v4459_v38 }
 0x491   : > { %1928 = vmatpush1.msra.mxu0 %v4358_v18  ;;  %1999 = vmatpush1.msra.mxu1 %v4463_v40 }
 0x492   : > { %1929 = vmatprep.subr.mxu0 %v4362_v19  ;;  %2000 = vmatprep.subr.mxu1 %v4467_v43 }
 0x493   : > { %1930 = vmatpush1.msra.mxu0 %v4366_v20  ;;  %2001 = vmatpush1.msra.mxu1 %v4471_v48 }
 0x494   : > { %1931 = vmatprep.subr.mxu0 %v4370_v9  ;;  %2002 = vmatprep.subr.mxu1 %v4475_v50 }
 0x495   : > { %1932 = vmatpush1.msra.mxu0 %v4374_v23  ;;  %2003 = vmatpush1.msra.mxu1 %v4479_v4 }
 0x496   : > { %1933 = vmatprep.subr.mxu0 %v4378_v24  ;;  %2004 = vmatprep.subr.mxu1 %v4483_v63 }
 0x497   : > { %1934 = vmatpush1.msra.mxu0 %v4486_v42  ;;  %2005 = vmatpush1.msra.mxu1 %v4489_v12 }
 0x498   : > { %1935 = vmatprep.subr.mxu0 %v4492_v22  ;;  %2006 = vmatprep.subr.mxu1 %v4601_v58 }
 0x499   : > { %1936 = vmatpush1.msra.mxu0 %v4496_v7  ;;  %2007 = vmatpush1.msra.mxu1 %v4605_v16 }
 0x49a   : > { %1937 = vmatprep.subr.mxu0 %v4500_v37  ;;  %2008 = vmatprep.subr.mxu1 %v4609_v59 }
 0x49b   : > { %1938 = vmatpush1.msra.mxu0 %v4504_v35  ;;  %2009 = vmatpush1.msra.mxu1 %v4613_v11 }
 0x49c   : > { %1939 = vmatprep.subr.mxu0 %v4508_v60  ;;  %2010 = vmatprep.subr.mxu1 %v4617_v55 }
 0x49d   : > { %1940 = vmatpush1.msra.mxu0 %v4512_v31  ;;  %2011 = vmatpush1.msra.mxu1 %v4621_v8 }
 0x49e   : > { %1941 = vmatprep.subr.mxu0 %v4516_v32  ;;  %2012 = vmatprep.subr.mxu1 %v4625_v54 }
 0x49f   : > { %1942 = vmatpush1.msra.mxu0 %v4520_v33  ;;  %2013 = vmatpush1.msra.mxu1 %v4629_v46 }
 0x4a0   : > { %1943 = vmatprep.subr.mxu0 %v4524_v27  ;;  %2014 = vmatprep.subr.mxu1 %v4633_v47  ;;  %v5224_v47 = vld [vmem:[#allocation65_spill] sm:$0xff] }
 0x4a1   : > { %1944 = vmatpush1.msra.mxu0 %v4528_v39  ;;  %2015 = vmatpush1.msra.mxu1 %v4637_v62  ;;  %v5223_v39 = vld [vmem:[#allocation66_spill] sm:$0xff] }
 0x4a2   : > { %1945 = vmatprep.subr.mxu0 %v4532_v41  ;;  %2016 = vmatprep.subr.mxu1 %v4641_v53 }
 0x4a3   : > { %1946 = vmatpush1.msra.mxu0 %v4536_v44  ;;  %2017 = vmatpush1.msra.mxu1 %v4645_v28 }
 0x4a4   : > { %1947 = vmatprep.subr.mxu0 %v4540_v49  ;;  %2018 = vmatprep.subr.mxu1 %v4649_v1  ;;  %v5220_v1 = vld [vmem:[#allocation36_spill] sm:$0xff] }
 0x4a5   : > { %1948 = vmatpush1.msra.mxu0 %v4544_v51  ;;  %2019 = vmatpush1.msra.mxu1 %v4653_v45  ;;  %v5219_v51 = vld [vmem:[#allocation18_spill] sm:$0xff] }
 0x4a6   : > { %1949 = vmatprep.subr.mxu0 %v4548_v0  ;;  %2020 = vmatprep.subr.mxu1 %v4657_v10  ;;  %v5221_v0 = vld [vmem:[#allocation45_spill] sm:$0xff]  ;;  %v5222_v10 = vld [vmem:[#allocation46_spill] sm:$0xff] }
 0x4a7   : > { %1950 = vmatpush1.msra.mxu0 %v5216_v56  ;;  %1983 = vmatprep.mubr.f32.mxu0 %v5217_v6 }
 0x4a8   : > { %2021 = vmatpush1.msra.mxu1 %v4662_v3  ;;  %2054 = vmatprep.mubr.f32.mxu1 %v5217_v6 }
 0x4a9   : > { %2096 = vmatprep.subr.mxu0 %v5219_v51  ;;  %2167 = vmatprep.subr.mxu1 %v5220_v1 }
 0x548   : > { %v1808_v45 = vpop.f32.mrf.mxu0  ;;  %v1879_v56 = vpop.f32.mrf.mxu1 }
 0x549   : > { %v1884_v49 = vadd.f32 %v1808_v45, %v5221_v0  ;;  %v1886_v6 = vadd.f32 %v1879_v56, %v5224_v47  ;;  %v5229_v56 = vld [vmem:[#allocation25_spill] sm:$0xff] }
 0x54a   : > { %v1810_v28 = vpop.f32.mrf.mxu0  ;;  %v1881_v62 = vpop.f32.mrf.mxu1 }
 0x54b   : > { %v2900_v44 = vmul.f32 -1.442695, %v1884_v49  ;;  %v1885_v53 = vadd.f32 %v1810_v28, %v5222_v10  ;;  %v1887_v3 = vadd.f32 %v1881_v62, %v5223_v39 }
 0x54d   : > { %3247 = vpow2.f32 %v2900_v44  ;;  %v2901_v41 = vmul.f32 -1.442695, %v1885_v53  ;;  %v2902_v27 = vmul.f32 -1.442695, %v1887_v3  ;;  %v5231_v3 = vld [vmem:[#allocation38_spill] sm:$0xff] }
 0x54f   : > { %3249 = vpow2.f32 %v2901_v41 }
 0x550   : > { %3251 = vtanh.f32 %v1886_v6  ;;  %v5230_v6 = vld [vmem:[#allocation33_spill] sm:$0xff] }
 0x551   : > { %3253 = vpow2.f32 %v2902_v27  ;;  %v5225_v27 = vld [vmem:[#allocation24_spill] sm:$0xff] }
 0x55a   : > { %v3248_v51 = vpop.eup %3247 }
 0x55b   : > { %v1891_v46 = vadd.f32 1.0, %v3248_v51 }
 0x55c   : > { %v3250_v1 = vpop.eup %3249 }
 0x55d   : > { %3255 = vrcp.f32 %v1891_v46  ;;  %v1897_v0 = vadd.f32 1.0, %v3250_v1  ;;  %v3252_v49 = vpop.eup %3251  ;;  %v5227_v46 = vld [vmem:[#allocation37_spill] sm:$0xff]  ;;  %v5228_v1 = vld [vmem:[#allocation20_spill] sm:$0xff] }
 0x55e   : > { %v3254_v28 = vpop.eup %3253 }
 0x55f   : > { %3257 = vrcp.f32 %v1897_v0  ;;  %v1904_v41 = vadd.f32 1.0, %v3254_v28  ;;  %v5232_v0 = vld [vmem:[#allocation21_spill] sm:$0xff]  ;;  %v5234_v28 = vld [vmem:[#allocation34_spill] sm:$0xff] }
 0x561   : > { %3259 = vrcp.f32 %v1904_v41  ;;  %v5238_v41 = vld [vmem:[#allocation35_spill] sm:$0xff] }
 0x56a   : > { %v3256_v44 = vpop.eup %3255 }
 0x56b   : > { %v1908_v45 = vmul.f32 %v3256_v44, %v3252_v49  ;;  %v5233_v49 = vld [vmem:[#allocation26_spill] sm:$0xff]  ;;  %v5235_v44 = vld [vmem:[#allocation39_spill] sm:$0xff] }
 0x56c   : > { %v3258_v53 = vpop.eup %3257 }
 0x56d   : > { %v1907_v10 = vmul.f32 %v3258_v53, %v4567_v57  ;;  %v5226_v57 = vld [vmem:[#allocation19_spill] sm:$0xff] }
 0x56e   : > { %v3260_v51 = vpop.eup %3259  ;;  %v5237_v53 = vld [vmem:[#allocation27_spill] sm:$0xff] }
 0x56f   : > { %v4673_v39 = vadd.f32 %v1908_v45, %v1907_v10  ;;  %v5236_v45 = vld [vmem:[#allocation22_spill] sm:$0xff]  ;;  %v5239_v10 = vld [vmem:[#allocation40_spill] sm:$0xff] }
 0x571   : > { %3261 = vtanh.f32 %v4673_v39 }
 0x57e   : > { %v3262_v47 = vpop.eup %3261 }
 0x57f   : > { %v1911_v62 = vmul.f32 %v3262_v47, %v3260_v51  ;;  %v5240_v51 = vld [vmem:[#allocation23_spill] sm:$0xff]  ;;  %v5241_v47 = vmov 0.0  }
 0x581   : > { %1984 = vmatmul.mubr.f32.vlgmr.msra.gmra.mxu0 %v1911_v62  ;;  %2055 = vmatmul.mubr.f32.vlgmr.msra.gmra.mxu1 %v1911_v62  ;;  %v5242_v62 = vld [vmem:[#allocation28_spill] sm:$0xff] }
 0x582   : > { %2097 = vmatpush1.msra.mxu0 %v4326_v61  ;;  %2168 = vmatpush1.msra.mxu1 %v4431_v25 }
 0x583   : > { %2098 = vmatprep.subr.mxu0 %v4330_v34  ;;  %2169 = vmatprep.subr.mxu1 %v4435_v15 }
 0x584   : > { %2099 = vmatpush1.msra.mxu0 %v4334_v52  ;;  %2170 = vmatpush1.msra.mxu1 %v4439_v36 }
 0x585   : > { %2100 = vmatprep.subr.mxu0 %v4338_v5  ;;  %2171 = vmatprep.subr.mxu1 %v4443_v26 }
 0x586   : > { %2101 = vmatpush1.msra.mxu0 %v4342_v2  ;;  %2172 = vmatpush1.msra.mxu1 %v4447_v29 }
 0x587   : > { %2102 = vmatprep.subr.mxu0 %v4346_v13  ;;  %2173 = vmatprep.subr.mxu1 %v4451_v30 }
 0x588   : > { %2103 = vmatpush1.msra.mxu0 %v4350_v14  ;;  %2174 = vmatpush1.msra.mxu1 %v4455_v21 }
 0x589   : > { %2104 = vmatprep.subr.mxu0 %v4354_v17  ;;  %2175 = vmatprep.subr.mxu1 %v4459_v38 }
 0x58a   : > { %2105 = vmatpush1.msra.mxu0 %v4358_v18  ;;  %2176 = vmatpush1.msra.mxu1 %v4463_v40 }
 0x58b   : > { %2106 = vmatprep.subr.mxu0 %v4362_v19  ;;  %2177 = vmatprep.subr.mxu1 %v4467_v43 }
 0x58c   : > { %2107 = vmatpush1.msra.mxu0 %v4366_v20  ;;  %2178 = vmatpush1.msra.mxu1 %v4471_v48 }
 0x58d   : > { %2108 = vmatprep.subr.mxu0 %v4370_v9  ;;  %2179 = vmatprep.subr.mxu1 %v4475_v50 }
 0x58e   : > { %2109 = vmatpush1.msra.mxu0 %v4374_v23  ;;  %2180 = vmatpush1.msra.mxu1 %v4479_v4 }
 0x58f   : > { %2110 = vmatprep.subr.mxu0 %v4378_v24  ;;  %2181 = vmatprep.subr.mxu1 %v4483_v63 }
 0x590   : > { %2111 = vmatpush1.msra.mxu0 %v4486_v42  ;;  %2182 = vmatpush1.msra.mxu1 %v4489_v12 }
 0x591   : > { %2112 = vmatprep.subr.mxu0 %v4492_v22  ;;  %2183 = vmatprep.subr.mxu1 %v4601_v58 }
 0x592   : > { %2113 = vmatpush1.msra.mxu0 %v4496_v7  ;;  %2184 = vmatpush1.msra.mxu1 %v4605_v16 }
 0x593   : > { %2114 = vmatprep.subr.mxu0 %v4500_v37  ;;  %2185 = vmatprep.subr.mxu1 %v4609_v59 }
 0x594   : > { %2115 = vmatpush1.msra.mxu0 %v4504_v35  ;;  %2186 = vmatpush1.msra.mxu1 %v4613_v11 }
 0x595   : > { %2116 = vmatprep.subr.mxu0 %v4508_v60  ;;  %2187 = vmatprep.subr.mxu1 %v4617_v55 }
 0x596   : > { %2117 = vmatpush1.msra.mxu0 %v4512_v31  ;;  %2188 = vmatpush1.msra.mxu1 %v4621_v8 }
 0x597   : > { %2118 = vmatprep.subr.mxu0 %v4516_v32  ;;  %2189 = vmatprep.subr.mxu1 %v4625_v54 }
 0x598   : > { %2119 = vmatpush1.msra.mxu0 %v4520_v33  ;;  %2190 = vmatpush1.msra.mxu1 %v5225_v27 }
 0x599   : > { %2120 = vmatprep.subr.mxu0 %v5226_v57  ;;  %2191 = vmatprep.subr.mxu1 %v5227_v46  ;;  %v5248_v46 = vld [vmem:[#allocation67_spill] sm:$0xff] }
 0x59a   : > { %2121 = vmatpush1.msra.mxu0 %v5228_v1  ;;  %2192 = vmatpush1.msra.mxu1 %v5229_v56  ;;  %v5247_v1 = vld [vmem:[#allocation68_spill] sm:$0xff] }
 0x59b   : > { %2122 = vmatprep.subr.mxu0 %v5230_v6  ;;  %2193 = vmatprep.subr.mxu1 %v5231_v3 }
 0x59c   : > { %2123 = vmatpush1.msra.mxu0 %v5232_v0  ;;  %2194 = vmatpush1.msra.mxu1 %v5233_v49  ;;  %v5243_v49 = vld [vmem:[#allocation18_spill] sm:$0xff] }
 0x59d   : > { %2124 = vmatprep.subr.mxu0 %v5234_v28  ;;  %2195 = vmatprep.subr.mxu1 %v5235_v44  ;;  %v5244_v28 = vld [vmem:[#allocation36_spill] sm:$0xff] }
 0x59e   : > { %2125 = vmatpush1.msra.mxu0 %v5236_v45  ;;  %2196 = vmatpush1.msra.mxu1 %v5237_v53  ;;  %v5245_v45 = vld [vmem:[#allocation48_spill] sm:$0xff] }
 0x59f   : > { %2126 = vmatprep.subr.mxu0 %v5238_v41  ;;  %2197 = vmatprep.subr.mxu1 %v5239_v10  ;;  %v5246_v41 = vld [vmem:[#allocation50_spill] sm:$0xff] }
 0x5a0   : > { %2127 = vmatpush1.msra.mxu0 %v5240_v51  ;;  %2160 = vmatprep.mubr.f32.mxu0 %v5241_v47 }
 0x5a1   : > { %2198 = vmatpush1.msra.mxu1 %v5242_v62  ;;  %2231 = vmatprep.mubr.f32.mxu1 %v5241_v47 }
 0x5a2   : > { %2273 = vmatprep.subr.mxu0 %v5243_v49  ;;  %2344 = vmatprep.subr.mxu1 %v5244_v28 }
 0x641   : > { %v1985_v44 = vpop.f32.mrf.mxu0  ;;  %v2056_v10 = vpop.f32.mrf.mxu1 }
 0x642   : > { %v2061_v0 = vadd.f32 %v1985_v44, %v5245_v45  ;;  %v2063_v47 = vadd.f32 %v2056_v10, %v5248_v46 }
 0x643   : > { %v1987_v53 = vpop.f32.mrf.mxu0  ;;  %v2058_v56 = vpop.f32.mrf.mxu1 }
 0x644   : > { %v2903_v3 = vmul.f32 -1.442695, %v2061_v0  ;;  %v2062_v6 = vadd.f32 %v1987_v53, %v5246_v41  ;;  %v2064_v62 = vadd.f32 %v2058_v56, %v5247_v1 }
 0x646   : > { %3263 = vpow2.f32 %v2903_v3  ;;  %v2904_v51 = vmul.f32 -1.442695, %v2062_v6  ;;  %v2905_v57 = vmul.f32 -1.442695, %v2064_v62  ;;  %v2473_v62 = vld [vmem:[#allocation8 + $0x70] sm:$0xff] }
 0x648   : > { %3265 = vpow2.f32 %v2904_v51 }
 0x649   : > { %3267 = vtanh.f32 %v2063_v47  ;;  %v2474_v47 = vld [vmem:[#allocation8 + $0x78] sm:$0xff] }
 0x64a   : > { %3269 = vpow2.f32 %v2905_v57 }
 0x653   : > { %v3264_v49 = vpop.eup %3263 }
 0x654   : > { %v2068_v27 = vadd.f32 1.0, %v3264_v49  ;;  %v2472_v49 = vld [vmem:[#allocation8 + $0x68] sm:$0xff] }
 0x655   : > { %v3266_v28 = vpop.eup %3265 }
 0x656   : > { %3271 = vrcp.f32 %v2068_v27  ;;  %v2074_v44 = vadd.f32 1.0, %v3266_v28  ;;  %v3268_v0 = vpop.eup %3267  ;;  %v2471_v28 = vld [vmem:[#allocation8 + $0x60] sm:$0xff] }
 0x657   : > { %v3270_v45 = vpop.eup %3269 }
 0x658   : > { %3273 = vrcp.f32 %v2074_v44  ;;  %v2081_v41 = vadd.f32 1.0, %v3270_v45  ;;  %v2470_v44 = vld [vmem:[#allocation8 + $0x58] sm:$0xff]  ;;  %v2468_v45 = vld [vmem:[#allocation8 + $0x48] sm:$0xff] }
 0x65a   : > { %3275 = vrcp.f32 %v2081_v41  ;;  %v2464_v41 = vld [vmem:[#allocation8 + $0x28] sm:$0xff] }
 0x663   : > { %v3272_v3 = vpop.eup %3271 }
 0x664   : > { %v2085_v53 = vmul.f32 %v3272_v3, %v3268_v0  ;;  %v2469_v0 = vld [vmem:[#allocation8 + $0x50] sm:$0xff]  ;;  %v2467_v3 = vld [vmem:[#allocation8 + $0x40] sm:$0xff] }
 0x665   : > { %v3274_v6 = vpop.eup %3273 }
 0x666   : > { %v2084_v51 = vmul.f32 %v3274_v6, %v4673_v39  ;;  %v2465_v6 = vld [vmem:[#allocation8 + $0x30] sm:$0xff] }
 0x667   : > { %v3276_v46 = vpop.eup %3275 }
 0x668   : > { %v4747_v1 = vadd.f32 %v2085_v53, %v2084_v51  ;;  %v2466_v53 = vld [vmem:[#allocation8 + $0x38] sm:$0xff]  ;;  %v2463_v51 = vld [vmem:[#allocation8 + $0x20] sm:$0xff] }
 0x66a   : > { %3277 = vtanh.f32 %v4747_v1 }
 0x677   : > { %v3278_v56 = vpop.eup %3277 }
 0x678   : > { %v2088_v10 = vmul.f32 %v3278_v56, %v3276_v46  ;;  %v2461_v46 = vld [vmem:[#allocation8 + $0x10] sm:$0xff]  ;;  %v2460_v56 = vld [vmem:[#allocation8 + $0x8] sm:$0xff] }
 0x67a   : > { %2161 = vmatmul.mubr.f32.vlgmr.msra.gmra.mxu0 %v2088_v10  ;;  %2232 = vmatmul.mubr.f32.vlgmr.msra.gmra.mxu1 %v2088_v10  ;;  %v2459_v10 = vld [vmem:[#allocation8] sm:$0xff] }
 0x67b   : > { %2274 = vmatpush1.msra.mxu0 %v4326_v61  ;;  %2345 = vmatpush1.msra.mxu1 %v4431_v25  ;;  %v5249_v61 = vld [vmem:[#allocation24_spill] sm:$0xff] }
 0x67c   : > { %2275 = vmatprep.subr.mxu0 %v4330_v34  ;;  %2346 = vmatprep.subr.mxu1 %v4435_v15  ;;  %v5250_v34 = vld [vmem:[#allocation19_spill] sm:$0xff]  ;;  %v5263_v25 = vld [vmem:[#allocation40_spill] sm:$0xff] }
 0x67d   : > { %2276 = vmatpush1.msra.mxu0 %v4334_v52  ;;  %2347 = vmatpush1.msra.mxu1 %v4439_v36  ;;  %v5251_v52 = vld [vmem:[#allocation37_spill] sm:$0xff]  ;;  %v5264_v15 = vld [vmem:[#allocation23_spill] sm:$0xff]  ;;  %v5265_v36 = vmov 0.0  }
 0x67e   : > { %2277 = vmatprep.subr.mxu0 %v4338_v5  ;;  %2348 = vmatprep.subr.mxu1 %v4443_v26  ;;  %v5252_v5 = vld [vmem:[#allocation20_spill] sm:$0xff] }
 0x67f   : > { %2278 = vmatpush1.msra.mxu0 %v4342_v2  ;;  %2349 = vmatpush1.msra.mxu1 %v4447_v29  ;;  %v5253_v2 = vld [vmem:[#allocation25_spill] sm:$0xff]  ;;  %v5266_v26 = vld [vmem:[#allocation28_spill] sm:$0xff] }
 0x680   : > { %2279 = vmatprep.subr.mxu0 %v4346_v13  ;;  %2350 = vmatprep.subr.mxu1 %v4451_v30  ;;  %v5254_v13 = vld [vmem:[#allocation33_spill] sm:$0xff]  ;;  %v5267_v30 = vld [vmem:[#allocation52_spill] sm:$0xff] }
 0x681   : > { %2280 = vmatpush1.msra.mxu0 %v4350_v14  ;;  %2351 = vmatpush1.msra.mxu1 %v4455_v21  ;;  %v5255_v14 = vld [vmem:[#allocation38_spill] sm:$0xff] }
 0x682   : > { %2281 = vmatprep.subr.mxu0 %v4354_v17  ;;  %2352 = vmatprep.subr.mxu1 %v4459_v38  ;;  %v5256_v17 = vld [vmem:[#allocation21_spill] sm:$0xff] }
 0x683   : > { %2282 = vmatpush1.msra.mxu0 %v4358_v18  ;;  %2353 = vmatpush1.msra.mxu1 %v4463_v40  ;;  %v5257_v18 = vld [vmem:[#allocation26_spill] sm:$0xff] }
 0x684   : > { %2283 = vmatprep.subr.mxu0 %v4362_v19  ;;  %2354 = vmatprep.subr.mxu1 %v4467_v43  ;;  %v5258_v19 = vld [vmem:[#allocation34_spill] sm:$0xff] }
 0x685   : > { %2284 = vmatpush1.msra.mxu0 %v4366_v20  ;;  %2355 = vmatpush1.msra.mxu1 %v4471_v48  ;;  %v5259_v20 = vld [vmem:[#allocation39_spill] sm:$0xff]  ;;  %v5268_v43 = vld [vmem:[#allocation54_spill] sm:$0xff] }
 0x686   : > { %2285 = vmatprep.subr.mxu0 %v4370_v9  ;;  %2356 = vmatprep.subr.mxu1 %v4475_v50  ;;  %v5260_v9 = vld [vmem:[#allocation22_spill] sm:$0xff] }
 0x687   : > { %2286 = vmatpush1.msra.mxu0 %v4374_v23  ;;  %2357 = vmatpush1.msra.mxu1 %v4479_v4  ;;  %v5261_v23 = vld [vmem:[#allocation27_spill] sm:$0xff] }
 0x688   : > { %2287 = vmatprep.subr.mxu0 %v4378_v24  ;;  %2358 = vmatprep.subr.mxu1 %v4483_v63  ;;  %v5262_v24 = vld [vmem:[#allocation35_spill] sm:$0xff] }
 0x689   : > { %2288 = vmatpush1.msra.mxu0 %v4486_v42  ;;  %2359 = vmatpush1.msra.mxu1 %v4489_v12  ;;  %v5269_v42 = vld [vmem:[#allocation70_spill] sm:$0xff] }
 0x68a   : > { %2289 = vmatprep.subr.mxu0 %v4492_v22  ;;  %2360 = vmatprep.subr.mxu1 %v4601_v58  ;;  %v5270_v22 = vld [vmem:[#allocation69_spill] sm:$0xff] }
 0x68b   : > { %2290 = vmatpush1.msra.mxu0 %v4496_v7  ;;  %2361 = vmatpush1.msra.mxu1 %v4605_v16 }
 0x68c   : > { %2291 = vmatprep.subr.mxu0 %v4500_v37  ;;  %2362 = vmatprep.subr.mxu1 %v4609_v59 }
 0x68d   : > { %2292 = vmatpush1.msra.mxu0 %v4504_v35  ;;  %2363 = vmatpush1.msra.mxu1 %v4613_v11 }
 0x68e   : > { %2293 = vmatprep.subr.mxu0 %v4508_v60  ;;  %2364 = vmatprep.subr.mxu1 %v4617_v55 }
 0x68f   : > { %2294 = vmatpush1.msra.mxu0 %v4512_v31  ;;  %2365 = vmatpush1.msra.mxu1 %v4621_v8 }
 0x690   : > { %2295 = vmatprep.subr.mxu0 %v4516_v32  ;;  %2366 = vmatprep.subr.mxu1 %v4625_v54 }
 0x691   : > { %2296 = vmatpush1.msra.mxu0 %v4520_v33  ;;  %2367 = vmatpush1.msra.mxu1 %v5249_v61  ;;  %v5271_v61 = vld [vmem:[#allocation73_spill] sm:$0xff] }
 0x692   : > { %2297 = vmatprep.subr.mxu0 %v5250_v34  ;;  %2368 = vmatprep.subr.mxu1 %v5251_v52  ;;  %v2458_v34 = vld [vmem:[%s4980_s4 + $0x78] sm:$0xff]  ;;  %v2457_v52 = vld [vmem:[%s4980_s4 + $0x70] sm:$0xff] }
 0x693   : > { %2298 = vmatpush1.msra.mxu0 %v5252_v5  ;;  %2369 = vmatpush1.msra.mxu1 %v5253_v2  ;;  %v2456_v5 = vld [vmem:[%s4980_s4 + $0x68] sm:$0xff]  ;;  %v2455_v2 = vld [vmem:[%s4980_s4 + $0x60] sm:$0xff] }
 0x694   : > { %2299 = vmatprep.subr.mxu0 %v5254_v13  ;;  %2370 = vmatprep.subr.mxu1 %v5255_v14  ;;  %v2454_v13 = vld [vmem:[%s4980_s4 + $0x58] sm:$0xff]  ;;  %v2453_v14 = vld [vmem:[%s4980_s4 + $0x50] sm:$0xff] }
 0x695   : > { %2300 = vmatpush1.msra.mxu0 %v5256_v17  ;;  %2371 = vmatpush1.msra.mxu1 %v5257_v18  ;;  %v2452_v17 = vld [vmem:[%s4980_s4 + $0x48] sm:$0xff]  ;;  %v2451_v18 = vld [vmem:[%s4980_s4 + $0x40] sm:$0xff] }
 0x696   : > { %2301 = vmatprep.subr.mxu0 %v5258_v19  ;;  %2372 = vmatprep.subr.mxu1 %v5259_v20  ;;  %v2450_v19 = vld [vmem:[%s4980_s4 + $0x38] sm:$0xff]  ;;  %v2449_v20 = vld [vmem:[%s4980_s4 + $0x30] sm:$0xff] }
 0x697   : > { %2302 = vmatpush1.msra.mxu0 %v5260_v9  ;;  %2373 = vmatpush1.msra.mxu1 %v5261_v23  ;;  %v2448_v9 = vld [vmem:[%s4980_s4 + $0x28] sm:$0xff]  ;;  %v2447_v23 = vld [vmem:[%s4980_s4 + $0x20] sm:$0xff] }
 0x698   : > { %2303 = vmatprep.subr.mxu0 %v5262_v24  ;;  %2374 = vmatprep.subr.mxu1 %v5263_v25  ;;  %v2446_v24 = vld [vmem:[%s4980_s4 + $0x18] sm:$0xff]  ;;  %v2445_v25 = vld [vmem:[%s4980_s4 + $0x10] sm:$0xff] }
 0x699   : > { %2304 = vmatpush1.msra.mxu0 %v5264_v15  ;;  %2337 = vmatprep.mubr.f32.mxu0 %v5265_v36  ;;  %v2444_v15 = vld [vmem:[%s4980_s4 + $0x8] sm:$0xff] }
 0x69a   : > { %2375 = vmatpush1.msra.mxu1 %v5266_v26  ;;  %2408 = vmatprep.mubr.f32.mxu1 %v5265_v36  ;;  %v2443_v26 = vld [vmem:[%s4980_s4] sm:$0xff] }
 0x69b   : > { %2970 = vmatprep.subr.mxu0 %v5265_v36  ;;  %3005 = vmatprep.subr.mxu1 %v5265_v36 }
 0x73a   : > { %v2162_v29 = vpop.f32.mrf.mxu0  ;;  %v2233_v50 = vpop.f32.mrf.mxu1 }
 0x73b   : > { %v2238_v21 = vadd.f32 %v2162_v29, %v5267_v30  ;;  %v2240_v7 = vadd.f32 %v2233_v50, %v5270_v22  ;;  %v2639_v29 = vld [vmem:[#allocation9 + $0x78] sm:$0xff]  ;;  %v2638_v30 = vld [vmem:[#allocation9 + $0x70] sm:$0xff]  ;;  %v5272_v50 = vld [vmem:[#allocation56_spill] sm:$0xff] }
 0x73c   : > { %v2164_v38 = vpop.f32.mrf.mxu0  ;;  %v2235_v63 = vpop.f32.mrf.mxu1 }
 0x73d   : > { %v2906_v40 = vmul.f32 -1.442695, %v2238_v21  ;;  %v2239_v48 = vadd.f32 %v2164_v38, %v5268_v43  ;;  %v2241_v12 = vadd.f32 %v2235_v63, %v5269_v42  ;;  %v2637_v21 = vld [vmem:[#allocation9 + $0x68] sm:$0xff]  ;;  %v2636_v38 = vld [vmem:[#allocation9 + $0x60] sm:$0xff]  ;;  %v2634_v43 = vld [vmem:[#allocation9 + $0x50] sm:$0xff] }
 0x73f   : > { %3279 = vpow2.f32 %v2906_v40  ;;  %v2907_v4 = vmul.f32 -1.442695, %v2239_v48  ;;  %v2908_v37 = vmul.f32 -1.442695, %v2241_v12  ;;  %v2635_v40 = vld [vmem:[#allocation9 + $0x58] sm:$0xff] }
 0x740   : > { %v5273_v12 = vld [vmem:[#allocation58_spill] sm:$0xff] }
 0x741   : > { %3281 = vpow2.f32 %v2907_v4 }
 0x742   : > { %3283 = vtanh.f32 %v2240_v7 }
 0x743   : > { %3285 = vpow2.f32 %v2908_v37 }
 0x74c   : > { %v3280_v35 = vpop.eup %3279 }
 0x74d   : > { %v2245_v60 = vadd.f32 1.0, %v3280_v35 }
 0x74e   : > { %v3282_v31 = vpop.eup %3281 }
 0x74f   : > { %3287 = vrcp.f32 %v2245_v60  ;;  %v2251_v32 = vadd.f32 1.0, %v3282_v31  ;;  %v3284_v33 = vpop.eup %3283  ;;  %v5274_v60 = vld [vmem:[#allocation72_spill] sm:$0xff] }
 0x750   : > { %v3286_v58 = vpop.eup %3285 }
 0x751   : > { %3289 = vrcp.f32 %v2251_v32  ;;  %v2258_v55 = vadd.f32 1.0, %v3286_v58  ;;  %v5275_v32 = vld [vmem:[#allocation71_spill] sm:$0xff] }
 0x753   : > { %3291 = vrcp.f32 %v2258_v55 }
 0x75c   : > { %v3288_v16 = vpop.eup %3287 }
 0x75d   : > { %v2262_v59 = vmul.f32 %v3288_v16, %v3284_v33 }
 0x75e   : > { %v3290_v11 = vpop.eup %3289 }
 0x75f   : > { %v2261_v8 = vmul.f32 %v3290_v11, %v4747_v1  ;;  %v2462_v1 = vld [vmem:[#allocation8 + $0x18] sm:$0xff] }
 0x760   : > { %v3292_v39 = vpop.eup %3291 }
 0x761   : > { %v4821_v54 = vadd.f32 %v2262_v59, %v2261_v8 }
 0x763   : > { %3293 = vtanh.f32 %v4821_v54 }
 0x770   : > { %v3294_v27 = vpop.eup %3293 }
 0x771   : > { %v2265_v57 = vmul.f32 %v3294_v27, %v3292_v39 }
 0x773   : > { %2338 = vmatmul.mubr.f32.vlgmr.msra.gmra.mxu0 %v2265_v57  ;;  %2409 = vmatmul.mubr.f32.vlgmr.msra.gmra.mxu1 %v2265_v57 }
 0x774   : > { %2971 = vmatpush3.msra.mxu0 %v2474_v47  ;;  %3002 = vmatprep.mubr.msk.f32.mxu0 %vm3566_vm1, %v5265_v36 }
 0x775   : > { %2972 = vmatprep.subr.mxu0 %v5265_v36  ;;  %3037 = vmatprep.mubr.msk.f32.mxu1 %vm3566_vm1, %v5265_v36 }
 0x776   : > { %2973 = vmatpush3.msra.mxu0 %v2473_v62  ;;  %3006 = vmatpush3.msra.mxu1 %v2458_v34  ;;  %v2624_v34 = vld [vmem:[#allocation9] sm:$0xff] }
 0x777   : > { %2974 = vmatprep.subr.mxu0 %v5265_v36  ;;  %3007 = vmatprep.subr.mxu1 %v5265_v36 }
 0x778   : > { %2975 = vmatpush3.msra.mxu0 %v2472_v49  ;;  %3008 = vmatpush3.msra.mxu1 %v2457_v52 }
 0x779   : > { %2976 = vmatprep.subr.mxu0 %v5265_v36  ;;  %3009 = vmatprep.subr.mxu1 %v5265_v36 }
 0x77a   : > { %2977 = vmatpush3.msra.mxu0 %v2471_v28  ;;  %3010 = vmatpush3.msra.mxu1 %v2456_v5  ;;  %v2912_v5 = vld [vmem:[%s4982_s6] ss:$0 sm:$0xff] }
 0x77b   : > { %2978 = vmatprep.subr.mxu0 %v5265_v36  ;;  %3011 = vmatprep.subr.mxu1 %v5265_v36 }
 0x77c   : > { %2979 = vmatpush3.msra.mxu0 %v2470_v44  ;;  %3012 = vmatpush3.msra.mxu1 %v2455_v2 }
 0x77d   : > { %2980 = vmatprep.subr.mxu0 %v5265_v36  ;;  %3013 = vmatprep.subr.mxu1 %v5265_v36 }
 0x77e   : > { %2981 = vmatpush3.msra.mxu0 %v2469_v0  ;;  %3014 = vmatpush3.msra.mxu1 %v2454_v13 }
 0x77f   : > { %2982 = vmatprep.subr.mxu0 %v5265_v36  ;;  %3015 = vmatprep.subr.mxu1 %v5265_v36 }
 0x780   : > { %2983 = vmatpush3.msra.mxu0 %v2468_v45  ;;  %3016 = vmatpush3.msra.mxu1 %v2453_v14 }
 0x781   : > { %2984 = vmatprep.subr.mxu0 %v5265_v36  ;;  %3017 = vmatprep.subr.mxu1 %v5265_v36 }
 0x782   : > { %2985 = vmatpush3.msra.mxu0 %v2467_v3  ;;  %3018 = vmatpush3.msra.mxu1 %v2452_v17 }
 0x783   : > { %2986 = vmatprep.subr.mxu0 %v5265_v36  ;;  %3019 = vmatprep.subr.mxu1 %v5265_v36 }
 0x784   : > { %2987 = vmatpush3.msra.mxu0 %v2466_v53  ;;  %3020 = vmatpush3.msra.mxu1 %v2451_v18  ;;  %v2913_v18 = vld [vmem:[%s4984_s8] ss:$0 sm:$0xff] }
 0x785   : > { %2988 = vmatprep.subr.mxu0 %v5265_v36  ;;  %3021 = vmatprep.subr.mxu1 %v5265_v36 }
 0x786   : > { %2989 = vmatpush3.msra.mxu0 %v2465_v6  ;;  %3022 = vmatpush3.msra.mxu1 %v2450_v19  ;;  %v2633_v6 = vld [vmem:[#allocation9 + $0x48] sm:$0xff] }
 0x787   : > { %2990 = vmatprep.subr.mxu0 %v5265_v36  ;;  %3023 = vmatprep.subr.mxu1 %v5265_v36 }
 0x788   : > { %2991 = vmatpush3.msra.mxu0 %v2464_v41  ;;  %3024 = vmatpush3.msra.mxu1 %v2449_v20  ;;  %v2632_v41 = vld [vmem:[#allocation9 + $0x40] sm:$0xff] }
 0x789   : > { %2992 = vmatprep.subr.mxu0 %v5265_v36  ;;  %3025 = vmatprep.subr.mxu1 %v5265_v36 }
 0x78a   : > { %2993 = vmatpush3.msra.mxu0 %v2463_v51  ;;  %3026 = vmatpush3.msra.mxu1 %v2448_v9  ;;  %v2631_v51 = vld [vmem:[#allocation9 + $0x38] sm:$0xff] }
 0x78b   : > { %2994 = vmatprep.subr.mxu0 %v5265_v36  ;;  %3027 = vmatprep.subr.mxu1 %v5265_v36 }
 0x78c   : > { %2995 = vmatpush3.msra.mxu0 %v2462_v1  ;;  %3028 = vmatpush3.msra.mxu1 %v2447_v23  ;;  %v2630_v1 = vld [vmem:[#allocation9 + $0x30] sm:$0xff] }
 0x78d   : > { %2996 = vmatprep.subr.mxu0 %v5265_v36  ;;  %3029 = vmatprep.subr.mxu1 %v5265_v36 }
 0x78e   : > { %2997 = vmatpush3.msra.mxu0 %v2461_v46  ;;  %3030 = vmatpush3.msra.mxu1 %v2446_v24  ;;  %v2628_v46 = vld [vmem:[#allocation9 + $0x20] sm:$0xff] }
 0x78f   : > { %2998 = vmatprep.subr.mxu0 %v5265_v36  ;;  %3031 = vmatprep.subr.mxu1 %v5265_v36 }
 0x790   : > { %2999 = vmatpush3.msra.mxu0 %v2460_v56  ;;  %3032 = vmatpush3.msra.mxu1 %v2445_v25  ;;  %v2627_v56 = vld [vmem:[#allocation9 + $0x18] sm:$0xff] }
 0x791   : > { %3000 = vmatprep.subr.mxu0 %v5265_v36  ;;  %3033 = vmatprep.subr.mxu1 %v5265_v36 }
 0x792   : > { %3001 = vmatpush3.msra.mxu0 %v2459_v10  ;;  %3034 = vmatpush3.msra.mxu1 %v2444_v15  ;;  %v2626_v10 = vld [vmem:[#allocation9 + $0x10] sm:$0xff] }
 0x793   : > { %3003 = vmatmul.mubr.f32.vlgmr.msra.gmra.mxu0 %v5271_v61  ;;  %3040 = vmatprep.subr.mxu0 %v5265_v36  ;;  %v2625_v61 = vld [vmem:[#allocation9 + $0x8] sm:$0xff] }
 0x794   : > { %3072 = vmatprep.mubr.msk.f32.mxu0 %vm3566_vm1, %v5265_v36  ;;  %3035 = vmatprep.subr.mxu1 %v5265_v36 }
 0x795   : > { %3036 = vmatpush3.msra.mxu1 %v2443_v26  ;;  %3041 = vmatpush3.msra.mxu0 %v2639_v29 }
 0x796   : > { %3042 = vmatprep.subr.mxu0 %v5265_v36 }
 0x797   : > { %3043 = vmatpush3.msra.mxu0 %v2638_v30 }
 0x798   : > { %3044 = vmatprep.subr.mxu0 %v5265_v36 }
 0x799   : > { %3045 = vmatpush3.msra.mxu0 %v2637_v21 }
 0x79a   : > { %3046 = vmatprep.subr.mxu0 %v5265_v36 }
 0x79b   : > { %3047 = vmatpush3.msra.mxu0 %v2636_v38 }
 0x79c   : > { %3048 = vmatprep.subr.mxu0 %v5265_v36 }
 0x79d   : > { %3049 = vmatpush3.msra.mxu0 %v2635_v40 }
 0x79e   : > { %3050 = vmatprep.subr.mxu0 %v5265_v36 }
 0x79f   : > { %3051 = vmatpush3.msra.mxu0 %v2634_v43 }
 0x7a0   : > { %3052 = vmatprep.subr.mxu0 %v5265_v36 }
 0x7a1   : > { %3053 = vmatpush3.msra.mxu0 %v2633_v6 }
 0x7a2   : > { %3054 = vmatprep.subr.mxu0 %v5265_v36 }
 0x7a3   : > { %3055 = vmatpush3.msra.mxu0 %v2632_v41 }
 0x7a4   : > { %3056 = vmatprep.subr.mxu0 %v5265_v36 }
 0x7a5   : > { %3057 = vmatpush3.msra.mxu0 %v2631_v51 }
 0x7a6   : > { %3058 = vmatprep.subr.mxu0 %v5265_v36 }
 0x7a7   : > { %3059 = vmatpush3.msra.mxu0 %v2630_v1 }
 0x7a8   : > { %3060 = vmatprep.subr.mxu0 %v5265_v36 }
 0x833   : > { %v2339_v48 = vpop.f32.mrf.mxu0  ;;  %v2410_v7 = vpop.f32.mrf.mxu1 }
 0x834   : > { %v2415_v4 = vadd.f32 %v2339_v48, %v5272_v50  ;;  %v2417_v33 = vadd.f32 %v2410_v7, %v5275_v32 }
 0x835   : > { %v2341_v63 = vpop.f32.mrf.mxu0  ;;  %v2412_v35 = vpop.f32.mrf.mxu1 }
 0x836   : > { %v2909_v42 = vmul.f32 -1.442695, %v2415_v4  ;;  %v2416_v22 = vadd.f32 %v2341_v63, %v5273_v12  ;;  %v2418_v31 = vadd.f32 %v2412_v35, %v5274_v60 }
 0x838   : > { %3295 = vpow2.f32 %v2909_v42  ;;  %v2910_v37 = vmul.f32 -1.442695, %v2416_v22  ;;  %v2911_v58 = vmul.f32 -1.442695, %v2418_v31 }
 0x83a   : > { %3297 = vpow2.f32 %v2910_v37 }
 0x83b   : > { %3299 = vtanh.f32 %v2417_v33 }
 0x83c   : > { %3301 = vpow2.f32 %v2911_v58 }
 0x845   : > { %v3296_v16 = vpop.eup %3295 }
 0x846   : > { %v2422_v59 = vadd.f32 1.0, %v3296_v16 }
 0x847   : > { %v3298_v11 = vpop.eup %3297 }
 0x848   : > { %3303 = vrcp.f32 %v2422_v59  ;;  %v2428_v55 = vadd.f32 1.0, %v3298_v11  ;;  %v3300_v8 = vpop.eup %3299 }
 0x849   : > { %v3302_v27 = vpop.eup %3301 }
 0x84a   : > { %3305 = vrcp.f32 %v2428_v55  ;;  %v2435_v28 = vadd.f32 1.0, %v3302_v27 }
 0x84c   : > { %3307 = vrcp.f32 %v2435_v28 }
 0x853   : > { %v2541_v39 = vpop.f32.mrf.mxu0 }
 0x855   : > { %v3304_v57 = vpop.eup %3303  ;;  %v3004_v47 = vpop.f32.mrf.mxu0 }
 0x856   : > { %v2439_v62 = vmul.f32 %v3304_v57, %v3300_v8 }
 0x857   : > { %v3306_v49 = vpop.eup %3305 }
 0x858   : > { %v2438_v44 = vmul.f32 %v3306_v49, %v4821_v54  ;;  %v2629_v54 = vld [vmem:[#allocation9 + $0x28] sm:$0xff] }
 0x859   : > { %v3308_v45 = vpop.eup %3307  ;;  %3061 = vmatpush3.msra.mxu0 %v2629_v54 }
 0x85a   : > { %v2440_v0 = vadd.f32 %v2439_v62, %v2438_v44  ;;  %3062 = vmatprep.subr.mxu0 %v5265_v36 }
 0x85b   : > { %3063 = vmatpush3.msra.mxu0 %v2628_v46 }
 0x85c   : > { %3309 = vtanh.f32 %v2440_v0  ;;  %3064 = vmatprep.subr.mxu0 %v5265_v36 }
 0x85d   : > { %3065 = vmatpush3.msra.mxu0 %v2627_v56 }
 0x85e   : > { %3066 = vmatprep.subr.mxu0 %v5265_v36 }
 0x85f   : > { %3067 = vmatpush3.msra.mxu0 %v2626_v10 }
 0x860   : > { %3068 = vmatprep.subr.mxu0 %v5265_v36 }
 0x861   : > { %3069 = vmatpush3.msra.mxu0 %v2625_v61 }
 0x862   : > { %3070 = vmatprep.subr.mxu0 %v5265_v36 }
 0x863   : > { %3071 = vmatpush3.msra.mxu0 %v2624_v34 }
 0x869   : > { %v3310_v3 = vpop.eup %3309 }
 0x86a   : > { %v2442_v53 = vmul.f32 %v3310_v3, %v3308_v45 }
 0x86c   : > { %3038 = vmatmul.mubr.f32.vlgmr.msra.gmra.mxu1 %v2442_v53 }
 0x92c   : > { %v2611_v52 = vpop.f32.mrf.mxu1 }
 0x92d   : > { %v2612_v2 = vadd.f32 %v2611_v52, %v2541_v39 }
 0x92e   : > { %v3039_v13 = vpop.f32.mrf.mxu1 }
 0x92f   : > { %v2622_v14 = vadd.f32 %v2912_v5, %v2612_v2 }
 0x931   : > { %3311 = vtanh.f32 %v2622_v14 }
 0x93e   : > { %v3312_v17 = vpop.eup %3311 }
 0x93f   : > { %3073 = vmatmul.mubr.f32.vlgmr.msra.gmra.mxu0 %v3312_v17 }
 0x9ff   : > { %v2713_v36 = vpop.f32.mrf.mxu0 }
 0xa00   : > { %v2714_v19 = vadd.f32 %v2913_v18, %v2713_v36 }
 0xa01   : > { %v3074_v20 = vpop.f32.mrf.mxu0 }
 0xa02   : > { %2717 = vst [vmem:[%s384_s26] sm:$0xff] %v2714_v19 }
 0xa03   : > { %3494 = shalt.err (!%p3491_p8)
}
 0xa04   : > { %s3495_s14 = scalar_lea.hbm %s4941_s27, 128  ;;  %s3499_s18 = scalar_lea.hbm %s4985_s9, 256 }
 0xa05   : > { %p3496_p13 = scmp.ne.s32.totalorder %s4941_s27, %s3495_s14  ;;  %p3500_p1 = scmp.lt.s32.totalorder %s4941_s27, %s4985_s9 }
 0xa06   : > { %p3501_p12 = scmp.lt.s32.totalorder %s3499_s18, %s3495_s14 }
 0xa07   : > { %p3497_p11 = pnand %p3496_p13, %p3656_p5 }
 0xa08   : > { %p3502_p10 = por %p3501_p12, %p3500_p1 }
 0xa09   : > { %p3498_p0 = pneg %p3497_p11 }
 0xa0b   : > { %p3503_p3 = pnand %p3502_p10, %p3498_p0 }
 0xa0d   : > { %3506 = shalt.err (!%p3503_p3)
}
 0xa0e   : > { %3099 = dma.vmem_to_hbm [thread:$0]  (%p3656_p5), %s2733_s17, 128, %s4941_s27, %s2719_s23  }
 0xa0f PF: > { %p3126_p2 = scmp.ge.s32.totalorder %s3553_s12, 2  ;;  %s2744_s25 = sand.u32 1, %s3541_s30  }
 0xa10   : > { %p5276_p4 = scmp.ne.s32.totalorder %s5086_s20, 0  ;;  %s2745_s21 = scalar_lea.sflag [#allocation5], %s2744_s25 }
 0xa12   : > { %p3115_p7 = pnand %p3126_p2, %p5276_p4 }
 0xa14   : > { %p3116_p6 = pneg %p3115_p7 }
 0xa16   : > { %3536 = dma.done.wait (%p3116_p6), %s2745_s21, 128  }
 0xa17   : > { %3538 = vsyncadd (%p3116_p6), %s2745_s21, 4294967168  ;;  %s5277_s24 = sld [smem:[#allocation16_spill]]  ;;  %p22_p9 = scmp.ge.s32.totalorder %s3643_s15, 4  }
 0xa18   : > { %s5278_s30 = smov %s3545_s10  ;;  %s5279_s10 = smov %s3549_s11 }
 0xa19   : > { %s5281_s12 = smov %s3643_s15  ;;  %24 = sbr.rel (!%p22_p9) target bundleno = 6 (0x6), region = 116 }
 0xa1d   : > { %s5280_s11 = smov %s5277_s24 }
 0xa1e   :  { %2750 = vsyncpa [#allocation4], 1 }
 0xa1f   :  { %2752 = vsyncpa [#allocation4 + $0x1], 1 }
 0xa20   :  { %2753 = vsyncpa [#allocation7], 1 }
 0xa21   :  { %2754 = vsyncpa [#allocation10], 1 }
 0xa22   :  { %2755 = vsyncpa [#allocation5], 1 }
 0xa23   :  { %2757 = vsyncpa [#allocation5 + $0x1], 1 }

</bundles_post_ra>
